<compile_context>
chip_gen: v7x
topology: tpu7x:2x2x1
jax: 0.10.0
libtpu: 0.0.40
codegen_flags: <defaults>
</compile_context>

<pallas_src>
import math

import jax
import jax.numpy as jnp
from jax.experimental import pallas as pl
from jax.experimental.pallas import tpu as pltpu

_C = 3    # in/out channels of the shared Conv2d(3, 3, 3)
_K = 3    # kernel size


def _fused_conv3_kernel(w_ref, b_ref, x_ref, o_ref):
    """Three chained valid 3x3 convs (shared weights), ReLU after the first two.

    w_ref: SMEM (81,) f32 — OIHW weights flattened row-major
    b_ref: SMEM (3,)  f32
    x_ref: VMEM (nb, 3, H, W)
    o_ref: VMEM (nb, 3, H-6, W-6)
    """
    nb, _, H, W = x_ref.shape
    Ho, Wo = o_ref.shape[2], o_ref.shape[3]

    # kw shifts via XLU roll only when the lane dim is 128-aligned; otherwise
    # fall back to lane slicing (correct for any W, e.g. the W=16 test shape).
    lane_roll = (W % 128) == 0

    # Hoist the 81 weight scalars + 3 biases out of the three layers: they are
    # shared across layers and JAX does not CSE repeated SMEM reads / splats.
    wv = [[[[w_ref[((co * _C + ci) * _K + kh) * _K + kw]
             for kw in range(_K)] for kh in range(_K)]
           for ci in range(_C)] for co in range(_C)]
    bv = [b_ref[co] for co in range(_C)]

    def conv_layer(chans, apply_relu):
        # chans: list of _C planes of shape (nb, Hin, Win)
        Hin, Win = chans[0].shape[1], chans[0].shape[2]
        Hout = Hin - (_K - 1)
        Wout = Win if lane_roll else Win - (_K - 1)
        # Accumulators start at the broadcast bias (saves a full-tile add).
        accs = [jnp.full((nb, Hout, Wout), bv[co], jnp.float32)
                for co in range(_C)]
        # Input channel outermost: at most one channel's taps live at a time.
        for ci in range(_C):
            plane = chans[ci]
            for kh in range(_K):
                rows = plane[:, kh:kh + Hout, :]
                for kw in range(_K):
                    if lane_roll:
                        # Lane shift on the (idle) XLU; wrap-around garbage
                        # lands only in columns trimmed before the final store
                        # and never feeds a valid output column.
                        tap = rows if kw == 0 else pltpu.roll(
                            rows, shift=Win - kw, axis=2)
                    else:
                        tap = rows[:, :, kw:kw + Wout]
                    for co in range(_C):
                        accs[co] = accs[co] + wv[co][ci][kh][kw] * tap
        if apply_relu:
            accs = [jnp.maximum(a, 0.0) for a in accs]
        return accs

    x = x_ref[...]
    y = [x[:, c, :, :] for c in range(_C)]
    y = conv_layer(y, apply_relu=True)    # conv1 + relu
    y = conv_layer(y, apply_relu=True)    # conv2 + relu
    y = conv_layer(y, apply_relu=False)   # conv3

    # One coalesced wide store instead of 3 narrow per-channel masked stores.
    out = jnp.stack(y, axis=1)
    if lane_roll:
        out = out[:, :, :, :Wo]
    o_ref[...] = out.astype(o_ref.dtype)


def _pick_batch_block(n, h, w, ho, wo):
    """Largest batch block that divides N, keeps the in+out tile small, and
    (when N > 1) leaves >= 2 grid steps for pipelining / megacore."""
    budget = 2 * 1024 * 1024                      # bytes per (in + out) tile
    per_n = 4 * _C * (h * w + ho * wo)            # f32
    best = 1
    for cand in range(n, 0, -1):
        if n % cand:
            continue
        if cand * per_n > budget:
            continue
        if n // cand >= 2 or n == 1:
            best = cand
            break
    return best


@jax.jit
def model_forward(x_nchw, w_oihw, b):
    """x: (N, 3, H, W) NCHW, w: (3, 3, 3, 3) OIHW, b: (3,) — returns NCHW."""
    N, C, H, W = x_nchw.shape
    Ho, Wo = H - 3 * (_K - 1), W - 3 * (_K - 1)
    nb = _pick_batch_block(N, H, W, Ho, Wo)
    w_flat = w_oihw.reshape(-1).astype(jnp.float32)   # OIHW row-major
    b_flat = b.astype(jnp.float32)
    # TODO(synk): for images too large for the per-tile VMEM budget, also tile
    # H with a 6-row halo (2 rows lost per conv x 3 chained convs).
    # TODO(synk): on v6e/v7x, bf16 intermediate storage with f32 accumulation
    # would halve VMEM footprint (skipped here to keep the f32 1e-5 tolerance).
    return pl.pallas_call(
        _fused_conv3_kernel,
        grid=(N // nb,),
        out_shape=jax.ShapeDtypeStruct((N, _C, Ho, Wo), x_nchw.dtype),
        in_specs=[
            pl.BlockSpec(memory_space=pltpu.MemorySpace.SMEM),        # weights
            pl.BlockSpec(memory_space=pltpu.MemorySpace.SMEM),        # bias
            pl.BlockSpec((nb, _C, H, W), lambda n: (n, 0, 0, 0)),     # acts
        ],
        out_specs=pl.BlockSpec((nb, _C, Ho, Wo), lambda n: (n, 0, 0, 0)),
        compiler_params=pltpu.CompilerParams(
            dimension_semantics=("parallel",),
            vmem_limit_bytes=32 * 1024 * 1024),
    )(w_flat, b_flat, x_nchw)


def _reference(x_nchw, w_oihw, b):
    def conv(x):
        y = jax.lax.conv_general_dilated(
            x, w_oihw, window_strides=(1, 1), padding="VALID",
            dimension_numbers=("NCHW", "OIHW", "NCHW"))
        return y + b.reshape(1, -1, 1, 1)

    y = jax.nn.relu(conv(x_nchw))
    y = jax.nn.relu(conv(y))
    return conv(y)


if __name__ == "__main__":
    key = jax.random.PRNGKey(0)
    kx, kw, kb = jax.random.split(key, 3)

    # Conv2d(3, 3, 3) applied three times with valid padding needs spatial >= 7;
    # use batch=2, channels=3, spatial=16 -> output (2, 3, 10, 10).
    x = jax.random.normal(kx, (2, 3, 16, 16), dtype=jnp.float32)

    # Deterministic PyTorch-style Conv2d init: U(-1/sqrt(fan_in), 1/sqrt(fan_in))
    fan_in = _C * _K * _K
    bound = 1.0 / math.sqrt(fan_in)
    w = jax.random.uniform(kw, (_C, _C, _K, _K), jnp.float32, -bound, bound)  # OIHW
    b = jax.random.uniform(kb, (_C,), jnp.float32, -bound, bound)

    out = jax.block_until_ready(model_forward(x, w, b))
    ref = jax.block_until_ready(_reference(x, w, b))

    assert out.shape == (2, 3, 10, 10), out.shape
    assert jnp.allclose(out, ref, atol=1e-5, rtol=1e-5), float(
        jnp.max(jnp.abs(out - ref)))
    print("KERNEL_OK")
</pallas_src>

<mosaic_0001>
module attributes {stable_mosaic.version = 11 : i64} {
  func.func @_fused_conv3_kernel(%arg0: i32, %arg1: memref<81xf32, #tpu.memory_space<smem>>, %arg2: memref<3xf32, #tpu.memory_space<smem>>, %arg3: memref<1x3x16x16xf32, #tpu.memory_space<vmem>>, %arg4: memref<1x3x10x10xf32, #tpu.memory_space<vmem>>) attributes {dimension_semantics = [#tpu.dimension_semantics<parallel>], iteration_bounds = array<i64: 2>, scalar_prefetch = 0 : i64, scratch_operands = 0 : i64, tpu.core_type = #tpu.core_type<tc>, window_params = [{transform_indices = @transform_0, window_bounds = array<i64: 81>}, {transform_indices = @transform_1, window_bounds = array<i64: 3>}, {transform_indices = @transform_2, window_bounds = array<i64: 1, 3, 16, 16>}, {transform_indices = @transform_3, window_bounds = array<i64: 1, 3, 10, 10>}]} {
    %c0 = arith.constant 0 : index
    %0 = memref.load %arg1[%c0] : memref<81xf32, #tpu.memory_space<smem>>
    %c1 = arith.constant 1 : index
    %1 = memref.load %arg1[%c1] : memref<81xf32, #tpu.memory_space<smem>>
    %c2 = arith.constant 2 : index
    %2 = memref.load %arg1[%c2] : memref<81xf32, #tpu.memory_space<smem>>
    %c3 = arith.constant 3 : index
    %3 = memref.load %arg1[%c3] : memref<81xf32, #tpu.memory_space<smem>>
    %c4 = arith.constant 4 : index
    %4 = memref.load %arg1[%c4] : memref<81xf32, #tpu.memory_space<smem>>
    %c5 = arith.constant 5 : index
    %5 = memref.load %arg1[%c5] : memref<81xf32, #tpu.memory_space<smem>>
    %c6 = arith.constant 6 : index
    %6 = memref.load %arg1[%c6] : memref<81xf32, #tpu.memory_space<smem>>
    %c7 = arith.constant 7 : index
    %7 = memref.load %arg1[%c7] : memref<81xf32, #tpu.memory_space<smem>>
    %c8 = arith.constant 8 : index
    %8 = memref.load %arg1[%c8] : memref<81xf32, #tpu.memory_space<smem>>
    %c9 = arith.constant 9 : index
    %9 = memref.load %arg1[%c9] : memref<81xf32, #tpu.memory_space<smem>>
    %c10 = arith.constant 10 : index
    %10 = memref.load %arg1[%c10] : memref<81xf32, #tpu.memory_space<smem>>
    %c11 = arith.constant 11 : index
    %11 = memref.load %arg1[%c11] : memref<81xf32, #tpu.memory_space<smem>>
    %c12 = arith.constant 12 : index
    %12 = memref.load %arg1[%c12] : memref<81xf32, #tpu.memory_space<smem>>
    %c13 = arith.constant 13 : index
    %13 = memref.load %arg1[%c13] : memref<81xf32, #tpu.memory_space<smem>>
    %c14 = arith.constant 14 : index
    %14 = memref.load %arg1[%c14] : memref<81xf32, #tpu.memory_space<smem>>
    %c15 = arith.constant 15 : index
    %15 = memref.load %arg1[%c15] : memref<81xf32, #tpu.memory_space<smem>>
    %c16 = arith.constant 16 : index
    %16 = memref.load %arg1[%c16] : memref<81xf32, #tpu.memory_space<smem>>
    %c17 = arith.constant 17 : index
    %17 = memref.load %arg1[%c17] : memref<81xf32, #tpu.memory_space<smem>>
    %c18 = arith.constant 18 : index
    %18 = memref.load %arg1[%c18] : memref<81xf32, #tpu.memory_space<smem>>
    %c19 = arith.constant 19 : index
    %19 = memref.load %arg1[%c19] : memref<81xf32, #tpu.memory_space<smem>>
    %c20 = arith.constant 20 : index
    %20 = memref.load %arg1[%c20] : memref<81xf32, #tpu.memory_space<smem>>
    %c21 = arith.constant 21 : index
    %21 = memref.load %arg1[%c21] : memref<81xf32, #tpu.memory_space<smem>>
    %c22 = arith.constant 22 : index
    %22 = memref.load %arg1[%c22] : memref<81xf32, #tpu.memory_space<smem>>
    %c23 = arith.constant 23 : index
    %23 = memref.load %arg1[%c23] : memref<81xf32, #tpu.memory_space<smem>>
    %c24 = arith.constant 24 : index
    %24 = memref.load %arg1[%c24] : memref<81xf32, #tpu.memory_space<smem>>
    %c25 = arith.constant 25 : index
    %25 = memref.load %arg1[%c25] : memref<81xf32, #tpu.memory_space<smem>>
    %c26 = arith.constant 26 : index
    %26 = memref.load %arg1[%c26] : memref<81xf32, #tpu.memory_space<smem>>
    %c27 = arith.constant 27 : index
    %27 = memref.load %arg1[%c27] : memref<81xf32, #tpu.memory_space<smem>>
    %c28 = arith.constant 28 : index
    %28 = memref.load %arg1[%c28] : memref<81xf32, #tpu.memory_space<smem>>
    %c29 = arith.constant 29 : index
    %29 = memref.load %arg1[%c29] : memref<81xf32, #tpu.memory_space<smem>>
    %c30 = arith.constant 30 : index
    %30 = memref.load %arg1[%c30] : memref<81xf32, #tpu.memory_space<smem>>
    %c31 = arith.constant 31 : index
    %31 = memref.load %arg1[%c31] : memref<81xf32, #tpu.memory_space<smem>>
    %c32 = arith.constant 32 : index
    %32 = memref.load %arg1[%c32] : memref<81xf32, #tpu.memory_space<smem>>
    %c33 = arith.constant 33 : index
    %33 = memref.load %arg1[%c33] : memref<81xf32, #tpu.memory_space<smem>>
    %c34 = arith.constant 34 : index
    %34 = memref.load %arg1[%c34] : memref<81xf32, #tpu.memory_space<smem>>
    %c35 = arith.constant 35 : index
    %35 = memref.load %arg1[%c35] : memref<81xf32, #tpu.memory_space<smem>>
    %c36 = arith.constant 36 : index
    %36 = memref.load %arg1[%c36] : memref<81xf32, #tpu.memory_space<smem>>
    %c37 = arith.constant 37 : index
    %37 = memref.load %arg1[%c37] : memref<81xf32, #tpu.memory_space<smem>>
    %c38 = arith.constant 38 : index
    %38 = memref.load %arg1[%c38] : memref<81xf32, #tpu.memory_space<smem>>
    %c39 = arith.constant 39 : index
    %39 = memref.load %arg1[%c39] : memref<81xf32, #tpu.memory_space<smem>>
    %c40 = arith.constant 40 : index
    %40 = memref.load %arg1[%c40] : memref<81xf32, #tpu.memory_space<smem>>
    %c41 = arith.constant 41 : index
    %41 = memref.load %arg1[%c41] : memref<81xf32, #tpu.memory_space<smem>>
    %c42 = arith.constant 42 : index
    %42 = memref.load %arg1[%c42] : memref<81xf32, #tpu.memory_space<smem>>
    %c43 = arith.constant 43 : index
    %43 = memref.load %arg1[%c43] : memref<81xf32, #tpu.memory_space<smem>>
    %c44 = arith.constant 44 : index
    %44 = memref.load %arg1[%c44] : memref<81xf32, #tpu.memory_space<smem>>
    %c45 = arith.constant 45 : index
    %45 = memref.load %arg1[%c45] : memref<81xf32, #tpu.memory_space<smem>>
    %c46 = arith.constant 46 : index
    %46 = memref.load %arg1[%c46] : memref<81xf32, #tpu.memory_space<smem>>
    %c47 = arith.constant 47 : index
    %47 = memref.load %arg1[%c47] : memref<81xf32, #tpu.memory_space<smem>>
    %c48 = arith.constant 48 : index
    %48 = memref.load %arg1[%c48] : memref<81xf32, #tpu.memory_space<smem>>
    %c49 = arith.constant 49 : index
    %49 = memref.load %arg1[%c49] : memref<81xf32, #tpu.memory_space<smem>>
    %c50 = arith.constant 50 : index
    %50 = memref.load %arg1[%c50] : memref<81xf32, #tpu.memory_space<smem>>
    %c51 = arith.constant 51 : index
    %51 = memref.load %arg1[%c51] : memref<81xf32, #tpu.memory_space<smem>>
    %c52 = arith.constant 52 : index
    %52 = memref.load %arg1[%c52] : memref<81xf32, #tpu.memory_space<smem>>
    %c53 = arith.constant 53 : index
    %53 = memref.load %arg1[%c53] : memref<81xf32, #tpu.memory_space<smem>>
    %c54 = arith.constant 54 : index
    %54 = memref.load %arg1[%c54] : memref<81xf32, #tpu.memory_space<smem>>
    %c55 = arith.constant 55 : index
    %55 = memref.load %arg1[%c55] : memref<81xf32, #tpu.memory_space<smem>>
    %c56 = arith.constant 56 : index
    %56 = memref.load %arg1[%c56] : memref<81xf32, #tpu.memory_space<smem>>
    %c57 = arith.constant 57 : index
    %57 = memref.load %arg1[%c57] : memref<81xf32, #tpu.memory_space<smem>>
    %c58 = arith.constant 58 : index
    %58 = memref.load %arg1[%c58] : memref<81xf32, #tpu.memory_space<smem>>
    %c59 = arith.constant 59 : index
    %59 = memref.load %arg1[%c59] : memref<81xf32, #tpu.memory_space<smem>>
    %c60 = arith.constant 60 : index
    %60 = memref.load %arg1[%c60] : memref<81xf32, #tpu.memory_space<smem>>
    %c61 = arith.constant 61 : index
    %61 = memref.load %arg1[%c61] : memref<81xf32, #tpu.memory_space<smem>>
    %c62 = arith.constant 62 : index
    %62 = memref.load %arg1[%c62] : memref<81xf32, #tpu.memory_space<smem>>
    %c63 = arith.constant 63 : index
    %63 = memref.load %arg1[%c63] : memref<81xf32, #tpu.memory_space<smem>>
    %c64 = arith.constant 64 : index
    %64 = memref.load %arg1[%c64] : memref<81xf32, #tpu.memory_space<smem>>
    %c65 = arith.constant 65 : index
    %65 = memref.load %arg1[%c65] : memref<81xf32, #tpu.memory_space<smem>>
    %c66 = arith.constant 66 : index
    %66 = memref.load %arg1[%c66] : memref<81xf32, #tpu.memory_space<smem>>
    %c67 = arith.constant 67 : index
    %67 = memref.load %arg1[%c67] : memref<81xf32, #tpu.memory_space<smem>>
    %c68 = arith.constant 68 : index
    %68 = memref.load %arg1[%c68] : memref<81xf32, #tpu.memory_space<smem>>
    %c69 = arith.constant 69 : index
    %69 = memref.load %arg1[%c69] : memref<81xf32, #tpu.memory_space<smem>>
    %c70 = arith.constant 70 : index
    %70 = memref.load %arg1[%c70] : memref<81xf32, #tpu.memory_space<smem>>
    %c71 = arith.constant 71 : index
    %71 = memref.load %arg1[%c71] : memref<81xf32, #tpu.memory_space<smem>>
    %c72 = arith.constant 72 : index
    %72 = memref.load %arg1[%c72] : memref<81xf32, #tpu.memory_space<smem>>
    %c73 = arith.constant 73 : index
    %73 = memref.load %arg1[%c73] : memref<81xf32, #tpu.memory_space<smem>>
    %c74 = arith.constant 74 : index
    %74 = memref.load %arg1[%c74] : memref<81xf32, #tpu.memory_space<smem>>
    %c75 = arith.constant 75 : index
    %75 = memref.load %arg1[%c75] : memref<81xf32, #tpu.memory_space<smem>>
    %c76 = arith.constant 76 : index
    %76 = memref.load %arg1[%c76] : memref<81xf32, #tpu.memory_space<smem>>
    %c77 = arith.constant 77 : index
    %77 = memref.load %arg1[%c77] : memref<81xf32, #tpu.memory_space<smem>>
    %c78 = arith.constant 78 : index
    %78 = memref.load %arg1[%c78] : memref<81xf32, #tpu.memory_space<smem>>
    %c79 = arith.constant 79 : index
    %79 = memref.load %arg1[%c79] : memref<81xf32, #tpu.memory_space<smem>>
    %c80 = arith.constant 80 : index
    %80 = memref.load %arg1[%c80] : memref<81xf32, #tpu.memory_space<smem>>
    %c0_0 = arith.constant 0 : index
    %81 = memref.load %arg2[%c0_0] : memref<3xf32, #tpu.memory_space<smem>>
    %c1_1 = arith.constant 1 : index
    %82 = memref.load %arg2[%c1_1] : memref<3xf32, #tpu.memory_space<smem>>
    %c2_2 = arith.constant 2 : index
    %83 = memref.load %arg2[%c2_2] : memref<3xf32, #tpu.memory_space<smem>>
    %c0_3 = arith.constant 0 : index
    %c0_4 = arith.constant 0 : index
    %c0_5 = arith.constant 0 : index
    %c0_6 = arith.constant 0 : index
    %84 = vector.load %arg3[%c0_3, %c0_4, %c0_5, %c0_6] : memref<1x3x16x16xf32, #tpu.memory_space<vmem>>, vector<1x3x16x16xf32>
    %85 = vector.extract_strided_slice %84 {offsets = [0, 0, 0, 0], sizes = [1, 1, 16, 16], strides = [1, 1, 1, 1]} : vector<1x3x16x16xf32> to vector<1x1x16x16xf32>
    %86 = vector.shape_cast %85 : vector<1x1x16x16xf32> to vector<1x16x16xf32>
    %87 = vector.extract_strided_slice %84 {offsets = [0, 1, 0, 0], sizes = [1, 1, 16, 16], strides = [1, 1, 1, 1]} : vector<1x3x16x16xf32> to vector<1x1x16x16xf32>
    %88 = vector.shape_cast %87 : vector<1x1x16x16xf32> to vector<1x16x16xf32>
    %89 = vector.extract_strided_slice %84 {offsets = [0, 2, 0, 0], sizes = [1, 1, 16, 16], strides = [1, 1, 1, 1]} : vector<1x3x16x16xf32> to vector<1x1x16x16xf32>
    %90 = vector.shape_cast %89 : vector<1x1x16x16xf32> to vector<1x16x16xf32>
    %91 = vector.broadcast %81 : f32 to vector<1x14x14xf32>
    %92 = vector.broadcast %82 : f32 to vector<1x14x14xf32>
    %93 = vector.broadcast %83 : f32 to vector<1x14x14xf32>
    %94 = vector.extract_strided_slice %86 {offsets = [0, 0, 0], sizes = [1, 14, 16], strides = [1, 1, 1]} : vector<1x16x16xf32> to vector<1x14x16xf32>
    %95 = vector.extract_strided_slice %94 {offsets = [0, 0, 0], sizes = [1, 14, 14], strides = [1, 1, 1]} : vector<1x14x16xf32> to vector<1x14x14xf32>
    %96 = vector.broadcast %0 : f32 to vector<1x14x14xf32>
    %97 = arith.mulf %96, %95 : vector<1x14x14xf32>
    %98 = arith.addf %91, %97 : vector<1x14x14xf32>
    %99 = vector.broadcast %27 : f32 to vector<1x14x14xf32>
    %100 = arith.mulf %99, %95 : vector<1x14x14xf32>
    %101 = arith.addf %92, %100 : vector<1x14x14xf32>
    %102 = vector.broadcast %54 : f32 to vector<1x14x14xf32>
    %103 = arith.mulf %102, %95 : vector<1x14x14xf32>
    %104 = arith.addf %93, %103 : vector<1x14x14xf32>
    %105 = vector.extract_strided_slice %94 {offsets = [0, 0, 1], sizes = [1, 14, 14], strides = [1, 1, 1]} : vector<1x14x16xf32> to vector<1x14x14xf32>
    %106 = vector.broadcast %1 : f32 to vector<1x14x14xf32>
    %107 = arith.mulf %106, %105 : vector<1x14x14xf32>
    %108 = arith.addf %98, %107 : vector<1x14x14xf32>
    %109 = vector.broadcast %28 : f32 to vector<1x14x14xf32>
    %110 = arith.mulf %109, %105 : vector<1x14x14xf32>
    %111 = arith.addf %101, %110 : vector<1x14x14xf32>
    %112 = vector.broadcast %55 : f32 to vector<1x14x14xf32>
    %113 = arith.mulf %112, %105 : vector<1x14x14xf32>
    %114 = arith.addf %104, %113 : vector<1x14x14xf32>
    %115 = vector.extract_strided_slice %94 {offsets = [0, 0, 2], sizes = [1, 14, 14], strides = [1, 1, 1]} : vector<1x14x16xf32> to vector<1x14x14xf32>
    %116 = vector.broadcast %2 : f32 to vector<1x14x14xf32>
    %117 = arith.mulf %116, %115 : vector<1x14x14xf32>
    %118 = arith.addf %108, %117 : vector<1x14x14xf32>
    %119 = vector.broadcast %29 : f32 to vector<1x14x14xf32>
    %120 = arith.mulf %119, %115 : vector<1x14x14xf32>
    %121 = arith.addf %111, %120 : vector<1x14x14xf32>
    %122 = vector.broadcast %56 : f32 to vector<1x14x14xf32>
    %123 = arith.mulf %122, %115 : vector<1x14x14xf32>
    %124 = arith.addf %114, %123 : vector<1x14x14xf32>
    %125 = vector.extract_strided_slice %86 {offsets = [0, 1, 0], sizes = [1, 14, 16], strides = [1, 1, 1]} : vector<1x16x16xf32> to vector<1x14x16xf32>
    %126 = vector.extract_strided_slice %125 {offsets = [0, 0, 0], sizes = [1, 14, 14], strides = [1, 1, 1]} : vector<1x14x16xf32> to vector<1x14x14xf32>
    %127 = vector.broadcast %3 : f32 to vector<1x14x14xf32>
    %128 = arith.mulf %127, %126 : vector<1x14x14xf32>
    %129 = arith.addf %118, %128 : vector<1x14x14xf32>
    %130 = vector.broadcast %30 : f32 to vector<1x14x14xf32>
    %131 = arith.mulf %130, %126 : vector<1x14x14xf32>
    %132 = arith.addf %121, %131 : vector<1x14x14xf32>
    %133 = vector.broadcast %57 : f32 to vector<1x14x14xf32>
    %134 = arith.mulf %133, %126 : vector<1x14x14xf32>
    %135 = arith.addf %124, %134 : vector<1x14x14xf32>
    %136 = vector.extract_strided_slice %125 {offsets = [0, 0, 1], sizes = [1, 14, 14], strides = [1, 1, 1]} : vector<1x14x16xf32> to vector<1x14x14xf32>
    %137 = vector.broadcast %4 : f32 to vector<1x14x14xf32>
    %138 = arith.mulf %137, %136 : vector<1x14x14xf32>
    %139 = arith.addf %129, %138 : vector<1x14x14xf32>
    %140 = vector.broadcast %31 : f32 to vector<1x14x14xf32>
    %141 = arith.mulf %140, %136 : vector<1x14x14xf32>
    %142 = arith.addf %132, %141 : vector<1x14x14xf32>
    %143 = vector.broadcast %58 : f32 to vector<1x14x14xf32>
    %144 = arith.mulf %143, %136 : vector<1x14x14xf32>
    %145 = arith.addf %135, %144 : vector<1x14x14xf32>
    %146 = vector.extract_strided_slice %125 {offsets = [0, 0, 2], sizes = [1, 14, 14], strides = [1, 1, 1]} : vector<1x14x16xf32> to vector<1x14x14xf32>
    %147 = vector.broadcast %5 : f32 to vector<1x14x14xf32>
    %148 = arith.mulf %147, %146 : vector<1x14x14xf32>
    %149 = arith.addf %139, %148 : vector<1x14x14xf32>
    %150 = vector.broadcast %32 : f32 to vector<1x14x14xf32>
    %151 = arith.mulf %150, %146 : vector<1x14x14xf32>
    %152 = arith.addf %142, %151 : vector<1x14x14xf32>
    %153 = vector.broadcast %59 : f32 to vector<1x14x14xf32>
    %154 = arith.mulf %153, %146 : vector<1x14x14xf32>
    %155 = arith.addf %145, %154 : vector<1x14x14xf32>
    %156 = vector.extract_strided_slice %86 {offsets = [0, 2, 0], sizes = [1, 14, 16], strides = [1, 1, 1]} : vector<1x16x16xf32> to vector<1x14x16xf32>
    %157 = vector.extract_strided_slice %156 {offsets = [0, 0, 0], sizes = [1, 14, 14], strides = [1, 1, 1]} : vector<1x14x16xf32> to vector<1x14x14xf32>
    %158 = vector.broadcast %6 : f32 to vector<1x14x14xf32>
    %159 = arith.mulf %158, %157 : vector<1x14x14xf32>
    %160 = arith.addf %149, %159 : vector<1x14x14xf32>
    %161 = vector.broadcast %33 : f32 to vector<1x14x14xf32>
    %162 = arith.mulf %161, %157 : vector<1x14x14xf32>
    %163 = arith.addf %152, %162 : vector<1x14x14xf32>
    %164 = vector.broadcast %60 : f32 to vector<1x14x14xf32>
    %165 = arith.mulf %164, %157 : vector<1x14x14xf32>
    %166 = arith.addf %155, %165 : vector<1x14x14xf32>
    %167 = vector.extract_strided_slice %156 {offsets = [0, 0, 1], sizes = [1, 14, 14], strides = [1, 1, 1]} : vector<1x14x16xf32> to vector<1x14x14xf32>
    %168 = vector.broadcast %7 : f32 to vector<1x14x14xf32>
    %169 = arith.mulf %168, %167 : vector<1x14x14xf32>
    %170 = arith.addf %160, %169 : vector<1x14x14xf32>
    %171 = vector.broadcast %34 : f32 to vector<1x14x14xf32>
    %172 = arith.mulf %171, %167 : vector<1x14x14xf32>
    %173 = arith.addf %163, %172 : vector<1x14x14xf32>
    %174 = vector.broadcast %61 : f32 to vector<1x14x14xf32>
    %175 = arith.mulf %174, %167 : vector<1x14x14xf32>
    %176 = arith.addf %166, %175 : vector<1x14x14xf32>
    %177 = vector.extract_strided_slice %156 {offsets = [0, 0, 2], sizes = [1, 14, 14], strides = [1, 1, 1]} : vector<1x14x16xf32> to vector<1x14x14xf32>
    %178 = vector.broadcast %8 : f32 to vector<1x14x14xf32>
    %179 = arith.mulf %178, %177 : vector<1x14x14xf32>
    %180 = arith.addf %170, %179 : vector<1x14x14xf32>
    %181 = vector.broadcast %35 : f32 to vector<1x14x14xf32>
    %182 = arith.mulf %181, %177 : vector<1x14x14xf32>
    %183 = arith.addf %173, %182 : vector<1x14x14xf32>
    %184 = vector.broadcast %62 : f32 to vector<1x14x14xf32>
    %185 = arith.mulf %184, %177 : vector<1x14x14xf32>
    %186 = arith.addf %176, %185 : vector<1x14x14xf32>
    %187 = vector.extract_strided_slice %88 {offsets = [0, 0, 0], sizes = [1, 14, 16], strides = [1, 1, 1]} : vector<1x16x16xf32> to vector<1x14x16xf32>
    %188 = vector.extract_strided_slice %187 {offsets = [0, 0, 0], sizes = [1, 14, 14], strides = [1, 1, 1]} : vector<1x14x16xf32> to vector<1x14x14xf32>
    %189 = vector.broadcast %9 : f32 to vector<1x14x14xf32>
    %190 = arith.mulf %189, %188 : vector<1x14x14xf32>
    %191 = arith.addf %180, %190 : vector<1x14x14xf32>
    %192 = vector.broadcast %36 : f32 to vector<1x14x14xf32>
    %193 = arith.mulf %192, %188 : vector<1x14x14xf32>
    %194 = arith.addf %183, %193 : vector<1x14x14xf32>
    %195 = vector.broadcast %63 : f32 to vector<1x14x14xf32>
    %196 = arith.mulf %195, %188 : vector<1x14x14xf32>
    %197 = arith.addf %186, %196 : vector<1x14x14xf32>
    %198 = vector.extract_strided_slice %187 {offsets = [0, 0, 1], sizes = [1, 14, 14], strides = [1, 1, 1]} : vector<1x14x16xf32> to vector<1x14x14xf32>
    %199 = vector.broadcast %10 : f32 to vector<1x14x14xf32>
    %200 = arith.mulf %199, %198 : vector<1x14x14xf32>
    %201 = arith.addf %191, %200 : vector<1x14x14xf32>
    %202 = vector.broadcast %37 : f32 to vector<1x14x14xf32>
    %203 = arith.mulf %202, %198 : vector<1x14x14xf32>
    %204 = arith.addf %194, %203 : vector<1x14x14xf32>
    %205 = vector.broadcast %64 : f32 to vector<1x14x14xf32>
    %206 = arith.mulf %205, %198 : vector<1x14x14xf32>
    %207 = arith.addf %197, %206 : vector<1x14x14xf32>
    %208 = vector.extract_strided_slice %187 {offsets = [0, 0, 2], sizes = [1, 14, 14], strides = [1, 1, 1]} : vector<1x14x16xf32> to vector<1x14x14xf32>
    %209 = vector.broadcast %11 : f32 to vector<1x14x14xf32>
    %210 = arith.mulf %209, %208 : vector<1x14x14xf32>
    %211 = arith.addf %201, %210 : vector<1x14x14xf32>
    %212 = vector.broadcast %38 : f32 to vector<1x14x14xf32>
    %213 = arith.mulf %212, %208 : vector<1x14x14xf32>
    %214 = arith.addf %204, %213 : vector<1x14x14xf32>
    %215 = vector.broadcast %65 : f32 to vector<1x14x14xf32>
    %216 = arith.mulf %215, %208 : vector<1x14x14xf32>
    %217 = arith.addf %207, %216 : vector<1x14x14xf32>
    %218 = vector.extract_strided_slice %88 {offsets = [0, 1, 0], sizes = [1, 14, 16], strides = [1, 1, 1]} : vector<1x16x16xf32> to vector<1x14x16xf32>
    %219 = vector.extract_strided_slice %218 {offsets = [0, 0, 0], sizes = [1, 14, 14], strides = [1, 1, 1]} : vector<1x14x16xf32> to vector<1x14x14xf32>
    %220 = vector.broadcast %12 : f32 to vector<1x14x14xf32>
    %221 = arith.mulf %220, %219 : vector<1x14x14xf32>
    %222 = arith.addf %211, %221 : vector<1x14x14xf32>
    %223 = vector.broadcast %39 : f32 to vector<1x14x14xf32>
    %224 = arith.mulf %223, %219 : vector<1x14x14xf32>
    %225 = arith.addf %214, %224 : vector<1x14x14xf32>
    %226 = vector.broadcast %66 : f32 to vector<1x14x14xf32>
    %227 = arith.mulf %226, %219 : vector<1x14x14xf32>
    %228 = arith.addf %217, %227 : vector<1x14x14xf32>
    %229 = vector.extract_strided_slice %218 {offsets = [0, 0, 1], sizes = [1, 14, 14], strides = [1, 1, 1]} : vector<1x14x16xf32> to vector<1x14x14xf32>
    %230 = vector.broadcast %13 : f32 to vector<1x14x14xf32>
    %231 = arith.mulf %230, %229 : vector<1x14x14xf32>
    %232 = arith.addf %222, %231 : vector<1x14x14xf32>
    %233 = vector.broadcast %40 : f32 to vector<1x14x14xf32>
    %234 = arith.mulf %233, %229 : vector<1x14x14xf32>
    %235 = arith.addf %225, %234 : vector<1x14x14xf32>
    %236 = vector.broadcast %67 : f32 to vector<1x14x14xf32>
    %237 = arith.mulf %236, %229 : vector<1x14x14xf32>
    %238 = arith.addf %228, %237 : vector<1x14x14xf32>
    %239 = vector.extract_strided_slice %218 {offsets = [0, 0, 2], sizes = [1, 14, 14], strides = [1, 1, 1]} : vector<1x14x16xf32> to vector<1x14x14xf32>
    %240 = vector.broadcast %14 : f32 to vector<1x14x14xf32>
    %241 = arith.mulf %240, %239 : vector<1x14x14xf32>
    %242 = arith.addf %232, %241 : vector<1x14x14xf32>
    %243 = vector.broadcast %41 : f32 to vector<1x14x14xf32>
    %244 = arith.mulf %243, %239 : vector<1x14x14xf32>
    %245 = arith.addf %235, %244 : vector<1x14x14xf32>
    %246 = vector.broadcast %68 : f32 to vector<1x14x14xf32>
    %247 = arith.mulf %246, %239 : vector<1x14x14xf32>
    %248 = arith.addf %238, %247 : vector<1x14x14xf32>
    %249 = vector.extract_strided_slice %88 {offsets = [0, 2, 0], sizes = [1, 14, 16], strides = [1, 1, 1]} : vector<1x16x16xf32> to vector<1x14x16xf32>
    %250 = vector.extract_strided_slice %249 {offsets = [0, 0, 0], sizes = [1, 14, 14], strides = [1, 1, 1]} : vector<1x14x16xf32> to vector<1x14x14xf32>
    %251 = vector.broadcast %15 : f32 to vector<1x14x14xf32>
    %252 = arith.mulf %251, %250 : vector<1x14x14xf32>
    %253 = arith.addf %242, %252 : vector<1x14x14xf32>
    %254 = vector.broadcast %42 : f32 to vector<1x14x14xf32>
    %255 = arith.mulf %254, %250 : vector<1x14x14xf32>
    %256 = arith.addf %245, %255 : vector<1x14x14xf32>
    %257 = vector.broadcast %69 : f32 to vector<1x14x14xf32>
    %258 = arith.mulf %257, %250 : vector<1x14x14xf32>
    %259 = arith.addf %248, %258 : vector<1x14x14xf32>
    %260 = vector.extract_strided_slice %249 {offsets = [0, 0, 1], sizes = [1, 14, 14], strides = [1, 1, 1]} : vector<1x14x16xf32> to vector<1x14x14xf32>
    %261 = vector.broadcast %16 : f32 to vector<1x14x14xf32>
    %262 = arith.mulf %261, %260 : vector<1x14x14xf32>
    %263 = arith.addf %253, %262 : vector<1x14x14xf32>
    %264 = vector.broadcast %43 : f32 to vector<1x14x14xf32>
    %265 = arith.mulf %264, %260 : vector<1x14x14xf32>
    %266 = arith.addf %256, %265 : vector<1x14x14xf32>
    %267 = vector.broadcast %70 : f32 to vector<1x14x14xf32>
    %268 = arith.mulf %267, %260 : vector<1x14x14xf32>
    %269 = arith.addf %259, %268 : vector<1x14x14xf32>
    %270 = vector.extract_strided_slice %249 {offsets = [0, 0, 2], sizes = [1, 14, 14], strides = [1, 1, 1]} : vector<1x14x16xf32> to vector<1x14x14xf32>
    %271 = vector.broadcast %17 : f32 to vector<1x14x14xf32>
    %272 = arith.mulf %271, %270 : vector<1x14x14xf32>
    %273 = arith.addf %263, %272 : vector<1x14x14xf32>
    %274 = vector.broadcast %44 : f32 to vector<1x14x14xf32>
    %275 = arith.mulf %274, %270 : vector<1x14x14xf32>
    %276 = arith.addf %266, %275 : vector<1x14x14xf32>
    %277 = vector.broadcast %71 : f32 to vector<1x14x14xf32>
    %278 = arith.mulf %277, %270 : vector<1x14x14xf32>
    %279 = arith.addf %269, %278 : vector<1x14x14xf32>
    %280 = vector.extract_strided_slice %90 {offsets = [0, 0, 0], sizes = [1, 14, 16], strides = [1, 1, 1]} : vector<1x16x16xf32> to vector<1x14x16xf32>
    %281 = vector.extract_strided_slice %280 {offsets = [0, 0, 0], sizes = [1, 14, 14], strides = [1, 1, 1]} : vector<1x14x16xf32> to vector<1x14x14xf32>
    %282 = vector.broadcast %18 : f32 to vector<1x14x14xf32>
    %283 = arith.mulf %282, %281 : vector<1x14x14xf32>
    %284 = arith.addf %273, %283 : vector<1x14x14xf32>
    %285 = vector.broadcast %45 : f32 to vector<1x14x14xf32>
    %286 = arith.mulf %285, %281 : vector<1x14x14xf32>
    %287 = arith.addf %276, %286 : vector<1x14x14xf32>
    %288 = vector.broadcast %72 : f32 to vector<1x14x14xf32>
    %289 = arith.mulf %288, %281 : vector<1x14x14xf32>
    %290 = arith.addf %279, %289 : vector<1x14x14xf32>
    %291 = vector.extract_strided_slice %280 {offsets = [0, 0, 1], sizes = [1, 14, 14], strides = [1, 1, 1]} : vector<1x14x16xf32> to vector<1x14x14xf32>
    %292 = vector.broadcast %19 : f32 to vector<1x14x14xf32>
    %293 = arith.mulf %292, %291 : vector<1x14x14xf32>
    %294 = arith.addf %284, %293 : vector<1x14x14xf32>
    %295 = vector.broadcast %46 : f32 to vector<1x14x14xf32>
    %296 = arith.mulf %295, %291 : vector<1x14x14xf32>
    %297 = arith.addf %287, %296 : vector<1x14x14xf32>
    %298 = vector.broadcast %73 : f32 to vector<1x14x14xf32>
    %299 = arith.mulf %298, %291 : vector<1x14x14xf32>
    %300 = arith.addf %290, %299 : vector<1x14x14xf32>
    %301 = vector.extract_strided_slice %280 {offsets = [0, 0, 2], sizes = [1, 14, 14], strides = [1, 1, 1]} : vector<1x14x16xf32> to vector<1x14x14xf32>
    %302 = vector.broadcast %20 : f32 to vector<1x14x14xf32>
    %303 = arith.mulf %302, %301 : vector<1x14x14xf32>
    %304 = arith.addf %294, %303 : vector<1x14x14xf32>
    %305 = vector.broadcast %47 : f32 to vector<1x14x14xf32>
    %306 = arith.mulf %305, %301 : vector<1x14x14xf32>
    %307 = arith.addf %297, %306 : vector<1x14x14xf32>
    %308 = vector.broadcast %74 : f32 to vector<1x14x14xf32>
    %309 = arith.mulf %308, %301 : vector<1x14x14xf32>
    %310 = arith.addf %300, %309 : vector<1x14x14xf32>
    %311 = vector.extract_strided_slice %90 {offsets = [0, 1, 0], sizes = [1, 14, 16], strides = [1, 1, 1]} : vector<1x16x16xf32> to vector<1x14x16xf32>
    %312 = vector.extract_strided_slice %311 {offsets = [0, 0, 0], sizes = [1, 14, 14], strides = [1, 1, 1]} : vector<1x14x16xf32> to vector<1x14x14xf32>
    %313 = vector.broadcast %21 : f32 to vector<1x14x14xf32>
    %314 = arith.mulf %313, %312 : vector<1x14x14xf32>
    %315 = arith.addf %304, %314 : vector<1x14x14xf32>
    %316 = vector.broadcast %48 : f32 to vector<1x14x14xf32>
    %317 = arith.mulf %316, %312 : vector<1x14x14xf32>
    %318 = arith.addf %307, %317 : vector<1x14x14xf32>
    %319 = vector.broadcast %75 : f32 to vector<1x14x14xf32>
    %320 = arith.mulf %319, %312 : vector<1x14x14xf32>
    %321 = arith.addf %310, %320 : vector<1x14x14xf32>
    %322 = vector.extract_strided_slice %311 {offsets = [0, 0, 1], sizes = [1, 14, 14], strides = [1, 1, 1]} : vector<1x14x16xf32> to vector<1x14x14xf32>
    %323 = vector.broadcast %22 : f32 to vector<1x14x14xf32>
    %324 = arith.mulf %323, %322 : vector<1x14x14xf32>
    %325 = arith.addf %315, %324 : vector<1x14x14xf32>
    %326 = vector.broadcast %49 : f32 to vector<1x14x14xf32>
    %327 = arith.mulf %326, %322 : vector<1x14x14xf32>
    %328 = arith.addf %318, %327 : vector<1x14x14xf32>
    %329 = vector.broadcast %76 : f32 to vector<1x14x14xf32>
    %330 = arith.mulf %329, %322 : vector<1x14x14xf32>
    %331 = arith.addf %321, %330 : vector<1x14x14xf32>
    %332 = vector.extract_strided_slice %311 {offsets = [0, 0, 2], sizes = [1, 14, 14], strides = [1, 1, 1]} : vector<1x14x16xf32> to vector<1x14x14xf32>
    %333 = vector.broadcast %23 : f32 to vector<1x14x14xf32>
    %334 = arith.mulf %333, %332 : vector<1x14x14xf32>
    %335 = arith.addf %325, %334 : vector<1x14x14xf32>
    %336 = vector.broadcast %50 : f32 to vector<1x14x14xf32>
    %337 = arith.mulf %336, %332 : vector<1x14x14xf32>
    %338 = arith.addf %328, %337 : vector<1x14x14xf32>
    %339 = vector.broadcast %77 : f32 to vector<1x14x14xf32>
    %340 = arith.mulf %339, %332 : vector<1x14x14xf32>
    %341 = arith.addf %331, %340 : vector<1x14x14xf32>
    %342 = vector.extract_strided_slice %90 {offsets = [0, 2, 0], sizes = [1, 14, 16], strides = [1, 1, 1]} : vector<1x16x16xf32> to vector<1x14x16xf32>
    %343 = vector.extract_strided_slice %342 {offsets = [0, 0, 0], sizes = [1, 14, 14], strides = [1, 1, 1]} : vector<1x14x16xf32> to vector<1x14x14xf32>
    %344 = vector.broadcast %24 : f32 to vector<1x14x14xf32>
    %345 = arith.mulf %344, %343 : vector<1x14x14xf32>
    %346 = arith.addf %335, %345 : vector<1x14x14xf32>
    %347 = vector.broadcast %51 : f32 to vector<1x14x14xf32>
    %348 = arith.mulf %347, %343 : vector<1x14x14xf32>
    %349 = arith.addf %338, %348 : vector<1x14x14xf32>
    %350 = vector.broadcast %78 : f32 to vector<1x14x14xf32>
    %351 = arith.mulf %350, %343 : vector<1x14x14xf32>
    %352 = arith.addf %341, %351 : vector<1x14x14xf32>
    %353 = vector.extract_strided_slice %342 {offsets = [0, 0, 1], sizes = [1, 14, 14], strides = [1, 1, 1]} : vector<1x14x16xf32> to vector<1x14x14xf32>
    %354 = vector.broadcast %25 : f32 to vector<1x14x14xf32>
    %355 = arith.mulf %354, %353 : vector<1x14x14xf32>
    %356 = arith.addf %346, %355 : vector<1x14x14xf32>
    %357 = vector.broadcast %52 : f32 to vector<1x14x14xf32>
    %358 = arith.mulf %357, %353 : vector<1x14x14xf32>
    %359 = arith.addf %349, %358 : vector<1x14x14xf32>
    %360 = vector.broadcast %79 : f32 to vector<1x14x14xf32>
    %361 = arith.mulf %360, %353 : vector<1x14x14xf32>
    %362 = arith.addf %352, %361 : vector<1x14x14xf32>
    %363 = vector.extract_strided_slice %342 {offsets = [0, 0, 2], sizes = [1, 14, 14], strides = [1, 1, 1]} : vector<1x14x16xf32> to vector<1x14x14xf32>
    %364 = vector.broadcast %26 : f32 to vector<1x14x14xf32>
    %365 = arith.mulf %364, %363 : vector<1x14x14xf32>
    %366 = arith.addf %356, %365 : vector<1x14x14xf32>
    %367 = vector.broadcast %53 : f32 to vector<1x14x14xf32>
    %368 = arith.mulf %367, %363 : vector<1x14x14xf32>
    %369 = arith.addf %359, %368 : vector<1x14x14xf32>
    %370 = vector.broadcast %80 : f32 to vector<1x14x14xf32>
    %371 = arith.mulf %370, %363 : vector<1x14x14xf32>
    %372 = arith.addf %362, %371 : vector<1x14x14xf32>
    %cst = arith.constant 0.000000e+00 : f32
    %373 = vector.broadcast %cst : f32 to vector<1x14x14xf32>
    %374 = arith.maximumf %366, %373 : vector<1x14x14xf32>
    %cst_7 = arith.constant 0.000000e+00 : f32
    %375 = vector.broadcast %cst_7 : f32 to vector<1x14x14xf32>
    %376 = arith.maximumf %369, %375 : vector<1x14x14xf32>
    %cst_8 = arith.constant 0.000000e+00 : f32
    %377 = vector.broadcast %cst_8 : f32 to vector<1x14x14xf32>
    %378 = arith.maximumf %372, %377 : vector<1x14x14xf32>
    %379 = vector.broadcast %81 : f32 to vector<1x12x12xf32>
    %380 = vector.broadcast %82 : f32 to vector<1x12x12xf32>
    %381 = vector.broadcast %83 : f32 to vector<1x12x12xf32>
    %382 = vector.extract_strided_slice %374 {offsets = [0, 0, 0], sizes = [1, 12, 14], strides = [1, 1, 1]} : vector<1x14x14xf32> to vector<1x12x14xf32>
    %383 = vector.extract_strided_slice %382 {offsets = [0, 0, 0], sizes = [1, 12, 12], strides = [1, 1, 1]} : vector<1x12x14xf32> to vector<1x12x12xf32>
    %384 = vector.broadcast %0 : f32 to vector<1x12x12xf32>
    %385 = arith.mulf %384, %383 : vector<1x12x12xf32>
    %386 = arith.addf %379, %385 : vector<1x12x12xf32>
    %387 = vector.broadcast %27 : f32 to vector<1x12x12xf32>
    %388 = arith.mulf %387, %383 : vector<1x12x12xf32>
    %389 = arith.addf %380, %388 : vector<1x12x12xf32>
    %390 = vector.broadcast %54 : f32 to vector<1x12x12xf32>
    %391 = arith.mulf %390, %383 : vector<1x12x12xf32>
    %392 = arith.addf %381, %391 : vector<1x12x12xf32>
    %393 = vector.extract_strided_slice %382 {offsets = [0, 0, 1], sizes = [1, 12, 12], strides = [1, 1, 1]} : vector<1x12x14xf32> to vector<1x12x12xf32>
    %394 = vector.broadcast %1 : f32 to vector<1x12x12xf32>
    %395 = arith.mulf %394, %393 : vector<1x12x12xf32>
    %396 = arith.addf %386, %395 : vector<1x12x12xf32>
    %397 = vector.broadcast %28 : f32 to vector<1x12x12xf32>
    %398 = arith.mulf %397, %393 : vector<1x12x12xf32>
    %399 = arith.addf %389, %398 : vector<1x12x12xf32>
    %400 = vector.broadcast %55 : f32 to vector<1x12x12xf32>
    %401 = arith.mulf %400, %393 : vector<1x12x12xf32>
    %402 = arith.addf %392, %401 : vector<1x12x12xf32>
    %403 = vector.extract_strided_slice %382 {offsets = [0, 0, 2], sizes = [1, 12, 12], strides = [1, 1, 1]} : vector<1x12x14xf32> to vector<1x12x12xf32>
    %404 = vector.broadcast %2 : f32 to vector<1x12x12xf32>
    %405 = arith.mulf %404, %403 : vector<1x12x12xf32>
    %406 = arith.addf %396, %405 : vector<1x12x12xf32>
    %407 = vector.broadcast %29 : f32 to vector<1x12x12xf32>
    %408 = arith.mulf %407, %403 : vector<1x12x12xf32>
    %409 = arith.addf %399, %408 : vector<1x12x12xf32>
    %410 = vector.broadcast %56 : f32 to vector<1x12x12xf32>
    %411 = arith.mulf %410, %403 : vector<1x12x12xf32>
    %412 = arith.addf %402, %411 : vector<1x12x12xf32>
    %413 = vector.extract_strided_slice %374 {offsets = [0, 1, 0], sizes = [1, 12, 14], strides = [1, 1, 1]} : vector<1x14x14xf32> to vector<1x12x14xf32>
    %414 = vector.extract_strided_slice %413 {offsets = [0, 0, 0], sizes = [1, 12, 12], strides = [1, 1, 1]} : vector<1x12x14xf32> to vector<1x12x12xf32>
    %415 = vector.broadcast %3 : f32 to vector<1x12x12xf32>
    %416 = arith.mulf %415, %414 : vector<1x12x12xf32>
    %417 = arith.addf %406, %416 : vector<1x12x12xf32>
    %418 = vector.broadcast %30 : f32 to vector<1x12x12xf32>
    %419 = arith.mulf %418, %414 : vector<1x12x12xf32>
    %420 = arith.addf %409, %419 : vector<1x12x12xf32>
    %421 = vector.broadcast %57 : f32 to vector<1x12x12xf32>
    %422 = arith.mulf %421, %414 : vector<1x12x12xf32>
    %423 = arith.addf %412, %422 : vector<1x12x12xf32>
    %424 = vector.extract_strided_slice %413 {offsets = [0, 0, 1], sizes = [1, 12, 12], strides = [1, 1, 1]} : vector<1x12x14xf32> to vector<1x12x12xf32>
    %425 = vector.broadcast %4 : f32 to vector<1x12x12xf32>
    %426 = arith.mulf %425, %424 : vector<1x12x12xf32>
    %427 = arith.addf %417, %426 : vector<1x12x12xf32>
    %428 = vector.broadcast %31 : f32 to vector<1x12x12xf32>
    %429 = arith.mulf %428, %424 : vector<1x12x12xf32>
    %430 = arith.addf %420, %429 : vector<1x12x12xf32>
    %431 = vector.broadcast %58 : f32 to vector<1x12x12xf32>
    %432 = arith.mulf %431, %424 : vector<1x12x12xf32>
    %433 = arith.addf %423, %432 : vector<1x12x12xf32>
    %434 = vector.extract_strided_slice %413 {offsets = [0, 0, 2], sizes = [1, 12, 12], strides = [1, 1, 1]} : vector<1x12x14xf32> to vector<1x12x12xf32>
    %435 = vector.broadcast %5 : f32 to vector<1x12x12xf32>
    %436 = arith.mulf %435, %434 : vector<1x12x12xf32>
    %437 = arith.addf %427, %436 : vector<1x12x12xf32>
    %438 = vector.broadcast %32 : f32 to vector<1x12x12xf32>
    %439 = arith.mulf %438, %434 : vector<1x12x12xf32>
    %440 = arith.addf %430, %439 : vector<1x12x12xf32>
    %441 = vector.broadcast %59 : f32 to vector<1x12x12xf32>
    %442 = arith.mulf %441, %434 : vector<1x12x12xf32>
    %443 = arith.addf %433, %442 : vector<1x12x12xf32>
    %444 = vector.extract_strided_slice %374 {offsets = [0, 2, 0], sizes = [1, 12, 14], strides = [1, 1, 1]} : vector<1x14x14xf32> to vector<1x12x14xf32>
    %445 = vector.extract_strided_slice %444 {offsets = [0, 0, 0], sizes = [1, 12, 12], strides = [1, 1, 1]} : vector<1x12x14xf32> to vector<1x12x12xf32>
    %446 = vector.broadcast %6 : f32 to vector<1x12x12xf32>
    %447 = arith.mulf %446, %445 : vector<1x12x12xf32>
    %448 = arith.addf %437, %447 : vector<1x12x12xf32>
    %449 = vector.broadcast %33 : f32 to vector<1x12x12xf32>
    %450 = arith.mulf %449, %445 : vector<1x12x12xf32>
    %451 = arith.addf %440, %450 : vector<1x12x12xf32>
    %452 = vector.broadcast %60 : f32 to vector<1x12x12xf32>
    %453 = arith.mulf %452, %445 : vector<1x12x12xf32>
    %454 = arith.addf %443, %453 : vector<1x12x12xf32>
    %455 = vector.extract_strided_slice %444 {offsets = [0, 0, 1], sizes = [1, 12, 12], strides = [1, 1, 1]} : vector<1x12x14xf32> to vector<1x12x12xf32>
    %456 = vector.broadcast %7 : f32 to vector<1x12x12xf32>
    %457 = arith.mulf %456, %455 : vector<1x12x12xf32>
    %458 = arith.addf %448, %457 : vector<1x12x12xf32>
    %459 = vector.broadcast %34 : f32 to vector<1x12x12xf32>
    %460 = arith.mulf %459, %455 : vector<1x12x12xf32>
    %461 = arith.addf %451, %460 : vector<1x12x12xf32>
    %462 = vector.broadcast %61 : f32 to vector<1x12x12xf32>
    %463 = arith.mulf %462, %455 : vector<1x12x12xf32>
    %464 = arith.addf %454, %463 : vector<1x12x12xf32>
    %465 = vector.extract_strided_slice %444 {offsets = [0, 0, 2], sizes = [1, 12, 12], strides = [1, 1, 1]} : vector<1x12x14xf32> to vector<1x12x12xf32>
    %466 = vector.broadcast %8 : f32 to vector<1x12x12xf32>
    %467 = arith.mulf %466, %465 : vector<1x12x12xf32>
    %468 = arith.addf %458, %467 : vector<1x12x12xf32>
    %469 = vector.broadcast %35 : f32 to vector<1x12x12xf32>
    %470 = arith.mulf %469, %465 : vector<1x12x12xf32>
    %471 = arith.addf %461, %470 : vector<1x12x12xf32>
    %472 = vector.broadcast %62 : f32 to vector<1x12x12xf32>
    %473 = arith.mulf %472, %465 : vector<1x12x12xf32>
    %474 = arith.addf %464, %473 : vector<1x12x12xf32>
    %475 = vector.extract_strided_slice %376 {offsets = [0, 0, 0], sizes = [1, 12, 14], strides = [1, 1, 1]} : vector<1x14x14xf32> to vector<1x12x14xf32>
    %476 = vector.extract_strided_slice %475 {offsets = [0, 0, 0], sizes = [1, 12, 12], strides = [1, 1, 1]} : vector<1x12x14xf32> to vector<1x12x12xf32>
    %477 = vector.broadcast %9 : f32 to vector<1x12x12xf32>
    %478 = arith.mulf %477, %476 : vector<1x12x12xf32>
    %479 = arith.addf %468, %478 : vector<1x12x12xf32>
    %480 = vector.broadcast %36 : f32 to vector<1x12x12xf32>
    %481 = arith.mulf %480, %476 : vector<1x12x12xf32>
    %482 = arith.addf %471, %481 : vector<1x12x12xf32>
    %483 = vector.broadcast %63 : f32 to vector<1x12x12xf32>
    %484 = arith.mulf %483, %476 : vector<1x12x12xf32>
    %485 = arith.addf %474, %484 : vector<1x12x12xf32>
    %486 = vector.extract_strided_slice %475 {offsets = [0, 0, 1], sizes = [1, 12, 12], strides = [1, 1, 1]} : vector<1x12x14xf32> to vector<1x12x12xf32>
    %487 = vector.broadcast %10 : f32 to vector<1x12x12xf32>
    %488 = arith.mulf %487, %486 : vector<1x12x12xf32>
    %489 = arith.addf %479, %488 : vector<1x12x12xf32>
    %490 = vector.broadcast %37 : f32 to vector<1x12x12xf32>
    %491 = arith.mulf %490, %486 : vector<1x12x12xf32>
    %492 = arith.addf %482, %491 : vector<1x12x12xf32>
    %493 = vector.broadcast %64 : f32 to vector<1x12x12xf32>
    %494 = arith.mulf %493, %486 : vector<1x12x12xf32>
    %495 = arith.addf %485, %494 : vector<1x12x12xf32>
    %496 = vector.extract_strided_slice %475 {offsets = [0, 0, 2], sizes = [1, 12, 12], strides = [1, 1, 1]} : vector<1x12x14xf32> to vector<1x12x12xf32>
    %497 = vector.broadcast %11 : f32 to vector<1x12x12xf32>
    %498 = arith.mulf %497, %496 : vector<1x12x12xf32>
    %499 = arith.addf %489, %498 : vector<1x12x12xf32>
    %500 = vector.broadcast %38 : f32 to vector<1x12x12xf32>
    %501 = arith.mulf %500, %496 : vector<1x12x12xf32>
    %502 = arith.addf %492, %501 : vector<1x12x12xf32>
    %503 = vector.broadcast %65 : f32 to vector<1x12x12xf32>
    %504 = arith.mulf %503, %496 : vector<1x12x12xf32>
    %505 = arith.addf %495, %504 : vector<1x12x12xf32>
    %506 = vector.extract_strided_slice %376 {offsets = [0, 1, 0], sizes = [1, 12, 14], strides = [1, 1, 1]} : vector<1x14x14xf32> to vector<1x12x14xf32>
    %507 = vector.extract_strided_slice %506 {offsets = [0, 0, 0], sizes = [1, 12, 12], strides = [1, 1, 1]} : vector<1x12x14xf32> to vector<1x12x12xf32>
    %508 = vector.broadcast %12 : f32 to vector<1x12x12xf32>
    %509 = arith.mulf %508, %507 : vector<1x12x12xf32>
    %510 = arith.addf %499, %509 : vector<1x12x12xf32>
    %511 = vector.broadcast %39 : f32 to vector<1x12x12xf32>
    %512 = arith.mulf %511, %507 : vector<1x12x12xf32>
    %513 = arith.addf %502, %512 : vector<1x12x12xf32>
    %514 = vector.broadcast %66 : f32 to vector<1x12x12xf32>
    %515 = arith.mulf %514, %507 : vector<1x12x12xf32>
    %516 = arith.addf %505, %515 : vector<1x12x12xf32>
    %517 = vector.extract_strided_slice %506 {offsets = [0, 0, 1], sizes = [1, 12, 12], strides = [1, 1, 1]} : vector<1x12x14xf32> to vector<1x12x12xf32>
    %518 = vector.broadcast %13 : f32 to vector<1x12x12xf32>
    %519 = arith.mulf %518, %517 : vector<1x12x12xf32>
    %520 = arith.addf %510, %519 : vector<1x12x12xf32>
    %521 = vector.broadcast %40 : f32 to vector<1x12x12xf32>
    %522 = arith.mulf %521, %517 : vector<1x12x12xf32>
    %523 = arith.addf %513, %522 : vector<1x12x12xf32>
    %524 = vector.broadcast %67 : f32 to vector<1x12x12xf32>
    %525 = arith.mulf %524, %517 : vector<1x12x12xf32>
    %526 = arith.addf %516, %525 : vector<1x12x12xf32>
    %527 = vector.extract_strided_slice %506 {offsets = [0, 0, 2], sizes = [1, 12, 12], strides = [1, 1, 1]} : vector<1x12x14xf32> to vector<1x12x12xf32>
    %528 = vector.broadcast %14 : f32 to vector<1x12x12xf32>
    %529 = arith.mulf %528, %527 : vector<1x12x12xf32>
    %530 = arith.addf %520, %529 : vector<1x12x12xf32>
    %531 = vector.broadcast %41 : f32 to vector<1x12x12xf32>
    %532 = arith.mulf %531, %527 : vector<1x12x12xf32>
    %533 = arith.addf %523, %532 : vector<1x12x12xf32>
    %534 = vector.broadcast %68 : f32 to vector<1x12x12xf32>
    %535 = arith.mulf %534, %527 : vector<1x12x12xf32>
    %536 = arith.addf %526, %535 : vector<1x12x12xf32>
    %537 = vector.extract_strided_slice %376 {offsets = [0, 2, 0], sizes = [1, 12, 14], strides = [1, 1, 1]} : vector<1x14x14xf32> to vector<1x12x14xf32>
    %538 = vector.extract_strided_slice %537 {offsets = [0, 0, 0], sizes = [1, 12, 12], strides = [1, 1, 1]} : vector<1x12x14xf32> to vector<1x12x12xf32>
    %539 = vector.broadcast %15 : f32 to vector<1x12x12xf32>
    %540 = arith.mulf %539, %538 : vector<1x12x12xf32>
    %541 = arith.addf %530, %540 : vector<1x12x12xf32>
    %542 = vector.broadcast %42 : f32 to vector<1x12x12xf32>
    %543 = arith.mulf %542, %538 : vector<1x12x12xf32>
    %544 = arith.addf %533, %543 : vector<1x12x12xf32>
    %545 = vector.broadcast %69 : f32 to vector<1x12x12xf32>
    %546 = arith.mulf %545, %538 : vector<1x12x12xf32>
    %547 = arith.addf %536, %546 : vector<1x12x12xf32>
    %548 = vector.extract_strided_slice %537 {offsets = [0, 0, 1], sizes = [1, 12, 12], strides = [1, 1, 1]} : vector<1x12x14xf32> to vector<1x12x12xf32>
    %549 = vector.broadcast %16 : f32 to vector<1x12x12xf32>
    %550 = arith.mulf %549, %548 : vector<1x12x12xf32>
    %551 = arith.addf %541, %550 : vector<1x12x12xf32>
    %552 = vector.broadcast %43 : f32 to vector<1x12x12xf32>
    %553 = arith.mulf %552, %548 : vector<1x12x12xf32>
    %554 = arith.addf %544, %553 : vector<1x12x12xf32>
    %555 = vector.broadcast %70 : f32 to vector<1x12x12xf32>
    %556 = arith.mulf %555, %548 : vector<1x12x12xf32>
    %557 = arith.addf %547, %556 : vector<1x12x12xf32>
    %558 = vector.extract_strided_slice %537 {offsets = [0, 0, 2], sizes = [1, 12, 12], strides = [1, 1, 1]} : vector<1x12x14xf32> to vector<1x12x12xf32>
    %559 = vector.broadcast %17 : f32 to vector<1x12x12xf32>
    %560 = arith.mulf %559, %558 : vector<1x12x12xf32>
    %561 = arith.addf %551, %560 : vector<1x12x12xf32>
    %562 = vector.broadcast %44 : f32 to vector<1x12x12xf32>
    %563 = arith.mulf %562, %558 : vector<1x12x12xf32>
    %564 = arith.addf %554, %563 : vector<1x12x12xf32>
    %565 = vector.broadcast %71 : f32 to vector<1x12x12xf32>
    %566 = arith.mulf %565, %558 : vector<1x12x12xf32>
    %567 = arith.addf %557, %566 : vector<1x12x12xf32>
    %568 = vector.extract_strided_slice %378 {offsets = [0, 0, 0], sizes = [1, 12, 14], strides = [1, 1, 1]} : vector<1x14x14xf32> to vector<1x12x14xf32>
    %569 = vector.extract_strided_slice %568 {offsets = [0, 0, 0], sizes = [1, 12, 12], strides = [1, 1, 1]} : vector<1x12x14xf32> to vector<1x12x12xf32>
    %570 = vector.broadcast %18 : f32 to vector<1x12x12xf32>
    %571 = arith.mulf %570, %569 : vector<1x12x12xf32>
    %572 = arith.addf %561, %571 : vector<1x12x12xf32>
    %573 = vector.broadcast %45 : f32 to vector<1x12x12xf32>
    %574 = arith.mulf %573, %569 : vector<1x12x12xf32>
    %575 = arith.addf %564, %574 : vector<1x12x12xf32>
    %576 = vector.broadcast %72 : f32 to vector<1x12x12xf32>
    %577 = arith.mulf %576, %569 : vector<1x12x12xf32>
    %578 = arith.addf %567, %577 : vector<1x12x12xf32>
    %579 = vector.extract_strided_slice %568 {offsets = [0, 0, 1], sizes = [1, 12, 12], strides = [1, 1, 1]} : vector<1x12x14xf32> to vector<1x12x12xf32>
    %580 = vector.broadcast %19 : f32 to vector<1x12x12xf32>
    %581 = arith.mulf %580, %579 : vector<1x12x12xf32>
    %582 = arith.addf %572, %581 : vector<1x12x12xf32>
    %583 = vector.broadcast %46 : f32 to vector<1x12x12xf32>
    %584 = arith.mulf %583, %579 : vector<1x12x12xf32>
    %585 = arith.addf %575, %584 : vector<1x12x12xf32>
    %586 = vector.broadcast %73 : f32 to vector<1x12x12xf32>
    %587 = arith.mulf %586, %579 : vector<1x12x12xf32>
    %588 = arith.addf %578, %587 : vector<1x12x12xf32>
    %589 = vector.extract_strided_slice %568 {offsets = [0, 0, 2], sizes = [1, 12, 12], strides = [1, 1, 1]} : vector<1x12x14xf32> to vector<1x12x12xf32>
    %590 = vector.broadcast %20 : f32 to vector<1x12x12xf32>
    %591 = arith.mulf %590, %589 : vector<1x12x12xf32>
    %592 = arith.addf %582, %591 : vector<1x12x12xf32>
    %593 = vector.broadcast %47 : f32 to vector<1x12x12xf32>
    %594 = arith.mulf %593, %589 : vector<1x12x12xf32>
    %595 = arith.addf %585, %594 : vector<1x12x12xf32>
    %596 = vector.broadcast %74 : f32 to vector<1x12x12xf32>
    %597 = arith.mulf %596, %589 : vector<1x12x12xf32>
    %598 = arith.addf %588, %597 : vector<1x12x12xf32>
    %599 = vector.extract_strided_slice %378 {offsets = [0, 1, 0], sizes = [1, 12, 14], strides = [1, 1, 1]} : vector<1x14x14xf32> to vector<1x12x14xf32>
    %600 = vector.extract_strided_slice %599 {offsets = [0, 0, 0], sizes = [1, 12, 12], strides = [1, 1, 1]} : vector<1x12x14xf32> to vector<1x12x12xf32>
    %601 = vector.broadcast %21 : f32 to vector<1x12x12xf32>
    %602 = arith.mulf %601, %600 : vector<1x12x12xf32>
    %603 = arith.addf %592, %602 : vector<1x12x12xf32>
    %604 = vector.broadcast %48 : f32 to vector<1x12x12xf32>
    %605 = arith.mulf %604, %600 : vector<1x12x12xf32>
    %606 = arith.addf %595, %605 : vector<1x12x12xf32>
    %607 = vector.broadcast %75 : f32 to vector<1x12x12xf32>
    %608 = arith.mulf %607, %600 : vector<1x12x12xf32>
    %609 = arith.addf %598, %608 : vector<1x12x12xf32>
    %610 = vector.extract_strided_slice %599 {offsets = [0, 0, 1], sizes = [1, 12, 12], strides = [1, 1, 1]} : vector<1x12x14xf32> to vector<1x12x12xf32>
    %611 = vector.broadcast %22 : f32 to vector<1x12x12xf32>
    %612 = arith.mulf %611, %610 : vector<1x12x12xf32>
    %613 = arith.addf %603, %612 : vector<1x12x12xf32>
    %614 = vector.broadcast %49 : f32 to vector<1x12x12xf32>
    %615 = arith.mulf %614, %610 : vector<1x12x12xf32>
    %616 = arith.addf %606, %615 : vector<1x12x12xf32>
    %617 = vector.broadcast %76 : f32 to vector<1x12x12xf32>
    %618 = arith.mulf %617, %610 : vector<1x12x12xf32>
    %619 = arith.addf %609, %618 : vector<1x12x12xf32>
    %620 = vector.extract_strided_slice %599 {offsets = [0, 0, 2], sizes = [1, 12, 12], strides = [1, 1, 1]} : vector<1x12x14xf32> to vector<1x12x12xf32>
    %621 = vector.broadcast %23 : f32 to vector<1x12x12xf32>
    %622 = arith.mulf %621, %620 : vector<1x12x12xf32>
    %623 = arith.addf %613, %622 : vector<1x12x12xf32>
    %624 = vector.broadcast %50 : f32 to vector<1x12x12xf32>
    %625 = arith.mulf %624, %620 : vector<1x12x12xf32>
    %626 = arith.addf %616, %625 : vector<1x12x12xf32>
    %627 = vector.broadcast %77 : f32 to vector<1x12x12xf32>
    %628 = arith.mulf %627, %620 : vector<1x12x12xf32>
    %629 = arith.addf %619, %628 : vector<1x12x12xf32>
    %630 = vector.extract_strided_slice %378 {offsets = [0, 2, 0], sizes = [1, 12, 14], strides = [1, 1, 1]} : vector<1x14x14xf32> to vector<1x12x14xf32>
    %631 = vector.extract_strided_slice %630 {offsets = [0, 0, 0], sizes = [1, 12, 12], strides = [1, 1, 1]} : vector<1x12x14xf32> to vector<1x12x12xf32>
    %632 = vector.broadcast %24 : f32 to vector<1x12x12xf32>
    %633 = arith.mulf %632, %631 : vector<1x12x12xf32>
    %634 = arith.addf %623, %633 : vector<1x12x12xf32>
    %635 = vector.broadcast %51 : f32 to vector<1x12x12xf32>
    %636 = arith.mulf %635, %631 : vector<1x12x12xf32>
    %637 = arith.addf %626, %636 : vector<1x12x12xf32>
    %638 = vector.broadcast %78 : f32 to vector<1x12x12xf32>
    %639 = arith.mulf %638, %631 : vector<1x12x12xf32>
    %640 = arith.addf %629, %639 : vector<1x12x12xf32>
    %641 = vector.extract_strided_slice %630 {offsets = [0, 0, 1], sizes = [1, 12, 12], strides = [1, 1, 1]} : vector<1x12x14xf32> to vector<1x12x12xf32>
    %642 = vector.broadcast %25 : f32 to vector<1x12x12xf32>
    %643 = arith.mulf %642, %641 : vector<1x12x12xf32>
    %644 = arith.addf %634, %643 : vector<1x12x12xf32>
    %645 = vector.broadcast %52 : f32 to vector<1x12x12xf32>
    %646 = arith.mulf %645, %641 : vector<1x12x12xf32>
    %647 = arith.addf %637, %646 : vector<1x12x12xf32>
    %648 = vector.broadcast %79 : f32 to vector<1x12x12xf32>
    %649 = arith.mulf %648, %641 : vector<1x12x12xf32>
    %650 = arith.addf %640, %649 : vector<1x12x12xf32>
    %651 = vector.extract_strided_slice %630 {offsets = [0, 0, 2], sizes = [1, 12, 12], strides = [1, 1, 1]} : vector<1x12x14xf32> to vector<1x12x12xf32>
    %652 = vector.broadcast %26 : f32 to vector<1x12x12xf32>
    %653 = arith.mulf %652, %651 : vector<1x12x12xf32>
    %654 = arith.addf %644, %653 : vector<1x12x12xf32>
    %655 = vector.broadcast %53 : f32 to vector<1x12x12xf32>
    %656 = arith.mulf %655, %651 : vector<1x12x12xf32>
    %657 = arith.addf %647, %656 : vector<1x12x12xf32>
    %658 = vector.broadcast %80 : f32 to vector<1x12x12xf32>
    %659 = arith.mulf %658, %651 : vector<1x12x12xf32>
    %660 = arith.addf %650, %659 : vector<1x12x12xf32>
    %cst_9 = arith.constant 0.000000e+00 : f32
    %661 = vector.broadcast %cst_9 : f32 to vector<1x12x12xf32>
    %662 = arith.maximumf %654, %661 : vector<1x12x12xf32>
    %cst_10 = arith.constant 0.000000e+00 : f32
    %663 = vector.broadcast %cst_10 : f32 to vector<1x12x12xf32>
    %664 = arith.maximumf %657, %663 : vector<1x12x12xf32>
    %cst_11 = arith.constant 0.000000e+00 : f32
    %665 = vector.broadcast %cst_11 : f32 to vector<1x12x12xf32>
    %666 = arith.maximumf %660, %665 : vector<1x12x12xf32>
    %667 = vector.broadcast %81 : f32 to vector<1x10x10xf32>
    %668 = vector.broadcast %82 : f32 to vector<1x10x10xf32>
    %669 = vector.broadcast %83 : f32 to vector<1x10x10xf32>
    %670 = vector.extract_strided_slice %662 {offsets = [0, 0, 0], sizes = [1, 10, 12], strides = [1, 1, 1]} : vector<1x12x12xf32> to vector<1x10x12xf32>
    %671 = vector.extract_strided_slice %670 {offsets = [0, 0, 0], sizes = [1, 10, 10], strides = [1, 1, 1]} : vector<1x10x12xf32> to vector<1x10x10xf32>
    %672 = vector.broadcast %0 : f32 to vector<1x10x10xf32>
    %673 = arith.mulf %672, %671 : vector<1x10x10xf32>
    %674 = arith.addf %667, %673 : vector<1x10x10xf32>
    %675 = vector.broadcast %27 : f32 to vector<1x10x10xf32>
    %676 = arith.mulf %675, %671 : vector<1x10x10xf32>
    %677 = arith.addf %668, %676 : vector<1x10x10xf32>
    %678 = vector.broadcast %54 : f32 to vector<1x10x10xf32>
    %679 = arith.mulf %678, %671 : vector<1x10x10xf32>
    %680 = arith.addf %669, %679 : vector<1x10x10xf32>
    %681 = vector.extract_strided_slice %670 {offsets = [0, 0, 1], sizes = [1, 10, 10], strides = [1, 1, 1]} : vector<1x10x12xf32> to vector<1x10x10xf32>
    %682 = vector.broadcast %1 : f32 to vector<1x10x10xf32>
    %683 = arith.mulf %682, %681 : vector<1x10x10xf32>
    %684 = arith.addf %674, %683 : vector<1x10x10xf32>
    %685 = vector.broadcast %28 : f32 to vector<1x10x10xf32>
    %686 = arith.mulf %685, %681 : vector<1x10x10xf32>
    %687 = arith.addf %677, %686 : vector<1x10x10xf32>
    %688 = vector.broadcast %55 : f32 to vector<1x10x10xf32>
    %689 = arith.mulf %688, %681 : vector<1x10x10xf32>
    %690 = arith.addf %680, %689 : vector<1x10x10xf32>
    %691 = vector.extract_strided_slice %670 {offsets = [0, 0, 2], sizes = [1, 10, 10], strides = [1, 1, 1]} : vector<1x10x12xf32> to vector<1x10x10xf32>
    %692 = vector.broadcast %2 : f32 to vector<1x10x10xf32>
    %693 = arith.mulf %692, %691 : vector<1x10x10xf32>
    %694 = arith.addf %684, %693 : vector<1x10x10xf32>
    %695 = vector.broadcast %29 : f32 to vector<1x10x10xf32>
    %696 = arith.mulf %695, %691 : vector<1x10x10xf32>
    %697 = arith.addf %687, %696 : vector<1x10x10xf32>
    %698 = vector.broadcast %56 : f32 to vector<1x10x10xf32>
    %699 = arith.mulf %698, %691 : vector<1x10x10xf32>
    %700 = arith.addf %690, %699 : vector<1x10x10xf32>
    %701 = vector.extract_strided_slice %662 {offsets = [0, 1, 0], sizes = [1, 10, 12], strides = [1, 1, 1]} : vector<1x12x12xf32> to vector<1x10x12xf32>
    %702 = vector.extract_strided_slice %701 {offsets = [0, 0, 0], sizes = [1, 10, 10], strides = [1, 1, 1]} : vector<1x10x12xf32> to vector<1x10x10xf32>
    %703 = vector.broadcast %3 : f32 to vector<1x10x10xf32>
    %704 = arith.mulf %703, %702 : vector<1x10x10xf32>
    %705 = arith.addf %694, %704 : vector<1x10x10xf32>
    %706 = vector.broadcast %30 : f32 to vector<1x10x10xf32>
    %707 = arith.mulf %706, %702 : vector<1x10x10xf32>
    %708 = arith.addf %697, %707 : vector<1x10x10xf32>
    %709 = vector.broadcast %57 : f32 to vector<1x10x10xf32>
    %710 = arith.mulf %709, %702 : vector<1x10x10xf32>
    %711 = arith.addf %700, %710 : vector<1x10x10xf32>
    %712 = vector.extract_strided_slice %701 {offsets = [0, 0, 1], sizes = [1, 10, 10], strides = [1, 1, 1]} : vector<1x10x12xf32> to vector<1x10x10xf32>
    %713 = vector.broadcast %4 : f32 to vector<1x10x10xf32>
    %714 = arith.mulf %713, %712 : vector<1x10x10xf32>
    %715 = arith.addf %705, %714 : vector<1x10x10xf32>
    %716 = vector.broadcast %31 : f32 to vector<1x10x10xf32>
    %717 = arith.mulf %716, %712 : vector<1x10x10xf32>
    %718 = arith.addf %708, %717 : vector<1x10x10xf32>
    %719 = vector.broadcast %58 : f32 to vector<1x10x10xf32>
    %720 = arith.mulf %719, %712 : vector<1x10x10xf32>
    %721 = arith.addf %711, %720 : vector<1x10x10xf32>
    %722 = vector.extract_strided_slice %701 {offsets = [0, 0, 2], sizes = [1, 10, 10], strides = [1, 1, 1]} : vector<1x10x12xf32> to vector<1x10x10xf32>
    %723 = vector.broadcast %5 : f32 to vector<1x10x10xf32>
    %724 = arith.mulf %723, %722 : vector<1x10x10xf32>
    %725 = arith.addf %715, %724 : vector<1x10x10xf32>
    %726 = vector.broadcast %32 : f32 to vector<1x10x10xf32>
    %727 = arith.mulf %726, %722 : vector<1x10x10xf32>
    %728 = arith.addf %718, %727 : vector<1x10x10xf32>
    %729 = vector.broadcast %59 : f32 to vector<1x10x10xf32>
    %730 = arith.mulf %729, %722 : vector<1x10x10xf32>
    %731 = arith.addf %721, %730 : vector<1x10x10xf32>
    %732 = vector.extract_strided_slice %662 {offsets = [0, 2, 0], sizes = [1, 10, 12], strides = [1, 1, 1]} : vector<1x12x12xf32> to vector<1x10x12xf32>
    %733 = vector.extract_strided_slice %732 {offsets = [0, 0, 0], sizes = [1, 10, 10], strides = [1, 1, 1]} : vector<1x10x12xf32> to vector<1x10x10xf32>
    %734 = vector.broadcast %6 : f32 to vector<1x10x10xf32>
    %735 = arith.mulf %734, %733 : vector<1x10x10xf32>
    %736 = arith.addf %725, %735 : vector<1x10x10xf32>
    %737 = vector.broadcast %33 : f32 to vector<1x10x10xf32>
    %738 = arith.mulf %737, %733 : vector<1x10x10xf32>
    %739 = arith.addf %728, %738 : vector<1x10x10xf32>
    %740 = vector.broadcast %60 : f32 to vector<1x10x10xf32>
    %741 = arith.mulf %740, %733 : vector<1x10x10xf32>
    %742 = arith.addf %731, %741 : vector<1x10x10xf32>
    %743 = vector.extract_strided_slice %732 {offsets = [0, 0, 1], sizes = [1, 10, 10], strides = [1, 1, 1]} : vector<1x10x12xf32> to vector<1x10x10xf32>
    %744 = vector.broadcast %7 : f32 to vector<1x10x10xf32>
    %745 = arith.mulf %744, %743 : vector<1x10x10xf32>
    %746 = arith.addf %736, %745 : vector<1x10x10xf32>
    %747 = vector.broadcast %34 : f32 to vector<1x10x10xf32>
    %748 = arith.mulf %747, %743 : vector<1x10x10xf32>
    %749 = arith.addf %739, %748 : vector<1x10x10xf32>
    %750 = vector.broadcast %61 : f32 to vector<1x10x10xf32>
    %751 = arith.mulf %750, %743 : vector<1x10x10xf32>
    %752 = arith.addf %742, %751 : vector<1x10x10xf32>
    %753 = vector.extract_strided_slice %732 {offsets = [0, 0, 2], sizes = [1, 10, 10], strides = [1, 1, 1]} : vector<1x10x12xf32> to vector<1x10x10xf32>
    %754 = vector.broadcast %8 : f32 to vector<1x10x10xf32>
    %755 = arith.mulf %754, %753 : vector<1x10x10xf32>
    %756 = arith.addf %746, %755 : vector<1x10x10xf32>
    %757 = vector.broadcast %35 : f32 to vector<1x10x10xf32>
    %758 = arith.mulf %757, %753 : vector<1x10x10xf32>
    %759 = arith.addf %749, %758 : vector<1x10x10xf32>
    %760 = vector.broadcast %62 : f32 to vector<1x10x10xf32>
    %761 = arith.mulf %760, %753 : vector<1x10x10xf32>
    %762 = arith.addf %752, %761 : vector<1x10x10xf32>
    %763 = vector.extract_strided_slice %664 {offsets = [0, 0, 0], sizes = [1, 10, 12], strides = [1, 1, 1]} : vector<1x12x12xf32> to vector<1x10x12xf32>
    %764 = vector.extract_strided_slice %763 {offsets = [0, 0, 0], sizes = [1, 10, 10], strides = [1, 1, 1]} : vector<1x10x12xf32> to vector<1x10x10xf32>
    %765 = vector.broadcast %9 : f32 to vector<1x10x10xf32>
    %766 = arith.mulf %765, %764 : vector<1x10x10xf32>
    %767 = arith.addf %756, %766 : vector<1x10x10xf32>
    %768 = vector.broadcast %36 : f32 to vector<1x10x10xf32>
    %769 = arith.mulf %768, %764 : vector<1x10x10xf32>
    %770 = arith.addf %759, %769 : vector<1x10x10xf32>
    %771 = vector.broadcast %63 : f32 to vector<1x10x10xf32>
    %772 = arith.mulf %771, %764 : vector<1x10x10xf32>
    %773 = arith.addf %762, %772 : vector<1x10x10xf32>
    %774 = vector.extract_strided_slice %763 {offsets = [0, 0, 1], sizes = [1, 10, 10], strides = [1, 1, 1]} : vector<1x10x12xf32> to vector<1x10x10xf32>
    %775 = vector.broadcast %10 : f32 to vector<1x10x10xf32>
    %776 = arith.mulf %775, %774 : vector<1x10x10xf32>
    %777 = arith.addf %767, %776 : vector<1x10x10xf32>
    %778 = vector.broadcast %37 : f32 to vector<1x10x10xf32>
    %779 = arith.mulf %778, %774 : vector<1x10x10xf32>
    %780 = arith.addf %770, %779 : vector<1x10x10xf32>
    %781 = vector.broadcast %64 : f32 to vector<1x10x10xf32>
    %782 = arith.mulf %781, %774 : vector<1x10x10xf32>
    %783 = arith.addf %773, %782 : vector<1x10x10xf32>
    %784 = vector.extract_strided_slice %763 {offsets = [0, 0, 2], sizes = [1, 10, 10], strides = [1, 1, 1]} : vector<1x10x12xf32> to vector<1x10x10xf32>
    %785 = vector.broadcast %11 : f32 to vector<1x10x10xf32>
    %786 = arith.mulf %785, %784 : vector<1x10x10xf32>
    %787 = arith.addf %777, %786 : vector<1x10x10xf32>
    %788 = vector.broadcast %38 : f32 to vector<1x10x10xf32>
    %789 = arith.mulf %788, %784 : vector<1x10x10xf32>
    %790 = arith.addf %780, %789 : vector<1x10x10xf32>
    %791 = vector.broadcast %65 : f32 to vector<1x10x10xf32>
    %792 = arith.mulf %791, %784 : vector<1x10x10xf32>
    %793 = arith.addf %783, %792 : vector<1x10x10xf32>
    %794 = vector.extract_strided_slice %664 {offsets = [0, 1, 0], sizes = [1, 10, 12], strides = [1, 1, 1]} : vector<1x12x12xf32> to vector<1x10x12xf32>
    %795 = vector.extract_strided_slice %794 {offsets = [0, 0, 0], sizes = [1, 10, 10], strides = [1, 1, 1]} : vector<1x10x12xf32> to vector<1x10x10xf32>
    %796 = vector.broadcast %12 : f32 to vector<1x10x10xf32>
    %797 = arith.mulf %796, %795 : vector<1x10x10xf32>
    %798 = arith.addf %787, %797 : vector<1x10x10xf32>
    %799 = vector.broadcast %39 : f32 to vector<1x10x10xf32>
    %800 = arith.mulf %799, %795 : vector<1x10x10xf32>
    %801 = arith.addf %790, %800 : vector<1x10x10xf32>
    %802 = vector.broadcast %66 : f32 to vector<1x10x10xf32>
    %803 = arith.mulf %802, %795 : vector<1x10x10xf32>
    %804 = arith.addf %793, %803 : vector<1x10x10xf32>
    %805 = vector.extract_strided_slice %794 {offsets = [0, 0, 1], sizes = [1, 10, 10], strides = [1, 1, 1]} : vector<1x10x12xf32> to vector<1x10x10xf32>
    %806 = vector.broadcast %13 : f32 to vector<1x10x10xf32>
    %807 = arith.mulf %806, %805 : vector<1x10x10xf32>
    %808 = arith.addf %798, %807 : vector<1x10x10xf32>
    %809 = vector.broadcast %40 : f32 to vector<1x10x10xf32>
    %810 = arith.mulf %809, %805 : vector<1x10x10xf32>
    %811 = arith.addf %801, %810 : vector<1x10x10xf32>
    %812 = vector.broadcast %67 : f32 to vector<1x10x10xf32>
    %813 = arith.mulf %812, %805 : vector<1x10x10xf32>
    %814 = arith.addf %804, %813 : vector<1x10x10xf32>
    %815 = vector.extract_strided_slice %794 {offsets = [0, 0, 2], sizes = [1, 10, 10], strides = [1, 1, 1]} : vector<1x10x12xf32> to vector<1x10x10xf32>
    %816 = vector.broadcast %14 : f32 to vector<1x10x10xf32>
    %817 = arith.mulf %816, %815 : vector<1x10x10xf32>
    %818 = arith.addf %808, %817 : vector<1x10x10xf32>
    %819 = vector.broadcast %41 : f32 to vector<1x10x10xf32>
    %820 = arith.mulf %819, %815 : vector<1x10x10xf32>
    %821 = arith.addf %811, %820 : vector<1x10x10xf32>
    %822 = vector.broadcast %68 : f32 to vector<1x10x10xf32>
    %823 = arith.mulf %822, %815 : vector<1x10x10xf32>
    %824 = arith.addf %814, %823 : vector<1x10x10xf32>
    %825 = vector.extract_strided_slice %664 {offsets = [0, 2, 0], sizes = [1, 10, 12], strides = [1, 1, 1]} : vector<1x12x12xf32> to vector<1x10x12xf32>
    %826 = vector.extract_strided_slice %825 {offsets = [0, 0, 0], sizes = [1, 10, 10], strides = [1, 1, 1]} : vector<1x10x12xf32> to vector<1x10x10xf32>
    %827 = vector.broadcast %15 : f32 to vector<1x10x10xf32>
    %828 = arith.mulf %827, %826 : vector<1x10x10xf32>
    %829 = arith.addf %818, %828 : vector<1x10x10xf32>
    %830 = vector.broadcast %42 : f32 to vector<1x10x10xf32>
    %831 = arith.mulf %830, %826 : vector<1x10x10xf32>
    %832 = arith.addf %821, %831 : vector<1x10x10xf32>
    %833 = vector.broadcast %69 : f32 to vector<1x10x10xf32>
    %834 = arith.mulf %833, %826 : vector<1x10x10xf32>
    %835 = arith.addf %824, %834 : vector<1x10x10xf32>
    %836 = vector.extract_strided_slice %825 {offsets = [0, 0, 1], sizes = [1, 10, 10], strides = [1, 1, 1]} : vector<1x10x12xf32> to vector<1x10x10xf32>
    %837 = vector.broadcast %16 : f32 to vector<1x10x10xf32>
    %838 = arith.mulf %837, %836 : vector<1x10x10xf32>
    %839 = arith.addf %829, %838 : vector<1x10x10xf32>
    %840 = vector.broadcast %43 : f32 to vector<1x10x10xf32>
    %841 = arith.mulf %840, %836 : vector<1x10x10xf32>
    %842 = arith.addf %832, %841 : vector<1x10x10xf32>
    %843 = vector.broadcast %70 : f32 to vector<1x10x10xf32>
    %844 = arith.mulf %843, %836 : vector<1x10x10xf32>
    %845 = arith.addf %835, %844 : vector<1x10x10xf32>
    %846 = vector.extract_strided_slice %825 {offsets = [0, 0, 2], sizes = [1, 10, 10], strides = [1, 1, 1]} : vector<1x10x12xf32> to vector<1x10x10xf32>
    %847 = vector.broadcast %17 : f32 to vector<1x10x10xf32>
    %848 = arith.mulf %847, %846 : vector<1x10x10xf32>
    %849 = arith.addf %839, %848 : vector<1x10x10xf32>
    %850 = vector.broadcast %44 : f32 to vector<1x10x10xf32>
    %851 = arith.mulf %850, %846 : vector<1x10x10xf32>
    %852 = arith.addf %842, %851 : vector<1x10x10xf32>
    %853 = vector.broadcast %71 : f32 to vector<1x10x10xf32>
    %854 = arith.mulf %853, %846 : vector<1x10x10xf32>
    %855 = arith.addf %845, %854 : vector<1x10x10xf32>
    %856 = vector.extract_strided_slice %666 {offsets = [0, 0, 0], sizes = [1, 10, 12], strides = [1, 1, 1]} : vector<1x12x12xf32> to vector<1x10x12xf32>
    %857 = vector.extract_strided_slice %856 {offsets = [0, 0, 0], sizes = [1, 10, 10], strides = [1, 1, 1]} : vector<1x10x12xf32> to vector<1x10x10xf32>
    %858 = vector.broadcast %18 : f32 to vector<1x10x10xf32>
    %859 = arith.mulf %858, %857 : vector<1x10x10xf32>
    %860 = arith.addf %849, %859 : vector<1x10x10xf32>
    %861 = vector.broadcast %45 : f32 to vector<1x10x10xf32>
    %862 = arith.mulf %861, %857 : vector<1x10x10xf32>
    %863 = arith.addf %852, %862 : vector<1x10x10xf32>
    %864 = vector.broadcast %72 : f32 to vector<1x10x10xf32>
    %865 = arith.mulf %864, %857 : vector<1x10x10xf32>
    %866 = arith.addf %855, %865 : vector<1x10x10xf32>
    %867 = vector.extract_strided_slice %856 {offsets = [0, 0, 1], sizes = [1, 10, 10], strides = [1, 1, 1]} : vector<1x10x12xf32> to vector<1x10x10xf32>
    %868 = vector.broadcast %19 : f32 to vector<1x10x10xf32>
    %869 = arith.mulf %868, %867 : vector<1x10x10xf32>
    %870 = arith.addf %860, %869 : vector<1x10x10xf32>
    %871 = vector.broadcast %46 : f32 to vector<1x10x10xf32>
    %872 = arith.mulf %871, %867 : vector<1x10x10xf32>
    %873 = arith.addf %863, %872 : vector<1x10x10xf32>
    %874 = vector.broadcast %73 : f32 to vector<1x10x10xf32>
    %875 = arith.mulf %874, %867 : vector<1x10x10xf32>
    %876 = arith.addf %866, %875 : vector<1x10x10xf32>
    %877 = vector.extract_strided_slice %856 {offsets = [0, 0, 2], sizes = [1, 10, 10], strides = [1, 1, 1]} : vector<1x10x12xf32> to vector<1x10x10xf32>
    %878 = vector.broadcast %20 : f32 to vector<1x10x10xf32>
    %879 = arith.mulf %878, %877 : vector<1x10x10xf32>
    %880 = arith.addf %870, %879 : vector<1x10x10xf32>
    %881 = vector.broadcast %47 : f32 to vector<1x10x10xf32>
    %882 = arith.mulf %881, %877 : vector<1x10x10xf32>
    %883 = arith.addf %873, %882 : vector<1x10x10xf32>
    %884 = vector.broadcast %74 : f32 to vector<1x10x10xf32>
    %885 = arith.mulf %884, %877 : vector<1x10x10xf32>
    %886 = arith.addf %876, %885 : vector<1x10x10xf32>
    %887 = vector.extract_strided_slice %666 {offsets = [0, 1, 0], sizes = [1, 10, 12], strides = [1, 1, 1]} : vector<1x12x12xf32> to vector<1x10x12xf32>
    %888 = vector.extract_strided_slice %887 {offsets = [0, 0, 0], sizes = [1, 10, 10], strides = [1, 1, 1]} : vector<1x10x12xf32> to vector<1x10x10xf32>
    %889 = vector.broadcast %21 : f32 to vector<1x10x10xf32>
    %890 = arith.mulf %889, %888 : vector<1x10x10xf32>
    %891 = arith.addf %880, %890 : vector<1x10x10xf32>
    %892 = vector.broadcast %48 : f32 to vector<1x10x10xf32>
    %893 = arith.mulf %892, %888 : vector<1x10x10xf32>
    %894 = arith.addf %883, %893 : vector<1x10x10xf32>
    %895 = vector.broadcast %75 : f32 to vector<1x10x10xf32>
    %896 = arith.mulf %895, %888 : vector<1x10x10xf32>
    %897 = arith.addf %886, %896 : vector<1x10x10xf32>
    %898 = vector.extract_strided_slice %887 {offsets = [0, 0, 1], sizes = [1, 10, 10], strides = [1, 1, 1]} : vector<1x10x12xf32> to vector<1x10x10xf32>
    %899 = vector.broadcast %22 : f32 to vector<1x10x10xf32>
    %900 = arith.mulf %899, %898 : vector<1x10x10xf32>
    %901 = arith.addf %891, %900 : vector<1x10x10xf32>
    %902 = vector.broadcast %49 : f32 to vector<1x10x10xf32>
    %903 = arith.mulf %902, %898 : vector<1x10x10xf32>
    %904 = arith.addf %894, %903 : vector<1x10x10xf32>
    %905 = vector.broadcast %76 : f32 to vector<1x10x10xf32>
    %906 = arith.mulf %905, %898 : vector<1x10x10xf32>
    %907 = arith.addf %897, %906 : vector<1x10x10xf32>
    %908 = vector.extract_strided_slice %887 {offsets = [0, 0, 2], sizes = [1, 10, 10], strides = [1, 1, 1]} : vector<1x10x12xf32> to vector<1x10x10xf32>
    %909 = vector.broadcast %23 : f32 to vector<1x10x10xf32>
    %910 = arith.mulf %909, %908 : vector<1x10x10xf32>
    %911 = arith.addf %901, %910 : vector<1x10x10xf32>
    %912 = vector.broadcast %50 : f32 to vector<1x10x10xf32>
    %913 = arith.mulf %912, %908 : vector<1x10x10xf32>
    %914 = arith.addf %904, %913 : vector<1x10x10xf32>
    %915 = vector.broadcast %77 : f32 to vector<1x10x10xf32>
    %916 = arith.mulf %915, %908 : vector<1x10x10xf32>
    %917 = arith.addf %907, %916 : vector<1x10x10xf32>
    %918 = vector.extract_strided_slice %666 {offsets = [0, 2, 0], sizes = [1, 10, 12], strides = [1, 1, 1]} : vector<1x12x12xf32> to vector<1x10x12xf32>
    %919 = vector.extract_strided_slice %918 {offsets = [0, 0, 0], sizes = [1, 10, 10], strides = [1, 1, 1]} : vector<1x10x12xf32> to vector<1x10x10xf32>
    %920 = vector.broadcast %24 : f32 to vector<1x10x10xf32>
    %921 = arith.mulf %920, %919 : vector<1x10x10xf32>
    %922 = arith.addf %911, %921 : vector<1x10x10xf32>
    %923 = vector.broadcast %51 : f32 to vector<1x10x10xf32>
    %924 = arith.mulf %923, %919 : vector<1x10x10xf32>
    %925 = arith.addf %914, %924 : vector<1x10x10xf32>
    %926 = vector.broadcast %78 : f32 to vector<1x10x10xf32>
    %927 = arith.mulf %926, %919 : vector<1x10x10xf32>
    %928 = arith.addf %917, %927 : vector<1x10x10xf32>
    %929 = vector.extract_strided_slice %918 {offsets = [0, 0, 1], sizes = [1, 10, 10], strides = [1, 1, 1]} : vector<1x10x12xf32> to vector<1x10x10xf32>
    %930 = vector.broadcast %25 : f32 to vector<1x10x10xf32>
    %931 = arith.mulf %930, %929 : vector<1x10x10xf32>
    %932 = arith.addf %922, %931 : vector<1x10x10xf32>
    %933 = vector.broadcast %52 : f32 to vector<1x10x10xf32>
    %934 = arith.mulf %933, %929 : vector<1x10x10xf32>
    %935 = arith.addf %925, %934 : vector<1x10x10xf32>
    %936 = vector.broadcast %79 : f32 to vector<1x10x10xf32>
    %937 = arith.mulf %936, %929 : vector<1x10x10xf32>
    %938 = arith.addf %928, %937 : vector<1x10x10xf32>
    %939 = vector.extract_strided_slice %918 {offsets = [0, 0, 2], sizes = [1, 10, 10], strides = [1, 1, 1]} : vector<1x10x12xf32> to vector<1x10x10xf32>
    %940 = vector.broadcast %26 : f32 to vector<1x10x10xf32>
    %941 = arith.mulf %940, %939 : vector<1x10x10xf32>
    %942 = arith.addf %932, %941 : vector<1x10x10xf32>
    %943 = vector.broadcast %53 : f32 to vector<1x10x10xf32>
    %944 = arith.mulf %943, %939 : vector<1x10x10xf32>
    %945 = arith.addf %935, %944 : vector<1x10x10xf32>
    %946 = vector.broadcast %80 : f32 to vector<1x10x10xf32>
    %947 = arith.mulf %946, %939 : vector<1x10x10xf32>
    %948 = arith.addf %938, %947 : vector<1x10x10xf32>
    %949 = vector.shape_cast %942 : vector<1x10x10xf32> to vector<1x1x10x10xf32>
    %950 = vector.shape_cast %945 : vector<1x10x10xf32> to vector<1x1x10x10xf32>
    %951 = vector.shape_cast %948 : vector<1x10x10xf32> to vector<1x1x10x10xf32>
    %952 = tpu.concatenate %949, %950, %951 in 1 : vector<1x1x10x10xf32>, vector<1x1x10x10xf32>, vector<1x1x10x10xf32> -> vector<1x3x10x10xf32>
    %c0_12 = arith.constant 0 : index
    %c0_13 = arith.constant 0 : index
    %c0_14 = arith.constant 0 : index
    %c0_15 = arith.constant 0 : index
    %953 = vector.load %arg4[%c0_12, %c0_13, %c0_14, %c0_15] : memref<1x3x10x10xf32, #tpu.memory_space<vmem>>, vector<1x3x10x10xf32>
    tpu.vector_store %arg4[%c0_12, %c0_13, %c0_14, %c0_15], %952 {strides = array<i32>} : memref<1x3x10x10xf32, #tpu.memory_space<vmem>>, vector<1x3x10x10xf32>,
    return
  }
  func.func @transform_0(%arg0: i32) -> i32 {
    %c0_i32 = arith.constant 0 : i32
    %c0_i32_0 = arith.constant 0 : i32
    return %c0_i32 : i32
  }
  func.func @transform_1(%arg0: i32) -> i32 {
    %c0_i32 = arith.constant 0 : i32
    %c0_i32_0 = arith.constant 0 : i32
    return %c0_i32 : i32
  }
  func.func @transform_2(%arg0: i32) -> (i32, i32, i32, i32) {
    %c0_i32 = arith.constant 0 : i32
    %c0_i32_0 = arith.constant 0 : i32
    %c0_i32_1 = arith.constant 0 : i32
    %c0_i32_2 = arith.constant 0 : i32
    return %arg0, %c0_i32, %c0_i32_0, %c0_i32_1 : i32, i32, i32, i32
  }
  func.func @transform_3(%arg0: i32) -> (i32, i32, i32, i32) {
    %c0_i32 = arith.constant 0 : i32
    %c0_i32_0 = arith.constant 0 : i32
    %c0_i32_1 = arith.constant 0 : i32
    %c0_i32_2 = arith.constant 0 : i32
    return %arg0, %c0_i32, %c0_i32_0, %c0_i32_1 : i32, i32, i32, i32
  }
}

</mosaic_0001>

<bundles_post_ra>
// kernel: model_forward.1
= control target key start
LH: loop header
LB: loop body
LE: loop exit
PB: predicated region body
PF: predicated region fallthrough
CT: control target
= control target key end

     0   :  { %8 = vsyncpa [#allocation4], 0  ;;  %s7145_s0 = inlined_call_operand.vmem [shape: f32[81], index: 0, kind: input, shape index: {}]   ;;  %s7146_s1 = inlined_call_operand.vmem [shape: f32[3], index: 1, kind: input, shape index: {}]   ;;  %s7147_s2 = inlined_call_operand.hbm [shape: f32[2,3,16,16], index: 2, kind: input, shape index: {}]   ;;  %s7148_s3 = inlined_call_operand.vmem [shape: f32[2,3,10,10], index: 3, kind: output, shape index: {}]  }
   0x1   :  { %9 = vsyncpa [#allocation6], 0 }
   0x2   :  { %10 = vsyncpa [#allocation3], 0 }
   0x3   :  { %12 = vsyncpa [#allocation3 + $0x1], 0  ;;  %s3769_s12 = smov 0   ;;  %s3771_s13 = smov 0  }
   0x4   :  { %s3773_s14 = smov 0   ;;  %s3775_s15 = smov 0  }
   0x5 LB: > { %s3788_s16 = sadd.s32 4294967295, %s3740_s15   ;;  %s3791_s17 = sadd.s32 1, %s3740_s15   ;;  %s3740_s15 = sphi %s3775_s15, %s8121_s15   ;;  %s3736_s14 = sphi %s3773_s14, %s8120_s14   ;;  %s3732_s13 = sphi %s3771_s13, %s8119_s13   ;;  %s3728_s12 = sphi %s3769_s12, %s8118_s12  }
   0x6   : > { %s64_s18 = ssub.s32 %s3740_s15, %s3791_s17  ;;  %s67_s19 = sadd.s32 1, %s3736_s14 }
   0x7   : > { %p65_p0 = scmp.eq.s32.totalorder %s64_s18, 0  ;;  %p74_p1 = scmp.ne.s32.totalorder %s3736_s14, %s3732_s13 }
   0x8   : > { %p75_p2 = scmp.eq.s32.totalorder %s3740_s15, 0  ;;  %p80_p3 = scmp.ne.s32.totalorder %s3732_s13, %s3728_s12 }
   0x9   : > { %s3801_s20 = scalar_select %p65_p0, %s3736_s14, %s67_s19  }
   0xa   : > { %p3803_p4 = por %p75_p2, %p74_p1  ;;  %p7149_p5 = scmp.eq.s32.totalorder %s3788_s16, 0 }
   0xb   : > { %p3474_p6 = scmp.ge.s32.totalorder %s3740_s15, 1  ;;  %p117_p7 = scmp.lt.s32.totalorder %s3740_s15, 3 }
   0xc   : > { %p3812_p8 = por %p7149_p5, %p80_p3  ;;  %s130_s26 = sshll.u32 %s7145_s0, 4  ;;  %s131_s26 = int_to_ptr.vmem [resolvable:$true] %s130_s26 }
   0xd   : > { %p3816_p9 = pnand %p3474_p6, %p117_p7  ;;  %p3594_p11 = scmp.lt.s32.totalorder %s3740_s15, 2 }
   0xe   : > { %s7505_s22 = scalar_select %p3812_p8, 1, 0 }
   0xf   : > { %s7506_s23 = scalar_select %p3816_p9, 1, 0 }
  0x10   : > { %p3581_p10 = pneg %p3816_p9  ;;  %s141_s29 = sshll.u32 %s7146_s1, 4  ;;  %s142_s29 = int_to_ptr.vmem [resolvable:$true] %s141_s29 }
  0x11   : > { %p3837_p13 = pnand %p3594_p11, %p3803_p4  ;;  %s152_s5 = sand.u32 1, %s3736_s14  }
  0x12   : > { %p3831_p12 = pnand %p3581_p10, %p7149_p5  ;;  %s3638_s6 = scalar_lea.vmem %s131_s26, 16 }
  0x13   : > { %s7508_s4 = scalar_select %p3837_p13, 1, 0 }
  0x14   : > { %p3639_p0 = scmp.ne.s32.totalorder %s131_s26, %s3638_s6  ;;  %p3640_p1 = pneg %p3831_p12 }
  0x15   : > { %p3646_p6 = scmp.lt.s32.totalorder %s131_s26, %s131_s26  ;;  %p3647_p7 = scmp.lt.s32.totalorder %s3638_s6, %s3638_s6 }
  0x16   : > { %p3641_p2 = pnand %p3640_p1, %p3639_p0 }
  0x17   : > { %p3648_p10 = por %p3647_p7, %p3646_p6 }
  0x18   : > { %p3642_p3 = pneg %p3641_p2 }
  0x1a   : > { %p3649_p5 = pnand %p3648_p10, %p3642_p3 }
  0x1c   : > { %3652 = shalt.err (!%p3649_p5)
}
  0x1d   : > { %s3742_s7 = smov [#allocation2]   ;;  %s3653_s8 = scalar_lea.vmem %s142_s29, 16 }
  0x1e   : > { %3584 = dma.vmem_to_smem (!%p3831_p12), %s131_s26, 16, %s3742_s7, [#allocation4]  }
  0x1f   : > { %p3654_p4 = scmp.ne.s32.totalorder %s142_s29, %s3653_s8  ;;  %p3661_p9 = scmp.lt.s32.totalorder %s142_s29, %s142_s29 }
  0x20   : > { %p3662_p13 = scmp.lt.s32.totalorder %s3653_s8, %s3653_s8 }
  0x21   : > { %p3656_p11 = pnand %p3654_p4, %p3640_p1 }
  0x22   : > { %p3663_p0 = por %p3662_p13, %p3661_p9 }
  0x23   : > { %p3657_p8 = pneg %p3656_p11 }
  0x25   : > { %p3664_p2 = pnand %p3663_p0, %p3657_p8 }
  0x27   : > { %3667 = shalt.err (!%p3664_p2)
}
  0x28   : > { %s3743_s9 = smov [#allocation5]   ;;  %s3567_s10 = smul.u32 48, %s152_s5 }
  0x29   : > { %3587 = dma.vmem_to_smem (!%p3831_p12), %s142_s29, 16, %s3743_s9, [#allocation6]  }
  0x2a   : > { %s3568_s11 = smul.u32 768, %s3740_s15  ;;  %s156_s21 = scalar_lea.vmem [#allocation7], %s3567_s10 }
  0x2b   : > { %s163_s24 = sshll.u32 %s156_s21, 4  ;;  %s3860_s25 = scalar_lea.sflag [#allocation3], %s152_s5  ;;  %s3856_s24 = int_to_ptr.vmem [resolvable:$true] %s163_s24 }
  0x2c   : > { %s3854_s19 = scalar_lea.hbm %s7147_s2, %s3568_s11  ;;  %p7509_p8 = scmp.ne.s32.totalorder %s7508_s4, 0 }
  0x2d   : > { %s3668_s26 = scalar_lea.hbm %s3854_s19, 768  ;;  %s3673_s28 = scalar_lea.hbm %s7147_s2, 1536 }
  0x2e   : > { %p3669_p5 = scmp.ne.s32.totalorder %s3854_s19, %s3668_s26  ;;  %p3670_p9 = pneg %p7509_p8 }
  0x2f   : > { %p3674_p1 = scmp.lt.u32.totalorder %s3854_s19, %s7147_s2  ;;  %p3675_p3 = scmp.lt.u32.totalorder %s3673_s28, %s3668_s26 }
  0x30   : > { %p3671_p12 = pnand %p3670_p9, %p3669_p5  ;;  %p3677_p7 = scmp.lt.u32.totalorder %s3668_s26, %s3854_s19 }
  0x31   : > { %p3676_p6 = por %p3675_p3, %p3674_p1 }
  0x32   : > { %p3672_p13 = pneg %p3671_p12 }
  0x33   : > { %p3678_p10 = por %p3677_p7, %p3676_p6 }
  0x35   : > { %p3679_p4 = pnand %p3678_p10, %p3672_p13 }
  0x37   : > { %3682 = shalt.err (!%p3679_p4)
}
  0x38   : > { %s3683_s5 = scalar_lea.vmem %s3856_s24, 768  ;;  %s3744_s6 = smov [#allocation7]  }
  0x39   : > { %p3684_p11 = scmp.ne.s32.totalorder %s3856_s24, %s3683_s5  ;;  %s3688_s7 = sshll.u32 %s3744_s6, 4  ;;  %s3689_s7 = int_to_ptr.vmem [resolvable:$false] %s3688_s7 }
  0x3a   : > { %s3690_s8 = scalar_lea.vmem %s3689_s7, 1536  ;;  %p3691_p5 = scmp.lt.s32.totalorder %s3856_s24, %s3689_s7 }
  0x3b   : > { %p3686_p0 = pnand %p3684_p11, %p3670_p9  ;;  %p3692_p12 = scmp.lt.s32.totalorder %s3690_s8, %s3683_s5 }
  0x3d   : > { %p3687_p2 = pneg %p3686_p0  ;;  %p3693_p1 = por %p3692_p12, %p3691_p5 }
  0x3f   : > { %p3694_p3 = pnand %p3693_p1, %p3687_p2 }
  0x41   : > { %3697 = shalt.err (!%p3694_p3)
}
  0x42   : > { %s3745_s9 = smov 128   ;;  %s3746_s10 = smov 8  }
  0x43   : > { %3591 = dma.hbm_to_vmem [thread:$0]  (!%p7509_p8), %s3854_s19, 768, %s3856_s24, %s3860_s25, %s3745_s9, %s3745_s9, %s3746_s10  }
  0x44   : > { %p7510_p9 = scmp.ne.s32.totalorder %s7506_s23, 0 }
  0x46   : > { %175 = sbr.rel (%p7510_p9) target bundleno = 1082 (0x43a), region = 32 }
  0x4d   : > { %p7511_p13 = scmp.eq.s32.totalorder %s3788_s16, 0 }
  0x4f   : > { %3715 = dma.done.wait (%p7511_p13), [#allocation4], 16   ;;  %p7512_p6 = pmov %p7511_p13 }
  0x51   : > { %3717 = vsyncadd (%p7512_p6), [#allocation4], 4294967280  ;;  %p7513_p7 = pmov %p7512_p6 }
  0x52   : > { %p7514_p10 = pmov %p7512_p6 }
  0x53   : > { %3719 = dma.done.wait (%p7513_p7), [#allocation6], 16  }
  0x54   : > { %3721 = vsyncadd (%p7514_p10), [#allocation6], 4294967280  ;;  %s185_s11 = sand.u32 1, %s3732_s13   ;;  %p7515_p8 = scmp.ne.s32.totalorder %s7505_s22, 0 }
  0x55   : > { %s3569_s4 = smul.u32 48, %s185_s11  ;;  %s186_s12 = scalar_lea.sflag [#allocation3], %s185_s11 }
  0x57   : > { %s3899_s18 = scalar_lea.vmem [#allocation7], %s3569_s4 }
  0x58   : > { %3723 = dma.done.wait (%p7515_p8), %s186_s12, 768  }
  0x59   : > { %3725 = vsyncadd (%p7515_p8), %s186_s12, 4294966528 }
  0x5a   : > { %194 = sfence }
  0x5b   : > { %s3510_s23 = sld [smem:[#allocation2 + $0x1c]]  ;;  %s3483_s19 = sld [smem:[#allocation2 + $0x1]]  ;;  %v3906_v0 = vld [vmem:[%s3899_s18] sm:$0xff]  ;;  %v3911_v2 = vld [vmem:[%s3899_s18 + $0x8] sm:$0xff]  ;;  %vm409_vm0 = vcmask 1046528   ;;  %vm542_vm1 = vcmask 1045504  }
  0x5c   : > { %s3537_s21 = sld [smem:[#allocation2 + $0x37]]  ;;  %s3484_s24 = sld [smem:[#allocation2 + $0x2]]  ;;  %vm3378_vm2 = vcmask 74752   ;;  %vm3376_vm3 = vcmask 80896  }
  0x5d   : > { %s3747_s22 = smov 127   ;;  %s3511_s25 = sld [smem:[#allocation2 + $0x1d]] }
  0x5e   : > { %s3486_s26 = sld [smem:[#allocation2 + $0x4]]  ;;  %s3538_s15 = sld [smem:[#allocation2 + $0x38]] }
  0x5f   : > { %s3513_s27 = sld [smem:[#allocation2 + $0x1f]]  ;;  %s3540_s28 = sld [smem:[#allocation2 + $0x3a]] }
  0x60   : > { %s3748_s29 = smov 126   ;;  %s3487_s30 = sld [smem:[#allocation2 + $0x5]] }
  0x61   : > { %v3908_v1 = vstv %s3510_s23  ;;  %v3915_v4 = vstv %s3483_s19  ;;  %s3514_s5 = sld [smem:[#allocation2 + $0x20]]  ;;  %s3541_s6 = sld [smem:[#allocation2 + $0x3b]] }
  0x62   : > { %7516 = vst [vmem:[#allocation11_spill] sm:$0xff] %v3908_v1  ;;  %v340_v3 = vmul.f32 %v3908_v1, %v3906_v0  ;;  %7517 = vst [vmem:[#allocation12_spill] sm:$0xff] %v3915_v4  ;;  %v327_v5 = vmul.f32 %v3915_v4, %v3906_v0  ;;  %v341_v6 = vmul.f32 %v3908_v1, %v3911_v2  ;;  %v3925_v8 = vstv %s3537_s21  ;;  %s3489_s7 = sld [smem:[#allocation2 + $0x7]]  ;;  %s3516_s8 = sld [smem:[#allocation2 + $0x22]] }
  0x63   : > { %v328_v7 = vmul.f32 %v3915_v4, %v3911_v2  ;;  %7518 = vst [vmem:[#allocation13_spill] sm:$0xff] %v3925_v8  ;;  %v354_v9 = vmul.f32 %v3925_v8, %v3911_v2  ;;  %v353_v10 = vmul.f32 %v3925_v8, %v3906_v0  ;;  %v3933_v11 = vstv %s3484_s24  ;;  %s3543_s9 = sld [smem:[#allocation2 + $0x3d]]  ;;  %s3485_s10 = sld [smem:[#allocation2 + $0x3]] }
  0x64   : > { %344 = vrot.lane.b32.xlu1 %v340_v3, %s3747_s22  ;;  %331 = vrot.lane.b32.xlu0 %v327_v5, %s3747_s22  ;;  %7519 = vst [vmem:[#allocation14_spill] sm:$0xff] %v3933_v11  ;;  %v367_v12 = vmul.f32 %v3933_v11, %v3911_v2  ;;  %v366_v13 = vmul.f32 %v3933_v11, %v3906_v0  ;;  %v3941_v14 = vstv %s3511_s25  ;;  %v3943_v15 = vstv %s3486_s26  ;;  %s3490_s11 = sld [smem:[#allocation2 + $0x8]]  ;;  %s3512_s4 = sld [smem:[#allocation2 + $0x1e]] }
  0x65   : > { %7520 = vst [vmem:[#allocation15_spill] sm:$0xff] %v3941_v14  ;;  %7521 = vst [vmem:[#allocation16_spill] sm:$0xff] %v3943_v15  ;;  %v380_v16 = vmul.f32 %v3941_v14, %v3911_v2  ;;  %v379_v17 = vmul.f32 %v3941_v14, %v3906_v0  ;;  %v3951_v18 = vstv %s3538_s15  ;;  %v443_v19 = vmul.f32 %v3943_v15, %v3911_v2  ;;  %s3517_s12 = sld [smem:[#allocation2 + $0x23]]  ;;  %s4025_s23 = sld [smem:[#allocation2 + $0x39]] }
  0x66   : > { %7522 = vst [vmem:[#allocation17_spill] sm:$0xff] %v3951_v18  ;;  %v442_v20 = vmul.f32 %v3943_v15, %v3906_v0  ;;  %v3957_v21 = vstv %s3513_s27  ;;  %v393_v22 = vmul.f32 %v3951_v18, %v3911_v2  ;;  %v392_v23 = vmul.f32 %v3951_v18, %v3906_v0  ;;  %s4028_s19 = sld [smem:[#allocation2 + $0x3e]]  ;;  %s4064_s24 = sld [smem:[#allocation2 + $0x21]] }
  0x67   : > { %7523 = vst [vmem:[#allocation18_spill] sm:$0xff] %v3957_v21  ;;  %v459_v24 = vmul.f32 %v3957_v21, %v3911_v2  ;;  %v447_v25 = vrot.slane %v443_v19, 1  ;;  %v458_v27 = vmul.f32 %v3957_v21, %v3906_v0  ;;  %v3969_v28 = vstv %s3540_s28  ;;  %s4048_s21 = sld [smem:[#allocation2 + $0x6]]  ;;  %s3542_s25 = sld [smem:[#allocation2 + $0x3c]] }
  0x68   : > { %346 = vrot.lane.b32.xlu1 %v341_v6, %s3747_s22  ;;  %333 = vrot.lane.b32.xlu0 %v328_v7, %s3747_s22  ;;  %v446_v26 = vrot.slane %v442_v20, 1  ;;  %7524 = vst [vmem:[#allocation19_spill] sm:$0xff] %v3969_v28  ;;  %v3973_v30 = vstv %s3487_s30  ;;  %v475_v33 = vmul.f32 %v3969_v28, %v3911_v2  ;;  %v474_v34 = vmul.f32 %v3969_v28, %v3906_v0  ;;  %s3492_s26 = sld [smem:[#allocation2 + $0xa]]  ;;  %s3519_s15 = sld [smem:[#allocation2 + $0x25]] }
  0x69   : > { %v463_v29 = vrot.slane %v459_v24, 1  ;;  %7525 = vst [vmem:[#allocation20_spill] sm:$0xff] %v3973_v30  ;;  %v462_v32 = vrot.slane %v458_v27, 1  ;;  %v491_v35 = vmul.f32 %v3973_v30, %v3911_v2  ;;  %v3984_v36 = vstv %s3514_s5  ;;  %s3546_s27 = sld [smem:[#allocation2 + $0x40]]  ;;  %s3493_s28 = sld [smem:[#allocation2 + $0xb]] }
  0x6a   : > { %v448_v31 = vsel %vm409_vm0, %v446_v26, %v447_v25  ;;  %7526 = vst [vmem:[#allocation21_spill] sm:$0xff] %v3984_v36  ;;  %v479_v38 = vrot.slane %v475_v33, 1  ;;  %v478_v39 = vrot.slane %v474_v34, 1  ;;  %v490_v40 = vmul.f32 %v3973_v30, %v3906_v0  ;;  %s3520_s30 = sld [smem:[#allocation2 + $0x26]]  ;;  %s3495_s5 = sld [smem:[#allocation2 + $0xd]] }
  0x6b   : > { %v464_v37 = vsel %vm409_vm0, %v462_v32, %v463_v29  ;;  %v507_v41 = vmul.f32 %v3984_v36, %v3911_v2  ;;  %v506_v42 = vmul.f32 %v3984_v36, %v3906_v0  ;;  %v495_v44 = vrot.slane %v491_v35, 1  ;;  %p213_p4 = scmp.lt.s32.totalorder %s3788_s16, 1 }
  0x6c   : > { %359 = vrot.lane.b32.xlu1 %v354_v9, %s3747_s22  ;;  %357 = vrot.lane.b32.xlu0 %v353_v10, %s3747_s22  ;;  %v480_v43 = vsel %vm409_vm0, %v478_v39, %v479_v38  ;;  %v494_v45 = vrot.slane %v490_v40, 1  ;;  %v3996_v46 = vstv %s3541_s6  ;;  %v4005_v52 = vstv %s3489_s7  ;;  %s3547_s6 = sld [smem:[#allocation2 + $0x41]]  ;;  %s3522_s7 = sld [smem:[#allocation2 + $0x28]] }
  0x6d   : > { %7527 = vst [vmem:[#allocation22_spill] sm:$0xff] %v3996_v46  ;;  %v511_v47 = vrot.slane %v507_v41, 1  ;;  %v510_v48 = vrot.slane %v506_v42, 1  ;;  %v523_v50 = vmul.f32 %v3996_v46, %v3911_v2  ;;  %v522_v51 = vmul.f32 %v3996_v46, %v3906_v0  ;;  %7528 = vst [vmem:[#allocation23_spill] sm:$0xff] %v4005_v52  ;;  %s8123_s16 = smov (!%p213_p4, %s3788_s16), 1 }
  0x6e   : > { %v496_v49 = vsel %vm409_vm0, %v494_v45, %v495_v44  ;;  %v576_v54 = vmul.f32 %v4005_v52, %v3911_v2  ;;  %v575_v57 = vmul.f32 %v4005_v52, %v3906_v0  ;;  %v4014_v58 = vstv %s3516_s8  ;;  %s3549_s8 = sld [smem:[#allocation2 + $0x43]] }
  0x6f   : > { %v512_v53 = vsel %vm409_vm0, %v510_v48, %v511_v47  ;;  %v527_v55 = vrot.slane %v523_v50, 1  ;;  %v526_v56 = vrot.slane %v522_v51, 1  ;;  %7529 = vst [vmem:[#allocation24_spill] sm:$0xff] %v4014_v58  ;;  %v592_v59 = vmul.f32 %v4014_v58, %v3911_v2 }
  0x70   : > { %372 = vrot.lane.b32.xlu1 %v367_v12, %s3748_s29  ;;  %370 = vrot.lane.b32.xlu0 %v366_v13, %s3748_s29  ;;  %v591_v60 = vmul.f32 %v4014_v58, %v3906_v0  ;;  %v580_v62 = vrot.slane %v576_v54, 2  ;;  %v579_v63 = vrot.slane %v575_v57, 2  ;;  %v4023_v3 = vstv %s3543_s9  ;;  %s3496_s9 = sld [smem:[#allocation2 + $0xe]] }
  0x71   : > { %v528_v61 = vsel %vm409_vm0, %v526_v56, %v527_v55  ;;  %7530 = vst [vmem:[#allocation25_spill] sm:$0xff] %v4023_v3  ;;  %v4030_v5 = vstv %s3485_s10  ;;  %v596_v6 = vrot.slane %v592_v59, 2  ;;  %v608_v9 = vmul.f32 %v4023_v3, %v3911_v2  ;;  %s3523_s10 = sld [smem:[#allocation2 + $0x29]] }
  0x72   : > { %7531 = vst [vmem:[#allocation26_spill] sm:$0xff] %v4030_v5  ;;  %v595_v7 = vrot.slane %v591_v60, 2  ;;  %v4035_v10 = vstv %s3490_s11  ;;  %v581_v12 = vsel %vm542_vm1, %v579_v63, %v580_v62  ;;  %v607_v13 = vmul.f32 %v4023_v3, %v3906_v0  ;;  %s3550_s11 = sld [smem:[#allocation2 + $0x44]] }
  0x73   : > { %7532 = vst [vmem:[#allocation27_spill] sm:$0xff] %v4035_v10  ;;  %v4046_v19 = vstv %s3512_s4  ;;  %v624_v20 = vmul.f32 %v4035_v10, %v3911_v2  ;;  %v4066_v32 = vstv %s3517_s12  ;;  %v4100_v50 = vstv %s4048_s21  ;;  %s3498_s4 = sld [smem:[#allocation2 + $0x10]]  ;;  %s3525_s12 = sld [smem:[#allocation2 + $0x2b]] }
  0x74   : > { %385 = vrot.lane.b32.xlu1 %v380_v16, %s3748_s29  ;;  %383 = vrot.lane.b32.xlu0 %v379_v17, %s3748_s29  ;;  %v4042_v16 = vmul.f32 %v4030_v5, %v3911_v2  ;;  %v405_v17 = vmul.f32 %v4030_v5, %v3906_v0  ;;  %7533 = vst [vmem:[#allocation28_spill] sm:$0xff] %v4046_v19  ;;  %7534 = vst [vmem:[#allocation29_spill] sm:$0xff] %v4066_v32  ;;  %v4121_v59 = vstv %s4064_s24  ;;  %s3509_s21 = sld [smem:[#allocation2 + $0x1b]]  ;;  %s299_s24 = sld [smem:[#allocation5]] }
  0x75   : > { %v597_v24 = vsel %vm542_vm1, %v595_v7, %v596_v6  ;;  %v4060_v26 = vmul.f32 %v4046_v19, %v3911_v2  ;;  %v418_v27 = vmul.f32 %v4046_v19, %v3906_v0  ;;  %v628_v41 = vrot.slane %v624_v20, 2  ;;  %7537 = vst [vmem:[#allocation32_spill] sm:$0xff] %v4100_v50  ;;  %7538 = vst [vmem:[#allocation33_spill] sm:$0xff] %v4121_v59 }
  0x76   : > { %v4112_v54 = vmul.f32 %v4100_v50, %v3911_v2  ;;  %v538_v57 = vmul.f32 %v4100_v50, %v3906_v0  ;;  %v4126_v63 = vmul.f32 %v4121_v59, %v3911_v2  ;;  %v551_v7 = vmul.f32 %v4121_v59, %v3906_v0 }
  0x77   : > { %v7157_v34 = vrot.slane %v4060_v26, 1  ;;  %v422_v35 = vrot.slane %v418_v27, 1 }
  0x78   : > { %398 = vrot.lane.b32.xlu1 %v393_v22, %s3748_s29  ;;  %396 = vrot.lane.b32.xlu0 %v392_v23, %s3748_s29  ;;  %v7158_v22 = vrot.slane %v4042_v16, 1  ;;  %v410_v23 = vrot.slane %v405_v17, 1  ;;  %v555_v20 = vrot.slane %v551_v7, 2 }
  0x7a   : > { %v4071_v33 = vsel %vm409_vm0, %v410_v23, %v7158_v22 }
  0x7c   : > { %451 = vrot.lane.b32.xlu1 %v447_v25, %s3747_s22  ;;  %449 = vrot.lane.b32.xlu0 %v448_v31, %s3747_s22  ;;  %v623_v25 = vmul.f32 %v4035_v10, %v3906_v0  ;;  %v611_v31 = vrot.slane %v607_v13, 2 }
  0x7e   : > { %v627_v42 = vrot.slane %v623_v25, 2 }
  0x80   : > { %467 = vrot.lane.b32.xlu1 %v463_v29, %s3747_s22  ;;  %465 = vrot.lane.b32.xlu0 %v464_v37, %s3747_s22  ;;  %v612_v29 = vrot.slane %v608_v9, 2  ;;  %v4075_v37 = vstv %s4025_s23  ;;  %v7155_v9 = vrot.slane %v4126_v63, 2  ;;  %s218_s23 = sld [smem:[#allocation2]] }
  0x81   : > { %7535 = vst [vmem:[#allocation30_spill] sm:$0xff] %v4075_v37  ;;  %v4083_v39 = vmul.f32 %v4075_v37, %v3911_v2  ;;  %v430_v40 = vmul.f32 %v4075_v37, %v3906_v0 }
  0x82   : > { %v613_v45 = vsel %vm542_vm1, %v611_v31, %v612_v29 }
  0x83   : > { %v7154_v48 = vrot.slane %v4083_v39, 1 }
  0x84   : > { %483 = vrot.lane.b32.xlu1 %v479_v38, %s3747_s22  ;;  %481 = vrot.lane.b32.xlu0 %v480_v43, %s3747_s22  ;;  %v4079_v38 = vstv %s4028_s19  ;;  %v640_v43 = vmul.f32 %v4066_v32, %v3911_v2  ;;  %s3552_s19 = sld [smem:[#allocation2 + $0x46]] }
  0x85   : > { %7536 = vst [vmem:[#allocation31_spill] sm:$0xff] %v4079_v38  ;;  %v656_v51 = vmul.f32 %v4079_v38, %v3911_v2  ;;  %v655_v56 = vmul.f32 %v4079_v38, %v3906_v0 }
  0x86   : > { %v644_v60 = vrot.slane %v640_v43, 2 }
  0x87   : > { %v660_v13 = vrot.slane %v656_v51, 2 }
  0x88   : > { %499 = vrot.lane.b32.xlu1 %v495_v44, %s3748_s29  ;;  %497 = vrot.lane.b32.xlu0 %v496_v49, %s3748_s29  ;;  %v4093_v44 = vsel %vm409_vm0, %v422_v35, %v7157_v34  ;;  %v434_v49 = vrot.slane %v430_v40, 1  ;;  %v4156_v40 = vld [vmem:[%s3899_s18 + $0x18] sm:$0xff] }
  0x8c   : > { %515 = vrot.lane.b32.xlu1 %v511_v47, %s3748_s29  ;;  %513 = vrot.lane.b32.xlu0 %v512_v53, %s3748_s29  ;;  %v639_v47 = vmul.f32 %v4066_v32, %v3906_v0  ;;  %v4108_v53 = vsel %vm409_vm0, %v434_v49, %v7154_v48  ;;  %v4175_v49 = vstv %s3519_s15  ;;  %s3536_s15 = sld [smem:[#allocation2 + $0x36]] }
  0x8d   : > { %7541 = vst [vmem:[#allocation36_spill] sm:$0xff] %v4175_v49  ;;  %v700_v51 = vmul.f32 %v4175_v49, %v4156_v40 }
  0x90   : > { %531 = vrot.lane.b32.xlu1 %v527_v55, %s3748_s29  ;;  %529 = vrot.lane.b32.xlu0 %v528_v61, %s3748_s29  ;;  %v629_v55 = vsel %vm542_vm1, %v627_v42, %v628_v41  ;;  %v643_v61 = vrot.slane %v639_v47, 2  ;;  %v4162_v42 = vld [vmem:[%s3899_s18 + $0x10] sm:$0xff] }
  0x92   : > { %v645_v23 = vsel %vm542_vm1, %v643_v61, %v644_v60  ;;  %v4191_v61 = vstv %s3493_s28  ;;  %s3564_s28 = sld [smem:[#allocation5 + $0x2]] }
  0x93   : > { %7543 = vst [vmem:[#allocation38_spill] sm:$0xff] %v4191_v61  ;;  %v725_v7 = vmul.f32 %v4191_v61, %v4162_v42 }
  0x94   : > { %584 = vrot.lane.b32.xlu1 %v580_v62, %s3747_s22  ;;  %582 = vrot.lane.b32.xlu0 %v581_v12, %s3747_s22  ;;  %v7156_v62 = vrot.slane %v4112_v54, 2  ;;  %v4132_v12 = vstv %s3542_s25  ;;  %s3499_s25 = sld [smem:[#allocation2 + $0x11]] }
  0x95   : > { %7539 = vst [vmem:[#allocation34_spill] sm:$0xff] %v4132_v12  ;;  %v4143_v25 = vmul.f32 %v4132_v12, %v3911_v2  ;;  %v563_v27 = vmul.f32 %v4132_v12, %v3906_v0 }
  0x97   : > { %v7153_v31 = vrot.slane %v4143_v25, 2  ;;  %v567_v35 = vrot.slane %v563_v27, 2  ;;  %v4209_v27 = vstv %s3547_s6  ;;  %s3528_s6 = sld [smem:[#allocation2 + $0x2e]] }
  0x98   : > { %600 = vrot.lane.b32.xlu1 %v596_v6, %s3747_s22  ;;  %598 = vrot.lane.b32.xlu0 %v597_v24, %s3747_s22  ;;  %v543_v6 = vrot.slane %v538_v57, 2  ;;  %v659_v24 = vrot.slane %v655_v56, 2  ;;  %v4183_v56 = vstv %s3546_s27  ;;  %7546 = vst [vmem:[#allocation41_spill] sm:$0xff] %v4209_v27  ;;  %s3526_s27 = sld [smem:[#allocation2 + $0x2c]] }
  0x99   : > { %v4167_v43 = vsel %vm542_vm1, %v567_v35, %v7153_v31  ;;  %7542 = vst [vmem:[#allocation37_spill] sm:$0xff] %v4183_v56  ;;  %v713_v57 = vmul.f32 %v4183_v56, %v4156_v40 }
  0x9a   : > { %v4138_v17 = vsel %vm542_vm1, %v543_v6, %v7156_v62  ;;  %v661_v2 = vsel %vm542_vm1, %v659_v24, %v660_v13  ;;  %v726_v6 = vmul.f32 %v4191_v61, %v4156_v40  ;;  %v4300_v59 = vstv %s3499_s25  ;;  %s3534_s25 = sld [smem:[#allocation2 + $0x34]] }
  0x9b   : > { %7558 = vst [vmem:[#allocation53_spill] sm:$0xff] %v4300_v59  ;;  %v980_v19 = vmul.f32 %v4300_v59, %v4162_v42 }
  0x9c   : > { %616 = vrot.lane.b32.xlu1 %v612_v29, %s3747_s22  ;;  %614 = vrot.lane.b32.xlu0 %v613_v45, %s3747_s22  ;;  %v4150_v29 = vsel %vm542_vm1, %v555_v20, %v7155_v9  ;;  %v4201_v20 = vstv %s3495_s5  ;;  %v4240_v9 = vstv %s3523_s10  ;;  %s3501_s5 = sld [smem:[#allocation2 + $0x13]]  ;;  %s3504_s10 = sld [smem:[#allocation2 + $0x16]] }
  0x9d   : > { %7545 = vst [vmem:[#allocation40_spill] sm:$0xff] %v4201_v20  ;;  %v801_v35 = vmul.f32 %v4201_v20, %v4156_v40  ;;  %7550 = vst [vmem:[#allocation45_spill] sm:$0xff] %v4240_v9 }
  0xa0   : > { %632 = vrot.lane.b32.xlu1 %v628_v41, %s3748_s29  ;;  %630 = vrot.lane.b32.xlu0 %v629_v55, %s3748_s29  ;;  %v4158_v41 = vstv %s3492_s26  ;;  %v699_v55 = vmul.f32 %v4175_v49, %v4162_v42  ;;  %s3563_s26 = sld [smem:[#allocation5 + $0x1]] }
  0xa1   : > { %7540 = vst [vmem:[#allocation35_spill] sm:$0xff] %v4158_v41  ;;  %v687_v45 = vmul.f32 %v4158_v41, %v4156_v40  ;;  %v686_v47 = vmul.f32 %v4158_v41, %v4162_v42 }
  0xa4   : > { %648 = vrot.lane.b32.xlu1 %v644_v60, %s3748_s29  ;;  %646 = vrot.lane.b32.xlu0 %v645_v23, %s3748_s29  ;;  %v712_v60 = vmul.f32 %v4183_v56, %v4162_v42  ;;  %v4285_v56 = vstv %s3509_s21  ;;  %s3559_s21 = sld [smem:[#allocation2 + $0x4d]] }
  0xa5   : > { %7556 = vst [vmem:[#allocation51_spill] sm:$0xff] %v4285_v56 }
  0xa6   : > { %v4304_v37 = vstv %s3563_s26  ;;  %s3561_s26 = sld [smem:[#allocation2 + $0x4f]] }
  0xa7   : > { %7559 = vst [vmem:[#allocation54_spill] sm:$0xff] %v4304_v37 }
  0xa8   : > { %664 = vrot.lane.b32.xlu1 %v660_v13, %s3748_s29  ;;  %662 = vrot.lane.b32.xlu0 %v661_v2, %s3748_s29  ;;  %v4199_v13 = vstv %s3520_s30  ;;  %v800_v2 = vmul.f32 %v4201_v20, %v4162_v42  ;;  %s3553_s30 = sld [smem:[#allocation2 + $0x47]] }
  0xa9   : > { %7544 = vst [vmem:[#allocation39_spill] sm:$0xff] %v4199_v13  ;;  %v739_v23 = vmul.f32 %v4199_v13, %v4156_v40  ;;  %v738_v24 = vmul.f32 %v4199_v13, %v4162_v42 }
  0xaa   : > { %v4487_v3 = vstv %s3559_s21  ;;  %s4811_s21 = sld [smem:[#allocation2 + $0x30]] }
  0xab   : > { %7577 = vst [vmem:[#allocation72_spill] sm:$0xff] %v4487_v3 }
  0xac   : > { %692 = vrot.lane.b32.xlu1 %v687_v45, %s3747_s22  ;;  %690 = vrot.lane.b32.xlu0 %v686_v47, %s3747_s22  ;;  %v4215_v45 = vstv %s3522_s7  ;;  %v752_v47 = vmul.f32 %v4209_v27, %v4156_v40  ;;  %s3555_s7 = sld [smem:[#allocation2 + $0x49]] }
  0xad   : > { %7547 = vst [vmem:[#allocation42_spill] sm:$0xff] %v4215_v45 }
  0xb0   : > { %705 = vrot.lane.b32.xlu1 %v700_v51, %s3747_s22  ;;  %703 = vrot.lane.b32.xlu0 %v699_v55, %s3747_s22  ;;  %v751_v51 = vmul.f32 %v4209_v27, %v4162_v42  ;;  %v4223_v55 = vstv %s3549_s8  ;;  %s3502_s8 = sld [smem:[#allocation2 + $0x14]] }
  0xb1   : > { %7548 = vst [vmem:[#allocation43_spill] sm:$0xff] %v4223_v55 }
  0xb4   : > { %718 = vrot.lane.b32.xlu1 %v713_v57, %s3747_s22  ;;  %716 = vrot.lane.b32.xlu0 %v712_v60, %s3747_s22  ;;  %v805_v57 = vrot.slane %v801_v35, 1  ;;  %v804_v60 = vrot.slane %v800_v2, 1  ;;  %v832_v35 = vmul.f32 %v4223_v55, %v4162_v42  ;;  %v4236_v2 = vstv %s3496_s9  ;;  %s3529_s9 = sld [smem:[#allocation2 + $0x2f]] }
  0xb5   : > { %7549 = vst [vmem:[#allocation44_spill] sm:$0xff] %v4236_v2 }
  0xb6   : > { %v836_v62 = vrot.slane %v832_v35, 1  ;;  %v4254_v35 = vstv %s3550_s11  ;;  %s3556_s11 = sld [smem:[#allocation2 + $0x4a]] }
  0xb7   : > { %7551 = vst [vmem:[#allocation46_spill] sm:$0xff] %v4254_v35  ;;  %v881_v22 = vmul.f32 %v4254_v35, %v4156_v40 }
  0xb8   : > { %731 = vrot.lane.b32.xlu1 %v726_v6, %s3748_s29  ;;  %729 = vrot.lane.b32.xlu0 %v725_v7, %s3748_s29  ;;  %v817_v6 = vmul.f32 %v4215_v45, %v4156_v40  ;;  %v816_v7 = vmul.f32 %v4215_v45, %v4162_v42  ;;  %v4336_v45 = vstv %s3553_s30  ;;  %s3491_s30 = sld [smem:[#allocation2 + $0x9]] }
  0xb9   : > { %7563 = vst [vmem:[#allocation58_spill] sm:$0xff] %v4336_v45 }
  0xba   : > { %v821_v31 = vrot.slane %v817_v6, 1  ;;  %v820_v48 = vrot.slane %v816_v7, 1  ;;  %v848_v6 = vmul.f32 %v4236_v2, %v4162_v42  ;;  %v864_v7 = vmul.f32 %v4240_v9, %v4162_v42 }
  0xbc   : > { %744 = vrot.lane.b32.xlu1 %v739_v23, %s3748_s29  ;;  %742 = vrot.lane.b32.xlu0 %v738_v24, %s3748_s29  ;;  %v833_v23 = vmul.f32 %v4223_v55, %v4156_v40  ;;  %v806_v24 = vsel %vm409_vm0, %v804_v60, %v805_v57  ;;  %v849_v60 = vmul.f32 %v4236_v2, %v4156_v40  ;;  %v868_v34 = vrot.slane %v864_v7, 1 }
  0xbd   : > { %v885_v7 = vrot.slane %v881_v22, 1  ;;  %v984_v2 = vrot.slane %v980_v19, 2 }
  0xc0   : > { %757 = vrot.lane.b32.xlu1 %v752_v47, %s3748_s29  ;;  %755 = vrot.lane.b32.xlu0 %v751_v51, %s3748_s29  ;;  %v837_v47 = vrot.slane %v833_v23, 1  ;;  %v822_v51 = vsel %vm409_vm0, %v820_v48, %v821_v31  ;;  %v853_v23 = vrot.slane %v849_v60, 1  ;;  %v4263_v60 = vstv %s3498_s4  ;;  %s3531_s4 = sld [smem:[#allocation2 + $0x31]] }
  0xc1   : > { %7552 = vst [vmem:[#allocation47_spill] sm:$0xff] %v4263_v60 }
  0xc2   : > { %v838_v48 = vsel %vm409_vm0, %v836_v62, %v837_v47  ;;  %v880_v62 = vmul.f32 %v4254_v35, %v4162_v42  ;;  %v4320_v35 = vstv %s3526_s27  ;;  %s3535_s27 = sld [smem:[#allocation2 + $0x35]] }
  0xc3   : > { %7561 = vst [vmem:[#allocation56_spill] sm:$0xff] %v4320_v35 }
  0xc4   : > { %809 = vrot.lane.b32.xlu1 %v805_v57, %s3747_s22  ;;  %807 = vrot.lane.b32.xlu0 %v806_v24, %s3747_s22  ;;  %v865_v57 = vmul.f32 %v4240_v9, %v4156_v40  ;;  %v852_v24 = vrot.slane %v848_v6, 1  ;;  %v932_v6 = vmul.f32 %v4263_v60, %v4162_v42 }
  0xc6   : > { %v936_v27 = vrot.slane %v932_v6, 2 }
  0xc8   : > { %825 = vrot.lane.b32.xlu1 %v821_v31, %s3747_s22  ;;  %823 = vrot.lane.b32.xlu0 %v822_v51, %s3747_s22  ;;  %v869_v31 = vrot.slane %v865_v57, 1  ;;  %v854_v51 = vsel %vm409_vm0, %v852_v24, %v853_v23  ;;  %v4272_v24 = vstv %s3525_s12  ;;  %s3558_s12 = sld [smem:[#allocation2 + $0x4c]]  ;;  %v4554_v8 = vstv %s3535_s27 }
  0xc9   : > { %7553 = vst [vmem:[#allocation48_spill] sm:$0xff] %v4272_v24  ;;  %v949_v22 = vmul.f32 %v4272_v24, %v4156_v40  ;;  %7585 = vst [vmem:[#allocation80_spill] sm:$0xff] %v4554_v8 }
  0xca   : > { %v870_v57 = vsel %vm409_vm0, %v868_v34, %v869_v31  ;;  %v948_v34 = vmul.f32 %v4272_v24, %v4162_v42 }
  0xcb   : > { %v953_v41 = vrot.slane %v949_v22, 2  ;;  %v4311_v22 = vstv %s3536_s15  ;;  %s3508_s15 = sld [smem:[#allocation2 + $0x1a]] }
  0xcc   : > { %841 = vrot.lane.b32.xlu1 %v837_v47, %s3747_s22  ;;  %839 = vrot.lane.b32.xlu0 %v838_v48, %s3747_s22  ;;  %v933_v47 = vmul.f32 %v4263_v60, %v4156_v40  ;;  %v884_v48 = vrot.slane %v880_v62, 1  ;;  %v4283_v62 = vstv %s3552_s19  ;;  %v952_v12 = vrot.slane %v948_v34, 2  ;;  %7560 = vst [vmem:[#allocation55_spill] sm:$0xff] %v4311_v22  ;;  %s3532_s19 = sld [smem:[#allocation2 + $0x32]] }
  0xcd   : > { %7555 = vst [vmem:[#allocation50_spill] sm:$0xff] %v4283_v62  ;;  %v981_v34 = vmul.f32 %v4300_v59, %v4156_v40  ;;  %v322_v9 = vmul.f32 %v4311_v22, %v3906_v0 }
  0xce   : > { %v886_v61 = vsel %vm409_vm0, %v884_v48, %v885_v7  ;;  %v965_v48 = vmul.f32 %v4283_v62, %v4156_v40 }
  0xcf   : > { %v985_v59 = vrot.slane %v981_v34, 2 }
  0xd0   : > { %857 = vrot.lane.b32.xlu1 %v853_v23, %s3748_s29  ;;  %855 = vrot.lane.b32.xlu0 %v854_v51, %s3748_s29  ;;  %v4276_v23 = vstv %s218_s23  ;;  %v937_v51 = vrot.slane %v933_v47, 2  ;;  %v4288_v47 = vstv %s299_s24  ;;  %v969_v24 = vrot.slane %v965_v48, 2  ;;  %s3505_s23 = sld [smem:[#allocation2 + $0x17]]  ;;  %s3507_s24 = sld [smem:[#allocation2 + $0x19]] }
  0xd1   : > { %7554 = vst [vmem:[#allocation49_spill] sm:$0xff] %v4276_v23  ;;  %7557 = vst [vmem:[#allocation52_spill] sm:$0xff] %v4288_v47  ;;  %v312_v6 = vmul.f32 %v4276_v23, %v3906_v0  ;;  %v986_v19 = vsel %vm542_vm1, %v984_v2, %v985_v59 }
  0xd4   : > { %873 = vrot.lane.b32.xlu1 %v869_v31, %s3748_s29  ;;  %871 = vrot.lane.b32.xlu0 %v870_v57, %s3748_s29  ;;  %v938_v57 = vsel %vm542_vm1, %v936_v27, %v937_v51  ;;  %v314_v27 = vadd.f32 %v312_v6, %v4288_v47 }
  0xd6   : > { %v345_v13 = vpop.permute.xlu1 %344  ;;  %v332_v31 = vpop.permute.xlu0 %331  ;;  %v4463_v38 = vstv %s3505_s23  ;;  %v4502_v46 = vstv %s3507_s24  ;;  %s4769_s23 = sld [smem:[#allocation2 + $0x15]]  ;;  %s4821_s24 = sld [smem:[#allocation2 + $0x18]] }
  0xd7   : > { %v337_v48 = vadd.f32 %v332_v31, %v314_v27  ;;  %v1013_v31 = vmul.f32 %v4336_v45, %v4156_v40  ;;  %7575 = vst [vmem:[#allocation70_spill] sm:$0xff] %v4463_v38  ;;  %7578 = vst [vmem:[#allocation73_spill] sm:$0xff] %v4502_v46 }
  0xd8   : > { %889 = vrot.lane.b32.xlu1 %v885_v7, %s3748_s29  ;;  %887 = vrot.lane.b32.xlu0 %v886_v61, %s3748_s29  ;;  %v964_v7 = vmul.f32 %v4283_v62, %v4162_v42  ;;  %v317_v61 = vmul.f32 %v4285_v56, %v3906_v0  ;;  %v954_v62 = vsel %vm542_vm1, %v952_v12, %v953_v41 }
  0xd9   : > { %v997_v12 = vmul.f32 %v4320_v35, %v4156_v40 }
  0xda   : > { %v4296_v49 = vpop.permute.xlu1 %346  ;;  %v4302_v50 = vpop.permute.xlu0 %333  ;;  %v968_v60 = vrot.slane %v964_v7, 2  ;;  %v319_v6 = vadd.f32 %v317_v61, %v4304_v37  ;;  %v996_v61 = vmul.f32 %v4320_v35, %v4162_v42 }
  0xdc   : > { %941 = vrot.lane.b32.xlu1 %v937_v51, %s3747_s22  ;;  %939 = vrot.lane.b32.xlu0 %v938_v57, %s3747_s22  ;;  %v4323_v57 = vstv %s3564_s28  ;;  %v970_v55 = vsel %vm542_vm1, %v968_v60, %v969_v24  ;;  %v350_v60 = vadd.f32 %v345_v13, %v319_v6  ;;  %v1000_v34 = vrot.slane %v996_v61, 2  ;;  %s3562_s28 = sld [smem:[#allocation2 + $0x50]] }
  0xdd   : > { %7562 = vst [vmem:[#allocation57_spill] sm:$0xff] %v4323_v57  ;;  %v324_v0 = vadd.f32 %v322_v9, %v4323_v57 }
  0xde   : > { %v4317_v5 = vpop.permute.xlu1 %359  ;;  %v358_v51 = vpop.permute.xlu0 %357 }
  0xdf   : > { %v363_v2 = vadd.f32 %v358_v51, %v324_v0  ;;  %v4366_v0 = vld [vmem:[%s3899_s18 + $0x20] sm:$0xff] }
  0xe0   : > { %957 = vrot.lane.b32.xlu1 %v953_v41, %s3747_s22  ;;  %955 = vrot.lane.b32.xlu0 %v954_v62, %s3747_s22  ;;  %v1001_v62 = vrot.slane %v997_v12, 2  ;;  %7566 = vst [vmem:[#allocation61_spill] sm:$0xff] %v4366_v0 }
  0xe2   : > { %v4331_v7 = vpop.permute.xlu1 %372  ;;  %v371_v41 = vpop.permute.xlu0 %370  ;;  %v1002_v6 = vsel %vm542_vm1, %v1000_v34, %v1001_v62  ;;  %v4375_v34 = vstv %s3528_s6  ;;  %s3518_s6 = sld [smem:[#allocation2 + $0x24]] }
  0xe3   : > { %v376_v20 = vadd.f32 %v371_v41, %v337_v48  ;;  %v4360_v41 = vstv %s3501_s5  ;;  %7567 = vst [vmem:[#allocation62_spill] sm:$0xff] %v4375_v34  ;;  %s3494_s5 = sld [smem:[#allocation2 + $0xc]] }
  0xe4   : > { %973 = vrot.lane.b32.xlu1 %v969_v24, %s3747_s22  ;;  %971 = vrot.lane.b32.xlu0 %v970_v55, %s3747_s22  ;;  %v1012_v24 = vmul.f32 %v4336_v45, %v4162_v42  ;;  %v1017_v55 = vrot.slane %v1013_v31, 2  ;;  %7565 = vst [vmem:[#allocation60_spill] sm:$0xff] %v4360_v41  ;;  %v4431_v45 = vstv %s3531_s4  ;;  %s4743_s4 = sld [smem:[#allocation2 + $0x45]] }
  0xe5   : > { %v415_v35 = vadd.f32 %v4071_v33, %v376_v20  ;;  %7573 = vst [vmem:[#allocation68_spill] sm:$0xff] %v4431_v45 }
  0xe6   : > { %v4344_v27 = vpop.permute.xlu1 %385  ;;  %v384_v9 = vpop.permute.xlu0 %383  ;;  %v1016_v12 = vrot.slane %v1012_v24, 2 }
  0xe7   : > { %v389_v48 = vadd.f32 %v384_v9, %v350_v60  ;;  %v1043_v60 = vmul.f32 %v4360_v41, %v4366_v0 }
  0xe8   : > { %989 = vrot.lane.b32.xlu1 %v985_v59, %s3748_s29  ;;  %987 = vrot.lane.b32.xlu0 %v986_v19, %s3748_s29  ;;  %v4358_v59 = vld [vmem:[%s3899_s18 + $0x28] sm:$0xff]  ;;  %v1018_v51 = vsel %vm542_vm1, %v1016_v12, %v1017_v55 }
  0xe9   : > { %v427_v33 = vadd.f32 %v4093_v44, %v389_v48  ;;  %7564 = vst [vmem:[#allocation59_spill] sm:$0xff] %v4358_v59  ;;  %v1056_v48 = vmul.f32 %v4375_v34, %v4366_v0  ;;  %v1290_v30 = vmul.f32 %v4502_v46, %v4358_v59  ;;  %v1354_v4 = vmul.f32 %v4554_v8, %v4358_v59 }
  0xea   : > { %v4351_v13 = vpop.permute.xlu1 %398  ;;  %v397_v20 = vpop.permute.xlu0 %396 }
  0xeb   : > { %v402_v61 = vadd.f32 %v397_v20, %v363_v2 }
  0xec   : > { %1005 = vrot.lane.b32.xlu1 %v1001_v62, %s3748_s29  ;;  %1003 = vrot.lane.b32.xlu0 %v1002_v6, %s3748_s29  ;;  %v1044_v62 = vmul.f32 %v4360_v41, %v4358_v59 }
  0xed   : > { %v439_v31 = vadd.f32 %v4108_v53, %v402_v61  ;;  %v1057_v53 = vmul.f32 %v4375_v34, %v4358_v59  ;;  %v4395_v61 = vstv %s3502_s8  ;;  %s3497_s8 = sld [smem:[#allocation2 + $0xf]] }
  0xee   : > { %v4362_v19 = vpop.permute.xlu1 %451  ;;  %v450_v44 = vpop.permute.xlu0 %449  ;;  %7569 = vst [vmem:[#allocation64_spill] sm:$0xff] %v4395_v61 }
  0xf0   : > { %1021 = vrot.lane.b32.xlu1 %v1017_v55, %s3748_s29  ;;  %1019 = vrot.lane.b32.xlu0 %v1018_v51, %s3748_s29  ;;  %v4385_v55 = vstv %s3555_s7  ;;  %v455_v51 = vadd.f32 %v450_v44, %v415_v35  ;;  %s3521_s7 = sld [smem:[#allocation2 + $0x27]] }
  0xf1   : > { %7568 = vst [vmem:[#allocation63_spill] sm:$0xff] %v4385_v55  ;;  %v1070_v12 = vmul.f32 %v4385_v55, %v4358_v59  ;;  %v1069_v20 = vmul.f32 %v4385_v55, %v4366_v0  ;;  %v4405_v55 = vstv %s3529_s9  ;;  %s4688_s9 = sld [smem:[#allocation2 + $0x2a]] }
  0xf2   : > { %v4377_v24 = vpop.permute.xlu1 %467  ;;  %v466_v9 = vpop.permute.xlu0 %465  ;;  %7570 = vst [vmem:[#allocation65_spill] sm:$0xff] %v4405_v55 }
  0xf3   : > { %v471_v41 = vadd.f32 %v466_v9, %v427_v33  ;;  %v4420_v33 = vstv %s3556_s11  ;;  %s3548_s11 = sld [smem:[#allocation2 + $0x42]] }
  0xf4   : > { %1049 = vrot.lane.b32.xlu1 %v1044_v62, %s3747_s22  ;;  %1047 = vrot.lane.b32.xlu0 %v1043_v60, %s3747_s22  ;;  %7572 = vst [vmem:[#allocation67_spill] sm:$0xff] %v4420_v33 }
  0xf6   : > { %v4387_v2 = vpop.permute.xlu1 %483  ;;  %v482_v6 = vpop.permute.xlu0 %481 }
  0xf8   : > { %1062 = vrot.lane.b32.xlu1 %v1057_v53, %s3747_s22  ;;  %1060 = vrot.lane.b32.xlu0 %v1056_v48, %s3747_s22  ;;  %v1083_v53 = vmul.f32 %v4395_v61, %v4358_v59  ;;  %v1082_v48 = vmul.f32 %v4395_v61, %v4366_v0  ;;  %v1095_v61 = vmul.f32 %v4405_v55, %v4366_v0 }
  0xfa   : > { %v4397_v62 = vpop.permute.xlu1 %499  ;;  %v498_v60 = vpop.permute.xlu0 %497 }
  0xfb   : > { %v503_v34 = vadd.f32 %v498_v60, %v455_v51  ;;  %v4412_v51 = vstv %s3504_s10  ;;  %s3545_s10 = sld [smem:[#allocation2 + $0x3f]] }
  0xfc   : > { %1075 = vrot.lane.b32.xlu1 %v1070_v12, %s3747_s22  ;;  %1073 = vrot.lane.b32.xlu0 %v1069_v20, %s3747_s22  ;;  %7571 = vst [vmem:[#allocation66_spill] sm:$0xff] %v4412_v51  ;;  %v1096_v20 = vmul.f32 %v4405_v55, %v4358_v59  ;;  %v1109_v55 = vmul.f32 %v4420_v33, %v4358_v59 }
  0xfd   : > { %v4410_v44 = vadd.f32 %v4138_v17, %v503_v34  ;;  %v1158_v17 = vmul.f32 %v4412_v51, %v4358_v59  ;;  %v487_v34 = vadd.f32 %v482_v6, %v439_v31  ;;  %v1108_v31 = vmul.f32 %v4420_v33, %v4366_v0 }
  0xfe   : > { %v4407_v35 = vpop.permute.xlu1 %515  ;;  %v514_v12 = vpop.permute.xlu0 %513  ;;  %v4439_v6 = vstv %s3558_s12  ;;  %s4762_s12 = sld [smem:[#allocation2 + $0x12]] }
  0xff   : > { %v519_v60 = vadd.f32 %v514_v12, %v471_v41  ;;  %7574 = vst [vmem:[#allocation69_spill] sm:$0xff] %v4439_v6 }
 0x100   : > { %1088 = vrot.lane.b32.xlu1 %v1083_v53, %s3748_s29  ;;  %1086 = vrot.lane.b32.xlu0 %v1082_v48, %s3748_s29  ;;  %v1157_v53 = vmul.f32 %v4412_v51, %v4366_v0 }
 0x101   : > { %v4427_v41 = vadd.f32 %v4150_v29, %v519_v60  ;;  %v1162_v29 = vrot.slane %v1158_v17, 1  ;;  %v1190_v17 = vmul.f32 %v4439_v6, %v4358_v59 }
 0x102   : > { %v4424_v9 = vpop.permute.xlu1 %531  ;;  %v530_v12 = vpop.permute.xlu0 %529  ;;  %v1161_v51 = vrot.slane %v1157_v53, 1 }
 0x103   : > { %v535_v48 = vadd.f32 %v530_v12, %v487_v34  ;;  %v1173_v34 = vmul.f32 %v4431_v45, %v4366_v0 }
 0x104   : > { %1101 = vrot.lane.b32.xlu1 %v1096_v20, %s3748_s29  ;;  %1099 = vrot.lane.b32.xlu0 %v1095_v61, %s3748_s29  ;;  %v1174_v20 = vmul.f32 %v4431_v45, %v4358_v59  ;;  %v1163_v12 = vsel %vm409_vm0, %v1161_v51, %v1162_v29  ;;  %v1206_v51 = vmul.f32 %v4463_v38, %v4358_v59 }
 0x105   : > { %v4444_v18 = vadd.f32 %v4167_v43, %v535_v48  ;;  %v1189_v43 = vmul.f32 %v4439_v6, %v4366_v0  ;;  %v1177_v33 = vrot.slane %v1173_v34, 1  ;;  %v4474_v34 = vstv %s3532_s19  ;;  %s4778_s19 = sld [smem:[#allocation2 + $0x2d]] }
 0x106   : > { %v4441_v60 = vpop.permute.xlu1 %584  ;;  %v4450_v61 = vpop.permute.xlu0 %582  ;;  %v1178_v48 = vrot.slane %v1174_v20, 1  ;;  %v1205_v20 = vmul.f32 %v4463_v38, %v4366_v0  ;;  %7576 = vst [vmem:[#allocation71_spill] sm:$0xff] %v4474_v34  ;;  %v1221_v38 = vmul.f32 %v4474_v34, %v4366_v0 }
 0x108   : > { %1114 = vrot.lane.b32.xlu1 %v1109_v55, %s3748_s29  ;;  %1112 = vrot.lane.b32.xlu0 %v1108_v31, %s3748_s29  ;;  %v1194_v55 = vrot.slane %v1190_v17, 1  ;;  %v1193_v31 = vrot.slane %v1189_v43, 1  ;;  %v1179_v6 = vsel %vm409_vm0, %v1177_v33, %v1178_v48  ;;  %v1222_v33 = vmul.f32 %v4474_v34, %v4358_v59 }
 0x109   : > { %v1210_v43 = vrot.slane %v1206_v51, 1  ;;  %v1225_v34 = vrot.slane %v1221_v38, 1  ;;  %v1289_v38 = vmul.f32 %v4502_v46, %v4366_v0 }
 0x10a   : > { %v4458_v53 = vpop.permute.xlu1 %600  ;;  %v4461_v45 = vpop.permute.xlu0 %598 }
 0x10c   : > { %1166 = vrot.lane.b32.xlu1 %v1162_v29, %s3747_s22  ;;  %1164 = vrot.lane.b32.xlu0 %v1163_v12, %s3747_s22  ;;  %v1195_v29 = vsel %vm409_vm0, %v1193_v31, %v1194_v55  ;;  %v1209_v12 = vrot.slane %v1205_v20, 1  ;;  %v1226_v20 = vrot.slane %v1222_v33, 1 }
 0x10e   : > { %v4467_v32 = vpop.permute.xlu1 %616  ;;  %v4476_v10 = vpop.permute.xlu0 %614  ;;  %v1211_v51 = vsel %vm409_vm0, %v1209_v12, %v1210_v43  ;;  %v4515_v12 = vstv %s3534_s25  ;;  %s4862_s25 = sld [smem:[#allocation2 + $0x4b]] }
 0x10f   : > { %7580 = vst [vmem:[#allocation75_spill] sm:$0xff] %v4515_v12  ;;  %v1306_v46 = vmul.f32 %v4515_v12, %v4358_v59  ;;  %v1305_v14 = vmul.f32 %v4515_v12, %v4366_v0  ;;  %v4539_v12 = vstv %s3508_s15  ;;  %s4907_s15 = sld [smem:[#allocation2 + $0x4e]] }
 0x110   : > { %1182 = vrot.lane.b32.xlu1 %v1178_v48, %s3747_s22  ;;  %1180 = vrot.lane.b32.xlu0 %v1179_v6, %s3747_s22  ;;  %v1238_v6 = vmul.f32 %v4487_v3, %v4358_v59  ;;  %v1237_v48 = vmul.f32 %v4487_v3, %v4366_v0  ;;  %v1227_v3 = vsel %vm409_vm0, %v1225_v34, %v1226_v20 }
 0x111   : > { %v1309_v21 = vrot.slane %v1305_v14, 2  ;;  %7582 = vst [vmem:[#allocation77_spill] sm:$0xff] %v4539_v12 }
 0x112   : > { %v4483_v17 = vpop.permute.xlu1 %632  ;;  %v4489_v58 = vpop.permute.xlu0 %630 }
 0x114   : > { %1198 = vrot.lane.b32.xlu1 %v1194_v55, %s3747_s22  ;;  %1196 = vrot.lane.b32.xlu0 %v1195_v29, %s3747_s22  ;;  %v1242_v55 = vrot.slane %v1238_v6, 1  ;;  %v1241_v29 = vrot.slane %v1237_v48, 1  ;;  %v4520_v6 = vstv %s3561_s26  ;;  %v1294_v48 = vrot.slane %v1290_v30, 2  ;;  %s4866_s26 = sld [smem:[#allocation2 + $0x33]] }
 0x115   : > { %7581 = vst [vmem:[#allocation76_spill] sm:$0xff] %v4520_v6  ;;  %v1321_v30 = vmul.f32 %v4520_v6, %v4366_v0 }
 0x116   : > { %v4497_v31 = vpop.permute.xlu1 %648  ;;  %v4500_v52 = vpop.permute.xlu0 %646 }
 0x118   : > { %1214 = vrot.lane.b32.xlu1 %v1210_v43, %s3748_s29  ;;  %1212 = vrot.lane.b32.xlu0 %v1211_v51, %s3748_s29  ;;  %v1243_v43 = vsel %vm409_vm0, %v1241_v29, %v1242_v55  ;;  %v1293_v51 = vrot.slane %v1289_v38, 2  ;;  %v1310_v38 = vrot.slane %v1306_v46, 2 }
 0x11a   : > { %v4506_v36 = vpop.permute.xlu1 %664  ;;  %v4513_v33 = vpop.permute.xlu0 %662  ;;  %v1295_v29 = vsel %vm542_vm1, %v1293_v51, %v1294_v48  ;;  %v1311_v46 = vsel %vm542_vm1, %v1309_v21, %v1310_v38  ;;  %v1325_v51 = vrot.slane %v1321_v30, 2  ;;  %v1353_v21 = vmul.f32 %v4554_v8, %v4366_v0 }
 0x11b   : > { %7579 = vst [vmem:[#allocation74_spill] sm:$0xff] %v4513_v33  ;;  %v4567_v30 = vstv %s3562_s28 }
 0x11c   : > { %1230 = vrot.lane.b32.xlu1 %v1226_v20, %s3748_s29  ;;  %1228 = vrot.lane.b32.xlu0 %v1227_v3, %s3748_s29  ;;  %v1322_v3 = vmul.f32 %v4520_v6, %v4358_v59  ;;  %7586 = vst [vmem:[#allocation81_spill] sm:$0xff] %v4567_v30  ;;  %v1369_v8 = vmul.f32 %v4567_v30, %v4366_v0 }
 0x11e   : > { %v4522_v34 = vpop.permute.xlu1 %692  ;;  %v4528_v28 = vpop.permute.xlu0 %690  ;;  %v1326_v14 = vrot.slane %v1322_v3, 2 }
 0x120   : > { %1246 = vrot.lane.b32.xlu1 %v1242_v55, %s3748_s29  ;;  %1244 = vrot.lane.b32.xlu0 %v1243_v43, %s3748_s29  ;;  %v1338_v55 = vmul.f32 %v4539_v12, %v4358_v59  ;;  %v1337_v43 = vmul.f32 %v4539_v12, %v4366_v0  ;;  %v1327_v12 = vsel %vm542_vm1, %v1325_v51, %v1326_v14 }
 0x121   : > { %v1370_v51 = vmul.f32 %v4567_v30, %v4358_v59 }
 0x122   : > { %v4536_v20 = vpop.permute.xlu1 %705  ;;  %v4541_v15 = vpop.permute.xlu0 %703 }
 0x124   : > { %1298 = vrot.lane.b32.xlu1 %v1294_v48, %s3747_s22  ;;  %1296 = vrot.lane.b32.xlu0 %v1295_v29, %s3747_s22  ;;  %v1342_v48 = vrot.slane %v1338_v55, 2  ;;  %v1341_v29 = vrot.slane %v1337_v43, 2  ;;  %v1358_v43 = vrot.slane %v1354_v4, 2 }
 0x126   : > { %v4549_v6 = vpop.permute.xlu1 %718  ;;  %v4552_v11 = vpop.permute.xlu0 %716 }
 0x127   : > { %7583 = vst [vmem:[#allocation78_spill] sm:$0xff] %v4549_v6  ;;  %7584 = vst [vmem:[#allocation79_spill] sm:$0xff] %v4552_v11  ;;  %v1373_v6 = vrot.slane %v1369_v8, 2 }
 0x128   : > { %1314 = vrot.lane.b32.xlu1 %v1310_v38, %s3747_s22  ;;  %1312 = vrot.lane.b32.xlu0 %v1311_v46, %s3747_s22  ;;  %v1343_v38 = vsel %vm542_vm1, %v1341_v29, %v1342_v48  ;;  %v1357_v46 = vrot.slane %v1353_v21, 2  ;;  %v1374_v29 = vrot.slane %v1370_v51, 2 }
 0x12a   : > { %v4558_v1 = vpop.permute.xlu1 %731  ;;  %v4565_v3 = vpop.permute.xlu0 %729  ;;  %v1375_v30 = vsel %vm542_vm1, %v1373_v6, %v1374_v29 }
 0x12c   : > { %1330 = vrot.lane.b32.xlu1 %v1326_v14, %s3747_s22  ;;  %1328 = vrot.lane.b32.xlu0 %v1327_v12, %s3747_s22  ;;  %v1359_v12 = vsel %vm542_vm1, %v1357_v46, %v1358_v43 }
 0x12e   : > { %v4572_v55 = vpop.permute.xlu1 %744  ;;  %v4578_v11 = vpop.permute.xlu0 %742 }
 0x130   : > { %1346 = vrot.lane.b32.xlu1 %v1342_v48, %s3748_s29  ;;  %1344 = vrot.lane.b32.xlu0 %v1343_v38, %s3748_s29 }
 0x132   : > { %v4582_v14 = vpop.permute.xlu1 %757  ;;  %v4585_v4 = vpop.permute.xlu0 %755 }
 0x133   : > { %7587 = vst [vmem:[#allocation82_spill] sm:$0xff] %v4582_v14  ;;  %7588 = vst [vmem:[#allocation83_spill] sm:$0xff] %v4585_v4 }
 0x134   : > { %1362 = vrot.lane.b32.xlu1 %v1358_v43, %s3748_s29  ;;  %1360 = vrot.lane.b32.xlu0 %v1359_v12, %s3748_s29 }
 0x136   : > { %v4589_v21 = vpop.permute.xlu1 %809  ;;  %v4592_v0 = vpop.permute.xlu0 %807 }
 0x138   : > { %1378 = vrot.lane.b32.xlu1 %v1374_v29, %s3748_s29  ;;  %1376 = vrot.lane.b32.xlu0 %v1375_v30, %s3748_s29 }
 0x13a   : > { %v4596_v48 = vpop.permute.xlu1 %825  ;;  %v4598_v8 = vpop.permute.xlu0 %823 }
 0x13b   : > { %7589 = vst [vmem:[#allocation84_spill] sm:$0xff] %v4596_v48  ;;  %7590 = vst [vmem:[#allocation85_spill] sm:$0xff] %v4598_v8  ;;  %v3635_v48 = vld [vmem:[%s3899_s18 + $0x8] sm:$0xff] }
 0x13e   : > { %v4600_v38 = vpop.permute.xlu1 %841  ;;  %v4602_v43 = vpop.permute.xlu0 %839 }
 0x13f   : > { %7591 = vst [vmem:[#allocation86_spill] sm:$0xff] %v4600_v38  ;;  %7592 = vst [vmem:[#allocation87_spill] sm:$0xff] %v4602_v43 }
 0x142   : > { %v4604_v46 = vpop.permute.xlu1 %857  ;;  %v4606_v51 = vpop.permute.xlu0 %855 }
 0x146   : > { %v4608_v6 = vpop.permute.xlu1 %873  ;;  %v4610_v12 = vpop.permute.xlu0 %871 }
 0x147   : > { %7593 = vst [vmem:[#allocation88_spill] sm:$0xff] %v4608_v6  ;;  %7594 = vst [vmem:[#allocation89_spill] sm:$0xff] %v4610_v12  ;;  %v313_v6 = vmul.f32 %v3635_v48, %v4276_v23 }
 0x14a   : > { %v4612_v29 = vpop.permute.xlu1 %889  ;;  %v4614_v30 = vpop.permute.xlu0 %887 }
 0x14b   : > { %7595 = vst [vmem:[#allocation90_spill] sm:$0xff] %v4612_v29  ;;  %7596 = vst [vmem:[#allocation91_spill] sm:$0xff] %v4614_v30  ;;  %v315_v30 = vadd.f32 %v313_v6, %v4288_v47  ;;  %v7605_v47 = vrot.slane %v4042_v16, 1  ;;  %v7606_v16 = vrot.slane %v4060_v26, 1  ;;  %v4676_v26 = vstv %s3494_s5 }
 0x14c   : > { %7609 = vst [vmem:[#allocation101_spill] sm:$0xff] %v4676_v26 }
 0x14e   : > { %v4616_v4 = vpop.permute.xlu1 %941  ;;  %v4618_v14 = vpop.permute.xlu0 %939 }
 0x14f   : > { %7597 = vst [vmem:[#allocation92_spill] sm:$0xff] %v4616_v4  ;;  %7598 = vst [vmem:[#allocation93_spill] sm:$0xff] %v4618_v14  ;;  %v318_v14 = vmul.f32 %v3635_v48, %v4285_v56 }
 0x152   : > { %v4620_v59 = vpop.permute.xlu1 %957  ;;  %v4622_v38 = vpop.permute.xlu0 %955 }
 0x153   : > { %7599 = vst [vmem:[#allocation94_spill] sm:$0xff] %v4620_v59  ;;  %7600 = vst [vmem:[#allocation95_spill] sm:$0xff] %v4622_v38  ;;  %v338_v38 = vadd.f32 %v4302_v50, %v315_v30 }
 0x155   : > { %v377_v23 = vadd.f32 %v4331_v7, %v338_v38  ;;  %v323_v7 = vmul.f32 %v3635_v48, %v4311_v22  ;;  %v4672_v48 = vstv %s3491_s30 }
 0x156   : > { %v4624_v43 = vpop.permute.xlu1 %973  ;;  %v4626_v8 = vpop.permute.xlu0 %971  ;;  %7608 = vst [vmem:[#allocation100_spill] sm:$0xff] %v4672_v48 }
 0x157   : > { %7601 = vst [vmem:[#allocation96_spill] sm:$0xff] %v4624_v43  ;;  %7602 = vst [vmem:[#allocation97_spill] sm:$0xff] %v4626_v8  ;;  %v320_v8 = vadd.f32 %v318_v14, %v4304_v37 }
 0x159   : > { %v351_v6 = vadd.f32 %v4296_v49, %v320_v8 }
 0x15a   : > { %v4630_v12 = vpop.permute.xlu1 %989  ;;  %v4632_v29 = vpop.permute.xlu0 %987 }
 0x15b   : > { %7603 = vst [vmem:[#allocation98_spill] sm:$0xff] %v4630_v12  ;;  %v390_v50 = vadd.f32 %v4344_v27, %v351_v6 }
 0x15d   : > { %v428_v49 = vadd.f32 %v7606_v16, %v390_v50  ;;  %v588_v50 = vadd.f32 %v4450_v61, %v4410_v44  ;;  %v4693_v16 = vstv %s3518_s6  ;;  %v764_v44 = vmul.f32 %v4676_v26, %v4162_v42 }
 0x15e   : > { %v4635_v4 = vpop.permute.xlu1 %1005  ;;  %v4638_v59 = vpop.permute.xlu0 %1003  ;;  %7610 = vst [vmem:[#allocation102_spill] sm:$0xff] %v4693_v16 }
 0x15f   : > { %7604 = vst [vmem:[#allocation99_spill] sm:$0xff] %v4635_v4  ;;  %v416_v4 = vadd.f32 %v7605_v47, %v377_v23  ;;  %v325_v47 = vadd.f32 %v323_v7, %v4323_v57  ;;  %v472_v27 = vadd.f32 %v4377_v24, %v428_v49  ;;  %v672_v7 = vmul.f32 %v4672_v48, %v4156_v40 }
 0x161   : > { %v456_v30 = vadd.f32 %v4362_v19, %v416_v4  ;;  %v7607_v19 = vrot.slane %v4112_v54, 2  ;;  %v364_v54 = vadd.f32 %v4317_v5, %v325_v47  ;;  %v765_v5 = vmul.f32 %v4676_v26, %v4156_v40 }
 0x162   : > { %v4641_v43 = vpop.permute.xlu1 %1021  ;;  %v4645_v33 = vpop.permute.xlu0 %1019 }
 0x163   : > { %v504_v38 = vadd.f32 %v4397_v62, %v456_v30  ;;  %v520_v62 = vadd.f32 %v4407_v35, %v472_v27  ;;  %v671_v35 = vmul.f32 %v4672_v48, %v4162_v42  ;;  %v403_v61 = vadd.f32 %v4351_v13, %v364_v54 }
 0x164   : > { %v769_v54 = vrot.slane %v765_v5, 1 }
 0x165   : > { %v549_v4 = vadd.f32 %v7607_v19, %v504_v38  ;;  %v636_v38 = vadd.f32 %v4489_v58, %v588_v50  ;;  %v677_v19 = vmul.f32 %v4693_v16, %v4156_v40  ;;  %v604_v50 = vadd.f32 %v4461_v45, %v4427_v41 }
 0x166   : > { %v4647_v12 = vpop.permute.xlu1 %1049  ;;  %v4652_v56 = vpop.permute.xlu0 %1047  ;;  %v676_v45 = vmul.f32 %v4693_v16, %v4162_v42  ;;  %v7641_v57 = vld [vmem:[#allocation99_spill] sm:$0xff] }
 0x167   : > { %v589_v6 = vadd.f32 %v4441_v60, %v549_v4  ;;  %v4707_v4 = vstv %s3521_s7  ;;  %v673_v13 = vadd.f32 %v671_v35, %v636_v38  ;;  %v4732_v38 = vstv %s4688_s9 }
 0x168   : > { %7612 = vst [vmem:[#allocation103_spill] sm:$0xff] %v4707_v4  ;;  %v777_v41 = vmul.f32 %v4707_v4, %v4156_v40  ;;  %7615 = vst [vmem:[#allocation105_spill] sm:$0xff] %v4732_v38 }
 0x169   : > { %v637_v24 = vadd.f32 %v4483_v17, %v589_v6  ;;  %v7611_v17 = vrot.slane %v4126_v63, 2  ;;  %v768_v63 = vrot.slane %v764_v44, 1  ;;  %v696_v48 = vadd.f32 %v4528_v28, %v673_v13 }
 0x16a   : > { %v4656_v14 = vpop.permute.xlu1 %1062  ;;  %v4660_v37 = vpop.permute.xlu0 %1060  ;;  %v4736_v28 = vstv %s3545_s10  ;;  %v4739_v44 = vstv %s3548_s11  ;;  %v781_v13 = vrot.slane %v777_v41, 1 }
 0x16b   : > { %v561_v49 = vadd.f32 %v7611_v17, %v520_v62  ;;  %v674_v58 = vadd.f32 %v672_v7, %v637_v24  ;;  %v7613_v62 = vrot.slane %v4083_v39, 1  ;;  %v4717_v7 = vstv %s3497_s8  ;;  %7616 = vst [vmem:[#allocation106_spill] sm:$0xff] %v4736_v28  ;;  %7617 = vst [vmem:[#allocation107_spill] sm:$0xff] %v4739_v44 }
 0x16c   : > { %7614 = vst [vmem:[#allocation104_spill] sm:$0xff] %v4717_v7  ;;  %v735_v5 = vadd.f32 %v4565_v3, %v696_v48  ;;  %v4751_v3 = vmul.f32 %v4732_v38, %v4156_v40  ;;  %v908_v48 = vmul.f32 %v4732_v38, %v4162_v42 }
 0x16d   : > { %v605_v27 = vadd.f32 %v4458_v53, %v561_v49  ;;  %v440_v17 = vadd.f32 %v7613_v62, %v403_v61  ;;  %v697_v24 = vadd.f32 %v4522_v34, %v674_v58  ;;  %v652_v49 = vadd.f32 %v4500_v52, %v604_v50 }
 0x16e   : > { %v4664_v23 = vpop.permute.xlu1 %1075  ;;  %v4670_v8 = vpop.permute.xlu0 %1073  ;;  %v776_v34 = vmul.f32 %v4707_v4, %v4162_v42  ;;  %v897_v61 = vmul.f32 %v4717_v7, %v4156_v40  ;;  %v896_v58 = vmul.f32 %v4717_v7, %v4162_v42 }
 0x16f   : > { %v653_v53 = vadd.f32 %v4497_v31, %v605_v27  ;;  %v488_v39 = vadd.f32 %v4387_v2, %v440_v17  ;;  %v736_v31 = vadd.f32 %v4558_v1, %v697_v24  ;;  %v770_v27 = vsel %vm409_vm0, %v768_v63, %v769_v54 }
 0x170   : > { %v678_v50 = vadd.f32 %v676_v45, %v652_v49  ;;  %v4760_v63 = vmul.f32 %v4739_v44, %v4156_v40  ;;  %v773_v49 = vadd.f32 %v770_v27, %v735_v5  ;;  %v788_v45 = vmul.f32 %v4739_v44, %v4162_v42 }
 0x171   : > { %v536_v1 = vadd.f32 %v4424_v9, %v488_v39  ;;  %v679_v2 = vadd.f32 %v677_v19, %v653_v53  ;;  %v774_v9 = vadd.f32 %v769_v54, %v736_v31  ;;  %v780_v19 = vrot.slane %v776_v34, 1 }
 0x172   : > { %v4680_v30 = vpop.permute.xlu1 %1088  ;;  %v4690_v60 = vpop.permute.xlu0 %1086  ;;  %v709_v24 = vadd.f32 %v4541_v15, %v678_v50  ;;  %v901_v41 = vrot.slane %v897_v61, 2  ;;  %v900_v31 = vrot.slane %v896_v58, 2  ;;  %v813_v15 = vadd.f32 %v4592_v0, %v773_v49 }
 0x173   : > { %v710_v17 = vadd.f32 %v4536_v20, %v679_v2  ;;  %v7618_v20 = vrot.slane %v4143_v25, 2  ;;  %v814_v39 = vadd.f32 %v4589_v21, %v774_v9  ;;  %v913_v5 = vrot.slane %v4751_v3, 2 }
 0x174   : > { %v748_v34 = vadd.f32 %v4578_v11, %v709_v24  ;;  %v912_v2 = vrot.slane %v908_v48, 2  ;;  %v782_v21 = vsel %vm409_vm0, %v780_v19, %v781_v13  ;;  %v3636_v11 = vld [vmem:[%s3899_s18 + $0x18] sm:$0xff]  ;;  %v681_v58 = vmul.f32 %v4736_v28, %v4162_v42 }
 0x175   : > { %v573_v54 = vadd.f32 %v7618_v20, %v536_v1  ;;  %v749_v40 = vadd.f32 %v4572_v55, %v710_v17  ;;  %v620_v55 = vadd.f32 %v4476_v10, %v4444_v18  ;;  %v862_v1 = vadd.f32 %v4604_v46, %v814_v39  ;;  %v7620_v18 = vld [vmem:[#allocation74_spill] sm:$0xff]  ;;  %v3637_v39 = vld [vmem:[%s3899_s18 + $0x10] sm:$0xff]  ;;  %s4854_s18 = sld [smem:[#allocation2 + $0x48]] }
 0x176   : > { %v4702_v47 = vpop.permute.xlu1 %1101  ;;  %v4709_v6 = vpop.permute.xlu0 %1099  ;;  %v682_v0 = vmul.f32 %v3636_v11, %v4736_v28  ;;  %v861_v50 = vadd.f32 %v4606_v51, %v813_v15  ;;  %v4795_v3 = vstv %s4743_s4  ;;  %v902_v46 = vsel %vm542_vm1, %v900_v31, %v901_v41  ;;  %v7621_v51 = vld [vmem:[#allocation84_spill] sm:$0xff]  ;;  %v7632_v28 = vld [vmem:[#allocation79_spill] sm:$0xff] }
 0x177   : > { %v621_v25 = vadd.f32 %v4467_v32, %v573_v54  ;;  %7619 = vst [vmem:[#allocation108_spill] sm:$0xff] %v4795_v3  ;;  %v668_v10 = vadd.f32 %v7620_v18, %v620_v55  ;;  %v786_v48 = vadd.f32 %v781_v13, %v749_v40  ;;  %v785_v17 = vadd.f32 %v782_v21, %v748_v34  ;;  %v7623_v40 = vld [vmem:[#allocation85_spill] sm:$0xff]  ;;  %v7626_v55 = vld [vmem:[#allocation92_spill] sm:$0xff] }
 0x178   : > { %v793_v9 = vrot.slane %v4760_v63, 1  ;;  %v792_v19 = vrot.slane %v788_v45, 1  ;;  %v914_v24 = vsel %vm542_vm1, %v912_v2, %v913_v5  ;;  %v906_v20 = vadd.f32 %v901_v41, %v862_v1  ;;  %v7625_v2 = vld [vmem:[#allocation88_spill] sm:$0xff]  ;;  %v7627_v1 = vld [vmem:[#allocation89_spill] sm:$0xff] }
 0x179   : > { %v669_v32 = vadd.f32 %v4506_v36, %v621_v25  ;;  %v830_v49 = vadd.f32 %v7621_v51, %v786_v48  ;;  %v4806_v36 = vmul.f32 %v3636_v11, %v4795_v3  ;;  %v4809_v54 = vstv %s4762_s12  ;;  %v7628_v18 = vld [vmem:[#allocation93_spill] sm:$0xff]  ;;  %v7629_v51 = vld [vmem:[#allocation59_spill] sm:$0xff] }
 0x17a   : > { %v4725_v35 = vpop.permute.xlu1 %1114  ;;  %v4734_v52 = vpop.permute.xlu0 %1112  ;;  %7622 = vst [vmem:[#allocation74_spill] sm:$0xff] %v4809_v54  ;;  %v829_v63 = vadd.f32 %v7623_v40, %v785_v17  ;;  %v905_v45 = vadd.f32 %v902_v46, %v861_v50  ;;  %v920_v31 = vmul.f32 %v3637_v39, %v4795_v3  ;;  %v4819_v34 = vstv %s4769_s23  ;;  %v7631_v40 = vld [vmem:[#allocation78_spill] sm:$0xff] }
 0x17b   : > { %7624 = vst [vmem:[#allocation84_spill] sm:$0xff] %v4819_v34  ;;  %v684_v41 = vadd.f32 %v682_v0, %v669_v32  ;;  %v683_v15 = vadd.f32 %v681_v58, %v668_v10  ;;  %v878_v25 = vadd.f32 %v7625_v2, %v830_v49  ;;  %v946_v21 = vadd.f32 %v7626_v55, %v906_v20  ;;  %v7633_v58 = vld [vmem:[#allocation98_spill] sm:$0xff] }
 0x17c   : > { %v877_v11 = vadd.f32 %v7627_v1, %v829_v63  ;;  %v945_v48 = vadd.f32 %v7628_v18, %v905_v45  ;;  %v1029_v50 = vmul.f32 %v4809_v54, %v7629_v51  ;;  %v4830_v46 = vstv %s4778_s19  ;;  %v7634_v45 = vld [vmem:[#allocation61_spill] sm:$0xff]  ;;  %v7635_v55 = vld [vmem:[#allocation82_spill] sm:$0xff] }
 0x17d   : > { %7630 = vst [vmem:[#allocation85_spill] sm:$0xff] %v4830_v46  ;;  %v723_v39 = vadd.f32 %v7631_v40, %v684_v41  ;;  %v722_v0 = vadd.f32 %v7632_v28, %v683_v15  ;;  %v994_v32 = vadd.f32 %v7633_v58, %v946_v21  ;;  %v1122_v10 = vmul.f32 %v4819_v34, %v7629_v51  ;;  %v7636_v15 = vld [vmem:[#allocation83_spill] sm:$0xff] }
 0x17e   : > { %v4755_v62 = vpop.permute.xlu1 %1166  ;;  %v4764_v53 = vpop.permute.xlu0 %1164  ;;  %v794_v20 = vsel %vm409_vm0, %v792_v19, %v793_v9  ;;  %v993_v63 = vadd.f32 %v4632_v29, %v945_v48  ;;  %v1028_v2 = vmul.f32 %v4809_v54, %v7634_v45  ;;  %v1121_v41 = vmul.f32 %v4819_v34, %v7634_v45  ;;  %v7637_v54 = vld [vmem:[#allocation94_spill] sm:$0xff] }
 0x17f   : > { %v762_v28 = vadd.f32 %v7635_v55, %v723_v39  ;;  %v761_v21 = vadd.f32 %v7636_v15, %v722_v0  ;;  %v918_v1 = vadd.f32 %v913_v5, %v878_v25  ;;  %v925_v18 = vrot.slane %v4806_v36, 2  ;;  %v7639_v36 = vld [vmem:[#allocation95_spill] sm:$0xff] }
 0x180   : > { %v917_v40 = vadd.f32 %v914_v24, %v877_v11  ;;  %v924_v58 = vrot.slane %v920_v31, 2  ;;  %v1034_v29 = vmul.f32 %v4830_v46, %v7629_v51  ;;  %v1033_v19 = vmul.f32 %v4830_v46, %v7634_v45 }
 0x181   : > { %v962_v39 = vadd.f32 %v7637_v54, %v918_v1  ;;  %v1031_v55 = vadd.f32 %v1029_v50, %v994_v32  ;;  %v1126_v0 = vrot.slane %v1122_v10, 1  ;;  %v4860_v5 = vstv %s4811_s21 }
 0x182   : > { %v4780_v61 = vpop.permute.xlu1 %1182  ;;  %v4787_v27 = vpop.permute.xlu0 %1180  ;;  %7638 = vst [vmem:[#allocation88_spill] sm:$0xff] %v4860_v5  ;;  %v961_v31 = vadd.f32 %v7639_v36, %v917_v40  ;;  %v1030_v25 = vadd.f32 %v1028_v2, %v993_v63  ;;  %v1125_v11 = vrot.slane %v1121_v41, 1  ;;  %v4870_v15 = vstv %s4821_s24  ;;  %v7642_v41 = vld [vmem:[#allocation86_spill] sm:$0xff] }
 0x183   : > { %7640 = vst [vmem:[#allocation92_spill] sm:$0xff] %v4870_v15  ;;  %v798_v46 = vadd.f32 %v793_v9, %v762_v28  ;;  %v797_v16 = vadd.f32 %v794_v20, %v761_v21  ;;  %v1010_v54 = vadd.f32 %v7641_v57, %v962_v39  ;;  %v1054_v50 = vadd.f32 %v4647_v12, %v1031_v55  ;;  %v7643_v20 = vld [vmem:[#allocation87_spill] sm:$0xff]  ;;  %v7644_v39 = vld [vmem:[#allocation90_spill] sm:$0xff] }
 0x184   : > { %v1009_v32 = vadd.f32 %v4638_v59, %v961_v31  ;;  %v1053_v10 = vadd.f32 %v4652_v56, %v1030_v25  ;;  %v1134_v1 = vmul.f32 %v4860_v5, %v7629_v51  ;;  %v1133_v63 = vmul.f32 %v4860_v5, %v7634_v45  ;;  %v7645_v55 = vld [vmem:[#allocation91_spill] sm:$0xff] }
 0x185   : > { %v846_v9 = vadd.f32 %v7642_v41, %v798_v46  ;;  %v845_v28 = vadd.f32 %v7643_v20, %v797_v16  ;;  %v1093_v57 = vadd.f32 %v4680_v30, %v1054_v50  ;;  %v926_v56 = vsel %vm542_vm1, %v924_v58, %v925_v18 }
 0x186   : > { %v4802_v42 = vpop.permute.xlu1 %1198  ;;  %v4813_v13 = vpop.permute.xlu0 %1196  ;;  %v1092_v59 = vadd.f32 %v4690_v60, %v1053_v10  ;;  %v1254_v21 = vmul.f32 %v4870_v15, %v7629_v51  ;;  %v1253_v40 = vmul.f32 %v4870_v15, %v7634_v45  ;;  %v1036_v36 = vadd.f32 %v1034_v29, %v1010_v54 }
 0x187   : > { %v894_v46 = vadd.f32 %v7644_v39, %v846_v9  ;;  %v893_v16 = vadd.f32 %v7645_v55, %v845_v28  ;;  %v1127_v30 = vsel %vm409_vm0, %v1125_v11, %v1126_v0  ;;  %v1035_v31 = vadd.f32 %v1033_v19, %v1009_v32 }
 0x188   : > { %v4897_v25 = vstv %s4854_s18  ;;  %v1138_v58 = vrot.slane %v1134_v1, 1  ;;  %v1137_v50 = vrot.slane %v1133_v63, 1  ;;  %v1067_v10 = vadd.f32 %v4656_v14, %v1036_v36 }
 0x189   : > { %7646 = vst [vmem:[#allocation89_spill] sm:$0xff] %v4897_v25  ;;  %v1131_v41 = vadd.f32 %v1126_v0, %v1093_v57  ;;  %v4901_v20 = vstv %s4862_s25  ;;  %v4904_v15 = vstv %s4866_s26  ;;  %v1066_v9 = vadd.f32 %v4660_v37, %v1035_v31 }
 0x18a   : > { %v4832_v17 = vpop.permute.xlu1 %1214  ;;  %v4839_v49 = vpop.permute.xlu0 %1212  ;;  %7647 = vst [vmem:[#allocation93_spill] sm:$0xff] %v4901_v20  ;;  %7648 = vst [vmem:[#allocation59_spill] sm:$0xff] %v4904_v15  ;;  %v1130_v28 = vadd.f32 %v1127_v30, %v1092_v59  ;;  %v1258_v29 = vrot.slane %v1254_v21, 2  ;;  %v1257_v54 = vrot.slane %v1253_v40, 2  ;;  %v930_v19 = vadd.f32 %v925_v18, %v894_v46  ;;  %v7649_v59 = vld [vmem:[#allocation96_spill] sm:$0xff]  ;;  %v7650_v40 = vld [vmem:[#allocation97_spill] sm:$0xff] }
 0x18b   : > { %v929_v11 = vadd.f32 %v926_v56, %v893_v16  ;;  %v1106_v32 = vadd.f32 %v4702_v47, %v1067_v10  ;;  %v1171_v1 = vadd.f32 %v4755_v62, %v1131_v41  ;;  %v1105_v14 = vadd.f32 %v4709_v6, %v1066_v9 }
 0x18c   : > { %v1170_v0 = vadd.f32 %v4764_v53, %v1130_v28  ;;  %v1139_v63 = vsel %vm409_vm0, %v1137_v50, %v1138_v58  ;;  %v1266_v37 = vmul.f32 %v4904_v15, %v7629_v51  ;;  %v978_v21 = vadd.f32 %v7649_v59, %v930_v19 }
 0x18d   : > { %v977_v39 = vadd.f32 %v7650_v40, %v929_v11  ;;  %v1219_v18 = vadd.f32 %v4832_v17, %v1171_v1  ;;  %v1265_v47 = vmul.f32 %v4904_v15, %v7634_v45  ;;  %v1039_v6 = vmul.f32 %v4897_v25, %v7629_v51 }
 0x18e   : > { %v4856_v48 = vpop.permute.xlu1 %1230  ;;  %v4864_v24 = vpop.permute.xlu0 %1228  ;;  %v1038_v53 = vmul.f32 %v4897_v25, %v7634_v45  ;;  %v1218_v56 = vadd.f32 %v4839_v49, %v1170_v0  ;;  %v1026_v46 = vadd.f32 %v4641_v43, %v978_v21  ;;  %v1143_v16 = vadd.f32 %v1138_v58, %v1106_v32 }
 0x18f   : > { %v1025_v55 = vadd.f32 %v4645_v33, %v977_v39  ;;  %v1259_v17 = vsel %vm542_vm1, %v1257_v54, %v1258_v29  ;;  %v1142_v36 = vadd.f32 %v1139_v63, %v1105_v14  ;;  %v1146_v30 = vmul.f32 %v4901_v20, %v7629_v51 }
 0x190   : > { %v1145_v31 = vmul.f32 %v4901_v20, %v7634_v45  ;;  %v1187_v10 = vadd.f32 %v4780_v61, %v1143_v16  ;;  %v1263_v49 = vadd.f32 %v1258_v29, %v1219_v18  ;;  %v1270_v41 = vrot.slane %v1266_v37, 2 }
 0x191   : > { %v1269_v9 = vrot.slane %v1265_v47, 2  ;;  %v1186_v33 = vadd.f32 %v4787_v27, %v1142_v36  ;;  %v1262_v58 = vadd.f32 %v1259_v17, %v1218_v56  ;;  %v4940_v28 = vstv %s4907_s15  ;;  %v7653_v56 = vld [vmem:[#allocation12_spill] sm:$0xff] }
 0x192   : > { %v4880_v2 = vpop.permute.xlu1 %1246  ;;  %v4885_v12 = vpop.permute.xlu0 %1244  ;;  %7651 = vst [vmem:[#allocation78_spill] sm:$0xff] %v4940_v28  ;;  %v1041_v54 = vadd.f32 %v1039_v6, %v1026_v46  ;;  %v1040_v19 = vadd.f32 %v1038_v53, %v1025_v55  ;;  %v1235_v11 = vadd.f32 %v4856_v48, %v1187_v10  ;;  %v1150_v1 = vrot.slane %v1146_v30, 1  ;;  %v7655_v10 = vld [vmem:[#allocation13_spill] sm:$0xff]  ;;  %v7665_v55 = vld [vmem:[#allocation24_spill] sm:$0xff] }
 0x193   : > { %v1149_v14 = vrot.slane %v1145_v31, 1  ;;  %v1234_v0 = vadd.f32 %v4864_v24, %v1186_v33  ;;  %v1271_v27 = vsel %vm542_vm1, %v1269_v9, %v1270_v41  ;;  %v4949_v40 = vmul.f32 %v4940_v28, %v7629_v51  ;;  %v7656_v9 = vld [vmem:[#allocation14_spill] sm:$0xff] }
 0x194   : > { %v1080_v63 = vadd.f32 %v4664_v23, %v1041_v54  ;;  %v1079_v37 = vadd.f32 %v4670_v8, %v1040_v19  ;;  %v4953_v48 = vmul.f32 %v4940_v28, %v7634_v45  ;;  %v1275_v23 = vadd.f32 %v1270_v41, %v1235_v11  ;;  %v7658_v11 = vld [vmem:[#allocation18_spill] sm:$0xff] }
 0x195   : > { %v1151_v8 = vsel %vm409_vm0, %v1149_v14, %v1150_v1  ;;  %v1274_v18 = vadd.f32 %v1271_v27, %v1234_v0  ;;  %v7659_v0 = vld [vmem:[#allocation19_spill] sm:$0xff] }
 0x196   : > { %v1299_v60 = vpop.permute.xlu1 %1298  ;;  %v1297_v22 = vpop.permute.xlu0 %1296  ;;  %v1118_v24 = vadd.f32 %v4734_v52, %v1079_v37 }
 0x197   : > { %v1303_v32 = vadd.f32 %v1299_v60, %v1263_v49  ;;  %v1302_v61 = vadd.f32 %v1297_v22, %v1262_v58  ;;  %v1119_v22 = vadd.f32 %v4725_v35, %v1080_v63  ;;  %v7657_v58 = vld [vmem:[#allocation16_spill] sm:$0xff]  ;;  %v7660_v63 = vld [vmem:[#allocation15_spill] sm:$0xff] }
 0x198   : > { %v4970_v17 = vadd.f32 %v1151_v8, %v1118_v24 }
 0x199   : > { %v4968_v16 = vadd.f32 %v1150_v1, %v1119_v22 }
 0x19a   : > { %v1315_v57 = vpop.permute.xlu1 %1314  ;;  %v1313_v62 = vpop.permute.xlu0 %1312 }
 0x19b   : > { %v1319_v51 = vadd.f32 %v1315_v57, %v1275_v23  ;;  %v1318_v46 = vadd.f32 %v1313_v62, %v1274_v18  ;;  %v7654_v57 = vld [vmem:[#allocation11_spill] sm:$0xff]  ;;  %v7661_v18 = vld [vmem:[#allocation20_spill] sm:$0xff] }
 0x19e   : > { %v4933_v50 = vpop.permute.xlu1 %1330  ;;  %v4936_v43 = vpop.permute.xlu0 %1328 }
 0x1a2   : > { %v1347_v29 = vpop.permute.xlu1 %1346  ;;  %v1345_v21 = vpop.permute.xlu0 %1344 }
 0x1a3   : > { %v1351_v59 = vadd.f32 %v1347_v29, %v1303_v32  ;;  %v1350_v60 = vadd.f32 %v1345_v21, %v1302_v61 }
 0x1a5   : > { %v4957_v39 = vmax.f32 %v1351_v59, 0.0  ;;  %v4960_v47 = vmax.f32 %v1350_v60, 0.0 }
 0x1a6   : > { %v1363_v6 = vpop.permute.xlu1 %1362  ;;  %v1361_v53 = vpop.permute.xlu0 %1360 }
 0x1a7   : > { %7652 = vst [vmem:[#allocation79_spill] sm:$0xff] %v4957_v39  ;;  %v1403_v45 = vmul.f32 %v4957_v39, %v7653_v56  ;;  %v1402_v52 = vmul.f32 %v4960_v47, %v7653_v56  ;;  %v4972_v36 = vadd.f32 %v1363_v6, %v1319_v51  ;;  %v1415_v30 = vmul.f32 %v4957_v39, %v7654_v57 }
 0x1a8   : > { %v4977_v31 = vadd.f32 %v1361_v53, %v1318_v46  ;;  %v1414_v62 = vmul.f32 %v4960_v47, %v7654_v57  ;;  %v1427_v49 = vmul.f32 %v4957_v39, %v7655_v10  ;;  %v1426_v41 = vmul.f32 %v4960_v47, %v7655_v10  ;;  %v7662_v53 = vld [vmem:[#allocation21_spill] sm:$0xff] }
 0x1a9   : > { %1408 = vrot.lane.b32.xlu1 %v1403_v45, %s3747_s22  ;;  %1406 = vrot.lane.b32.xlu0 %v1402_v52, %s3747_s22  ;;  %v1439_v33 = vmul.f32 %v4957_v39, %v7656_v9  ;;  %v4990_v54 = vmul.f32 %v4957_v39, %v7657_v58  ;;  %v1507_v19 = vmul.f32 %v4960_v47, %v7657_v58 }
 0x1aa   : > { %v4996_v32 = vmul.f32 %v4957_v39, %v7658_v11  ;;  %v1438_v1 = vmul.f32 %v4960_v47, %v7656_v9  ;;  %v1522_v14 = vmul.f32 %v4960_v47, %v7658_v11  ;;  %v5004_v61 = vmul.f32 %v4957_v39, %v7659_v0 }
 0x1ab   : > { %v1537_v29 = vmul.f32 %v4960_v47, %v7659_v0  ;;  %v1451_v37 = vmul.f32 %v4957_v39, %v7660_v63  ;;  %v7309_v27 = vrot.slane %v4990_v54, 1  ;;  %v1511_v59 = vrot.slane %v1507_v19, 1  ;;  %v7671_v0 = vld [vmem:[#allocation31_spill] sm:$0xff] }
 0x1ac   : > { %v7308_v21 = vrot.slane %v4996_v32, 1  ;;  %v1450_v60 = vmul.f32 %v4960_v47, %v7660_v63  ;;  %v1526_v22 = vrot.slane %v1522_v14, 1  ;;  %v7307_v24 = vrot.slane %v5004_v61, 1 }
 0x1ad   : > { %1420 = vrot.lane.b32.xlu1 %v1415_v30, %s3747_s22  ;;  %1418 = vrot.lane.b32.xlu0 %v1414_v62, %s3747_s22  ;;  %v1541_v23 = vrot.slane %v1537_v29, 1  ;;  %v5020_v8 = vsel %vm409_vm0, %v1511_v59, %v7309_v27  ;;  %v5024_v6 = vmul.f32 %v4957_v39, %v7661_v18  ;;  %v1552_v51 = vmul.f32 %v4960_v47, %v7661_v18  ;;  %v7663_v62 = vld [vmem:[#allocation22_spill] sm:$0xff] }
 0x1ae   : > { %v5030_v45 = vmul.f32 %v4957_v39, %v7662_v53  ;;  %v5035_v46 = vsel %vm409_vm0, %v1526_v22, %v7308_v21  ;;  %v1567_v30 = vmul.f32 %v4960_v47, %v7662_v53  ;;  %v5046_v19 = vmul.f32 %v4957_v39, %v7663_v62  ;;  %v7664_v21 = vld [vmem:[#allocation23_spill] sm:$0xff]  ;;  %v7667_v53 = vld [vmem:[#allocation25_spill] sm:$0xff] }
 0x1af   : > { %v5040_v52 = vsel %vm409_vm0, %v1541_v23, %v7307_v24  ;;  %v7313_v14 = vrot.slane %v5024_v6, 1  ;;  %v1556_v29 = vrot.slane %v1552_v51, 1  ;;  %v1582_v22 = vmul.f32 %v4960_v47, %v7663_v62 }
 0x1b0   : > { %v1571_v23 = vrot.slane %v1567_v30, 1  ;;  %v5057_v27 = vmul.f32 %v4957_v39, %v7664_v21  ;;  %v5068_v59 = vmul.f32 %v4957_v39, %v7665_v55  ;;  %v7666_v30 = vrot.slane %v5030_v45, 1 }
 0x1b1   : > { %1432 = vrot.lane.b32.xlu1 %v1427_v49, %s3747_s22  ;;  %1430 = vrot.lane.b32.xlu0 %v1426_v41, %s3747_s22  ;;  %v1630_v49 = vmul.f32 %v4960_v47, %v7664_v21  ;;  %v5064_v51 = vsel %vm409_vm0, %v1556_v29, %v7313_v14  ;;  %v1586_v35 = vrot.slane %v1582_v22, 1  ;;  %v1645_v41 = vmul.f32 %v4960_v47, %v7665_v55 }
 0x1b2   : > { %v5075_v24 = vsel %vm409_vm0, %v1571_v23, %v7666_v30  ;;  %v7318_v21 = vrot.slane %v5057_v27, 2  ;;  %v5080_v29 = vmul.f32 %v4957_v39, %v7667_v53  ;;  %v7668_v22 = vrot.slane %v5046_v19, 1  ;;  %v7669_v30 = vld [vmem:[#allocation27_spill] sm:$0xff] }
 0x1b3   : > { %v1634_v62 = vrot.slane %v1630_v49, 2  ;;  %v7322_v55 = vrot.slane %v5068_v59, 2  ;;  %v1649_v18 = vrot.slane %v1645_v41, 2  ;;  %v1660_v23 = vmul.f32 %v4960_v47, %v7667_v53 }
 0x1b4   : > { %v5086_v14 = vsel %vm409_vm0, %v1586_v35, %v7668_v22  ;;  %v5100_v63 = vmul.f32 %v4957_v39, %v7669_v30  ;;  %v1675_v35 = vmul.f32 %v4960_v47, %v7669_v30  ;;  %v7670_v22 = vld [vmem:[#allocation29_spill] sm:$0xff]  ;;  %v5118_v11 = vmul.f32 %v4957_v39, %v7671_v0 }
 0x1b5   : > { %1444 = vrot.lane.b32.xlu1 %v1439_v33, %s3748_s29  ;;  %1442 = vrot.lane.b32.xlu0 %v1438_v1, %s3748_s29  ;;  %v5095_v49 = vsel %vm542_vm1, %v1634_v62, %v7318_v21  ;;  %v5107_v41 = vsel %vm542_vm1, %v1649_v18, %v7322_v55  ;;  %v1664_v1 = vrot.slane %v1660_v23, 2  ;;  %v5111_v53 = vmul.f32 %v4957_v39, %v7670_v22 }
 0x1b6   : > { %v1690_v62 = vmul.f32 %v4960_v47, %v7670_v22  ;;  %v1679_v33 = vrot.slane %v1675_v35, 2  ;;  %v1705_v30 = vmul.f32 %v4960_v47, %v7671_v0  ;;  %v5123_v18 = vmax.f32 %v4972_v36, 0.0 }
 0x1b7   : > { %v7672_v23 = vrot.slane %v5080_v29, 2  ;;  %v7326_v21 = vrot.slane %v5111_v53, 2  ;;  %v5133_v22 = vmax.f32 %v4977_v31, 0.0  ;;  %v7673_v0 = vrot.slane %v5100_v63, 2 }
 0x1b8   : > { %v1694_v35 = vrot.slane %v1690_v62, 2  ;;  %v1709_v58 = vrot.slane %v1705_v30, 2  ;;  %v7674_v62 = vld [vmem:[#allocation17_spill] sm:$0xff]  ;;  %v7681_v9 = vrot.slane %v4990_v54, 1 }
 0x1b9   : > { %1456 = vrot.lane.b32.xlu1 %v1451_v37, %s3748_s29  ;;  %v5129_v55 = vsel %vm542_vm1, %v1664_v1, %v7672_v23  ;;  %1454 = vrot.lane.b32.xlu0 %v1450_v60, %s3748_s29  ;;  %v5139_v36 = vsel %vm542_vm1, %v1679_v33, %v7673_v0  ;;  %v7327_v37 = vrot.slane %v5118_v11, 2  ;;  %v1203_v1 = vadd.f32 %v4802_v42, %v4968_v16 }
 0x1ba   : > { %v1202_v23 = vadd.f32 %v4813_v13, %v4970_v17  ;;  %v1463_v31 = vmul.f32 %v4957_v39, %v7674_v62  ;;  %v5151_v60 = vsel %vm542_vm1, %v1694_v35, %v7326_v21  ;;  %v1462_v0 = vmul.f32 %v4960_v47, %v7674_v62  ;;  %v7677_v35 = vld [vmem:[#allocation40_spill] sm:$0xff] }
 0x1bb   : > { %v5158_v33 = vsel %vm542_vm1, %v1709_v58, %v7327_v37  ;;  %v1251_v42 = vadd.f32 %v4880_v2, %v1203_v1  ;;  %v7675_v16 = vrot.slane %v4949_v40, 2  ;;  %v7676_v17 = vrot.slane %v4953_v48, 2  ;;  %v7678_v2 = vld [vmem:[#allocation42_spill] sm:$0xff]  ;;  %v7679_v1 = vld [vmem:[#allocation43_spill] sm:$0xff] }
 0x1bc   : > { %v1250_v13 = vadd.f32 %v4885_v12, %v1202_v23  ;;  %v5171_v21 = vmul.f32 %v5123_v18, %v7677_v35  ;;  %v1837_v58 = vmul.f32 %v5133_v22, %v7677_v35  ;;  %v5177_v12 = vmul.f32 %v5123_v18, %v7678_v2 }
 0x1bd   : > { %v1283_v30 = vsel %vm542_vm1, %v7676_v17, %v7675_v16  ;;  %1468 = vrot.lane.b32.xlu1 %v1463_v31, %s3748_s29  ;;  %1466 = vrot.lane.b32.xlu0 %v1462_v0, %s3748_s29  ;;  %v1852_v48 = vmul.f32 %v5133_v22, %v7678_v2  ;;  %v5183_v23 = vmul.f32 %v5123_v18, %v7679_v1  ;;  %v7680_v0 = vld [vmem:[#allocation44_spill] sm:$0xff] }
 0x1be   : > { %v1867_v31 = vmul.f32 %v5133_v22, %v7679_v1  ;;  %v5189_v16 = vmul.f32 %v5123_v18, %v7680_v0  ;;  %v1882_v17 = vmul.f32 %v5133_v22, %v7680_v0  ;;  %v7337_v37 = vrot.slane %v5171_v21, 1 }
 0x1bf   : > { %v1841_v35 = vrot.slane %v1837_v58, 1  ;;  %v7336_v62 = vrot.slane %v5177_v12, 1  ;;  %v1856_v2 = vrot.slane %v1852_v48, 1  ;;  %v7342_v10 = vrot.slane %v5183_v23, 1 }
 0x1c0   : > { %v1871_v1 = vrot.slane %v1867_v31, 1  ;;  %v7343_v57 = vrot.slane %v5189_v16, 1  ;;  %v1886_v56 = vrot.slane %v1882_v17, 1  ;;  %v7685_v0 = vrot.slane %v4949_v40, 2 }
 0x1c1   : > { %1516 = vrot.lane.b32.xlu1 %v7681_v9, %s3747_s22  ;;  %1514 = vrot.lane.b32.xlu0 %v5020_v8, %s3747_s22  ;;  %v5205_v58 = vsel %vm409_vm0, %v1841_v35, %v7337_v37  ;;  %v5210_v48 = vsel %vm409_vm0, %v1856_v2, %v7336_v62  ;;  %v7682_v9 = vld [vmem:[#allocation45_spill] sm:$0xff]  ;;  %v7684_v62 = vld [vmem:[#allocation46_spill] sm:$0xff] }
 0x1c2   : > { %v5214_v54 = vmul.f32 %v5123_v18, %v7682_v9  ;;  %v1897_v31 = vmul.f32 %v5133_v22, %v7682_v9  ;;  %v5221_v8 = vsel %vm409_vm0, %v1871_v1, %v7342_v10  ;;  %v5226_v35 = vsel %vm409_vm0, %v1886_v56, %v7343_v57  ;;  %v1379_v56 = vpop.permute.xlu1 %1378 }
 0x1c3   : > { %7683 = vst [vmem:[#allocation98_spill] sm:$0xff] %v5226_v35  ;;  %v5231_v37 = vmul.f32 %v5123_v18, %v7684_v62  ;;  %v1912_v9 = vmul.f32 %v5133_v22, %v7684_v62  ;;  %v1287_v25 = vadd.f32 %v7685_v0, %v1251_v42  ;;  %v1286_v1 = vadd.f32 %v1283_v30, %v1250_v13  ;;  %v7687_v35 = vld [vmem:[#allocation47_spill] sm:$0xff]  ;;  %v7688_v0 = vld [vmem:[#allocation48_spill] sm:$0xff] }
 0x1c4   : > { %v7345_v2 = vrot.slane %v5214_v54, 1  ;;  %v1901_v17 = vrot.slane %v1897_v31, 1  ;;  %v7686_v10 = vrot.slane %v4996_v32, 1  ;;  %v5250_v40 = vmul.f32 %v5123_v18, %v7687_v35  ;;  %v1377_v32 = vpop.permute.xlu0 %1376 }
 0x1c5   : > { %1529 = vrot.lane.b32.xlu0 %v5035_v46, %s3747_s22  ;;  %v7346_v57 = vrot.slane %v5231_v37, 1  ;;  %v1916_v62 = vrot.slane %v1912_v9, 1  ;;  %v1335_v42 = vadd.f32 %v4933_v50, %v1287_v25  ;;  %v1334_v46 = vadd.f32 %v4936_v43, %v1286_v1  ;;  %v7691_v1 = vld [vmem:[#allocation50_spill] sm:$0xff] }
 0x1c6   : > { %1531 = vrot.lane.b32.xlu1 %v7686_v10, %s3747_s22  ;;  %v5245_v31 = vsel %vm409_vm0, %v1901_v17, %v7345_v2  ;;  %v1960_v10 = vmul.f32 %v5133_v22, %v7687_v35  ;;  %v7350_v30 = vrot.slane %v5250_v40, 2  ;;  %v5264_v9 = vmul.f32 %v5123_v18, %v7688_v0 }
 0x1c7   : > { %v5259_v13 = vsel %vm409_vm0, %v1916_v62, %v7346_v57  ;;  %v1383_v17 = vadd.f32 %v1379_v56, %v1335_v42  ;;  %v7690_v25 = vrot.slane %v5004_v61, 1  ;;  %v1975_v43 = vmul.f32 %v5133_v22, %v7688_v0  ;;  %v7693_v42 = vld [vmem:[#allocation53_spill] sm:$0xff]  ;;  %v7694_v0 = vld [vmem:[#allocation56_spill] sm:$0xff] }
 0x1c8   : > { %7689 = vst [vmem:[#allocation61_spill] sm:$0xff] %v5264_v9  ;;  %v1964_v50 = vrot.slane %v1960_v10, 2  ;;  %v5273_v2 = vmul.f32 %v5123_v18, %v7691_v1  ;;  %v1382_v62 = vadd.f32 %v1377_v32, %v1334_v46  ;;  %v1990_v56 = vmul.f32 %v5133_v22, %v7691_v1 }
 0x1c9   : > { %1544 = vrot.lane.b32.xlu0 %v5040_v52, %s3747_s22  ;;  %v5282_v61 = vmul.f32 %v5123_v18, %v7693_v42  ;;  %v2005_v52 = vmul.f32 %v5133_v22, %v7693_v42  ;;  %v5295_v1 = vmul.f32 %v5123_v18, %v7694_v0  ;;  %v2020_v35 = vmul.f32 %v5133_v22, %v7694_v0 }
 0x1ca   : > { %1546 = vrot.lane.b32.xlu1 %v7690_v25, %s3747_s22  ;;  %7692 = vst [vmem:[#allocation82_spill] sm:$0xff] %v5273_v2  ;;  %v5287_v10 = vsel %vm542_vm1, %v1964_v50, %v7350_v30  ;;  %v1979_v25 = vrot.slane %v1975_v43, 2  ;;  %v1994_v46 = vrot.slane %v1990_v56, 2  ;;  %v7695_v50 = vrot.slane %v5024_v6, 1  ;;  %v7698_v56 = vld [vmem:[#allocation26_spill] sm:$0xff] }
 0x1cb   : > { %v7696_v43 = vrot.slane %v5264_v9, 2  ;;  %v2009_v32 = vrot.slane %v2005_v52, 2  ;;  %v5309_v57 = vmul.f32 %v4957_v39, %v7698_v56  ;;  %v1474_v42 = vmul.f32 %v4960_v47, %v7698_v56 }
 0x1cc   : > { %v7700_v0 = vrot.slane %v5273_v2, 2 }
 0x1cd   : > { %v5305_v30 = vsel %vm542_vm1, %v1979_v25, %v7696_v43  ;;  %7699 = vst [vmem:[#allocation94_spill] sm:$0xff] %v5309_v57  ;;  %1559 = vrot.lane.b32.xlu0 %v5064_v51, %s3748_s29  ;;  %v2024_v25 = vrot.slane %v2020_v35, 2  ;;  %v7702_v43 = vld [vmem:[#allocation58_spill] sm:$0xff]  ;;  %v7359_v56 = vrot.slane %v5309_v57, 1  ;;  %v1478_v51 = vrot.slane %v1474_v42, 1 }
 0x1ce   : > { %1561 = vrot.lane.b32.xlu1 %v7695_v50, %s3748_s29  ;;  %7697 = vst [vmem:[#allocation83_spill] sm:$0xff] %v5305_v30  ;;  %v5318_v6 = vsel %vm542_vm1, %v1994_v46, %v7700_v0  ;;  %v7356_v50 = vrot.slane %v5295_v1, 2  ;;  %v5323_v52 = vmul.f32 %v5123_v18, %v7702_v43  ;;  %v7703_v30 = vrot.slane %v5282_v61, 2  ;;  %v7705_v46 = vld [vmem:[#allocation28_spill] sm:$0xff] }
 0x1cf   : > { %7701 = vst [vmem:[#allocation95_spill] sm:$0xff] %v5318_v6  ;;  %v2035_v2 = vmul.f32 %v5133_v22, %v7702_v43  ;;  %v5341_v6 = vmul.f32 %v4957_v39, %v7705_v46  ;;  %v7707_v42 = vrot.slane %v5030_v45, 1  ;;  %v7708_v43 = vld [vmem:[#allocation30_spill] sm:$0xff] }
 0x1d0   : > { %v5328_v9 = vsel %vm542_vm1, %v2009_v32, %v7703_v30  ;;  %v5336_v0 = vsel %vm542_vm1, %v2024_v25, %v7356_v50  ;;  %v1485_v30 = vmul.f32 %v4960_v47, %v7705_v46  ;;  %v5351_v32 = vsel %vm409_vm0, %v1478_v51, %v7359_v56 }
 0x1d1   : > { %7704 = vst [vmem:[#allocation99_spill] sm:$0xff] %v5336_v0  ;;  %7706 = vst [vmem:[#allocation86_spill] sm:$0xff] %v5341_v6  ;;  %v2039_v25 = vrot.slane %v2035_v2, 2  ;;  %1574 = vrot.lane.b32.xlu0 %v5075_v24, %s3748_s29  ;;  %v7362_v50 = vrot.slane %v5341_v6, 1  ;;  %v5358_v0 = vmul.f32 %v4957_v39, %v7708_v43  ;;  %v1496_v45 = vmul.f32 %v4960_v47, %v7708_v43 }
 0x1d2   : > { %1576 = vrot.lane.b32.xlu1 %v7707_v42, %s3748_s29  ;;  %v1489_v35 = vrot.slane %v1485_v30, 1  ;;  %v5362_v42 = vmax.f32 %v1383_v17, 0.0  ;;  %v7710_v46 = vrot.slane %v5323_v52, 2  ;;  %v5369_v2 = vmax.f32 %v1382_v62, 0.0  ;;  %v7713_v62 = vld [vmem:[#allocation32_spill] sm:$0xff] }
 0x1d3   : > { %7709 = vst [vmem:[#allocation87_spill] sm:$0xff] %v5358_v0  ;;  %v7361_v30 = vrot.slane %v5358_v0, 1  ;;  %v1500_v56 = vrot.slane %v1496_v45, 1  ;;  %v7712_v43 = vrot.slane %v5046_v19, 1  ;;  %v7719_v0 = vld [vmem:[#allocation34_spill] sm:$0xff]  ;;  %v7721_v6 = vrot.slane %v5057_v27, 2 }
 0x1d4   : > { %v5367_v51 = vsel %vm542_vm1, %v2039_v25, %v7710_v46  ;;  %v5374_v24 = vsel %vm409_vm0, %v1489_v35, %v7362_v50  ;;  %v5389_v46 = vmul.f32 %v4957_v39, %v7713_v62  ;;  %v1597_v35 = vmul.f32 %v4960_v47, %v7713_v62  ;;  %v7715_v25 = vld [vmem:[#allocation33_spill] sm:$0xff] }
 0x1d5   : > { %7711 = vst [vmem:[#allocation90_spill] sm:$0xff] %v5367_v51  ;;  %1589 = vrot.lane.b32.xlu0 %v5086_v14, %s3748_s29  ;;  %v5385_v17 = vsel %vm409_vm0, %v1500_v56, %v7361_v30  ;;  %v5395_v45 = vmul.f32 %v4957_v39, %v7715_v25  ;;  %v1608_v19 = vmul.f32 %v4960_v47, %v7715_v25  ;;  %v7717_v14 = vld [vmem:[#allocation66_spill] sm:$0xff] }
 0x1d6   : > { %1591 = vrot.lane.b32.xlu1 %v7712_v43, %s3748_s29  ;;  %7714 = vst [vmem:[#allocation91_spill] sm:$0xff] %v5389_v46  ;;  %v5401_v43 = vmul.f32 %v5362_v42, %v7717_v14  ;;  %v1601_v30 = vrot.slane %v1597_v35, 2  ;;  %v2167_v50 = vmul.f32 %v5369_v2, %v7717_v14  ;;  %v5408_v62 = vmul.f32 %v4957_v39, %v7719_v0 }
 0x1d7   : > { %7716 = vst [vmem:[#allocation96_spill] sm:$0xff] %v5395_v45  ;;  %v1612_v57 = vrot.slane %v1608_v19, 2  ;;  %v1619_v56 = vmul.f32 %v4960_v47, %v7719_v0  ;;  %v7722_v35 = vrot.slane %v5389_v46, 2  ;;  %v7724_v19 = vrot.slane %v5395_v45, 2  ;;  %v7726_v46 = vld [vmem:[#allocation69_spill] sm:$0xff] }
 0x1d8   : > { %7718 = vst [vmem:[#allocation97_spill] sm:$0xff] %v5401_v43  ;;  %7720 = vst [vmem:[#allocation109_spill] sm:$0xff] %v5408_v62  ;;  %v2171_v39 = vrot.slane %v2167_v50, 1  ;;  %v7728_v50 = vrot.slane %v5401_v43, 1  ;;  %v2197_v45 = vmul.f32 %v5369_v2, %v7726_v46 }
 0x1d9   : > { %1637 = vrot.lane.b32.xlu0 %v5095_v49, %s3747_s22  ;;  %v5422_v14 = vsel %vm542_vm1, %v1601_v30, %v7722_v35  ;;  %v5432_v51 = vsel %vm542_vm1, %v1612_v57, %v7724_v19  ;;  %v1623_v0 = vrot.slane %v1619_v56, 2  ;;  %v5438_v30 = vmul.f32 %v5362_v42, %v7726_v46  ;;  %v7730_v57 = vld [vmem:[#allocation70_spill] sm:$0xff] }
 0x1da   : > { %1639 = vrot.lane.b32.xlu1 %v7721_v6, %s3747_s22  ;;  %v7723_v6 = vld [vmem:[#allocation68_spill] sm:$0xff]  ;;  %7725 = vst [vmem:[#allocation110_spill] sm:$0xff] %v5432_v51  ;;  %v5443_v35 = vsel %vm409_vm0, %v2171_v39, %v7728_v50  ;;  %v5450_v56 = vmul.f32 %v5362_v42, %v7730_v57  ;;  %v7732_v19 = vrot.slane %v5068_v59, 2  ;;  %v2212_v27 = vmul.f32 %v5369_v2, %v7730_v57  ;;  %v7734_v51 = vld [vmem:[#allocation71_spill] sm:$0xff] }
 0x1db   : > { %v5427_v25 = vmul.f32 %v5362_v42, %v7723_v6  ;;  %v2182_v49 = vmul.f32 %v5369_v2, %v7723_v6  ;;  %7727 = vst [vmem:[#allocation111_spill] sm:$0xff] %v5438_v30  ;;  %7729 = vst [vmem:[#allocation112_spill] sm:$0xff] %v5443_v35  ;;  %v7733_v6 = vrot.slane %v5408_v62, 2  ;;  %v7380_v50 = vrot.slane %v5438_v30, 1  ;;  %v7738_v57 = vld [vmem:[#allocation72_spill] sm:$0xff] }
 0x1dc   : > { %7731 = vst [vmem:[#allocation113_spill] sm:$0xff] %v5450_v56  ;;  %v2201_v46 = vrot.slane %v2197_v45, 1  ;;  %v5468_v59 = vmul.f32 %v5362_v42, %v7734_v51  ;;  %v5485_v62 = vmul.f32 %v5362_v42, %v7738_v57 }
 0x1dd   : > { %v5458_v43 = vsel %vm542_vm1, %v1623_v0, %v7733_v6  ;;  %v2186_v39 = vrot.slane %v2182_v49, 1  ;;  %1652 = vrot.lane.b32.xlu0 %v5107_v41, %s3747_s22  ;;  %v2227_v0 = vmul.f32 %v5369_v2, %v7734_v51  ;;  %v7736_v6 = vrot.slane %v5427_v25, 1 }
 0x1de   : > { %1654 = vrot.lane.b32.xlu1 %v7732_v19, %s3747_s22  ;;  %7735 = vst [vmem:[#allocation114_spill] sm:$0xff] %v5468_v59  ;;  %v2216_v19 = vrot.slane %v2212_v27, 1  ;;  %v5480_v41 = vsel %vm409_vm0, %v2201_v46, %v7380_v50  ;;  %v7383_v45 = vrot.slane %v5468_v59, 1  ;;  %7739 = vst [vmem:[#allocation116_spill] sm:$0xff] %v5485_v62  ;;  %v7740_v51 = vrot.slane %v5080_v29, 2  ;;  %v7744_v29 = vld [vmem:[#allocation73_spill] sm:$0xff] }
 0x1df   : > { %v5475_v49 = vsel %vm409_vm0, %v2186_v39, %v7736_v6  ;;  %7737 = vst [vmem:[#allocation115_spill] sm:$0xff] %v5480_v41  ;;  %v2231_v35 = vrot.slane %v2227_v0, 1  ;;  %v7741_v39 = vrot.slane %v5450_v56, 1  ;;  %v2242_v46 = vmul.f32 %v5369_v2, %v7738_v57  ;;  %v7747_v59 = vld [vmem:[#allocation75_spill] sm:$0xff] }
 0x1e0   : > { %v7750_v56 = vrot.slane %v5100_v63, 2 }
 0x1e1   : > { %v5493_v27 = vsel %vm409_vm0, %v2216_v19, %v7741_v39  ;;  %1667 = vrot.lane.b32.xlu0 %v5129_v55, %s3747_s22  ;;  %v5502_v0 = vsel %vm409_vm0, %v2231_v35, %v7383_v45  ;;  %v2290_v19 = vmul.f32 %v5369_v2, %v7744_v29  ;;  %v7746_v39 = vld [vmem:[#allocation35_spill] sm:$0xff]  ;;  %v2246_v57 = vrot.slane %v2242_v46, 1  ;;  %v7753_v45 = vld [vmem:[#allocation77_spill] sm:$0xff] }
 0x1e2   : > { %1669 = vrot.lane.b32.xlu1 %v7740_v51, %s3747_s22  ;;  %7742 = vst [vmem:[#allocation117_spill] sm:$0xff] %v5493_v27  ;;  %7743 = vst [vmem:[#allocation118_spill] sm:$0xff] %v5502_v0  ;;  %v5507_v51 = vmul.f32 %v5362_v42, %v7744_v29  ;;  %v1733_v50 = vmul.f32 %v5123_v18, %v7746_v39  ;;  %v5515_v55 = vmul.f32 %v5133_v22, %v7746_v39  ;;  %v7748_v27 = vld [vmem:[#allocation76_spill] sm:$0xff] }
 0x1e3   : > { %v5519_v35 = vmul.f32 %v5362_v42, %v7747_v59  ;;  %v2294_v6 = vrot.slane %v2290_v19, 2  ;;  %v2305_v0 = vmul.f32 %v5369_v2, %v7747_v59  ;;  %v5526_v29 = vmul.f32 %v5362_v42, %v7748_v27 }
 0x1e4   : > { %7745 = vst [vmem:[#allocation119_spill] sm:$0xff] %v5507_v51  ;;  %v7751_v46 = vrot.slane %v5485_v62, 1  ;;  %v2320_v19 = vmul.f32 %v5369_v2, %v7748_v27  ;;  %v5541_v59 = vmul.f32 %v5362_v42, %v7753_v45  ;;  %v7754_v63 = vrot.slane %v5507_v51, 2 }
 0x1e5   : > { %7749 = vst [vmem:[#allocation120_spill] sm:$0xff] %v5526_v29  ;;  %1682 = vrot.lane.b32.xlu0 %v5139_v36, %s3748_s29  ;;  %v2309_v62 = vrot.slane %v2305_v0, 2  ;;  %v7756_v51 = vrot.slane %v5519_v35, 2  ;;  %v7757_v27 = vrot.slane %v5111_v53, 2 }
 0x1e6   : > { %1684 = vrot.lane.b32.xlu1 %v7750_v56, %s3748_s29  ;;  %v5534_v39 = vsel %vm409_vm0, %v2246_v57, %v7751_v46  ;;  %v5548_v56 = vsel %vm542_vm1, %v2294_v6, %v7754_v63  ;;  %v7397_v57 = vrot.slane %v5526_v29, 2  ;;  %v2335_v46 = vmul.f32 %v5369_v2, %v7753_v45 }
 0x1e7   : > { %7752 = vst [vmem:[#allocation121_spill] sm:$0xff] %v5534_v39  ;;  %v2324_v41 = vrot.slane %v2320_v19, 2  ;;  %v7755_v39 = vld [vmem:[#allocation80_spill] sm:$0xff]  ;;  %v5563_v6 = vsel %vm542_vm1, %v2309_v62, %v7756_v51  ;;  %v5567_v63 = vmul.f32 %v5123_v18, %v4676_v26  ;;  %v1804_v19 = vmul.f32 %v5133_v22, %v4676_v26 }
 0x1e8   : > { %v5556_v30 = vmul.f32 %v5362_v42, %v7755_v39  ;;  %v2350_v36 = vmul.f32 %v5369_v2, %v7755_v39  ;;  %v2339_v0 = vrot.slane %v2335_v46, 2  ;;  %v7758_v46 = vld [vmem:[#allocation81_spill] sm:$0xff]  ;;  %v7760_v26 = vrot.slane %v5541_v59, 2 }
 0x1e9   : > { %v5577_v39 = vsel %vm542_vm1, %v2324_v41, %v7397_v57  ;;  %v5582_v45 = vmul.f32 %v5362_v42, %v7758_v46  ;;  %1697 = vrot.lane.b32.xlu0 %v5151_v60, %s3748_s29  ;;  %v1808_v29 = vrot.slane %v1804_v19, 1  ;;  %v2365_v41 = vmul.f32 %v5369_v2, %v7758_v46 }
 0x1ea   : > { %1699 = vrot.lane.b32.xlu1 %v7757_v27, %s3748_s29  ;;  %v7399_v62 = vrot.slane %v5556_v30, 2  ;;  %v2354_v51 = vrot.slane %v2350_v36, 2  ;;  %v5589_v53 = vsel %vm542_vm1, %v2339_v0, %v7760_v26  ;;  %v7402_v27 = vrot.slane %v5567_v63, 1 }
 0x1eb   : > { %7759 = vst [vmem:[#allocation122_spill] sm:$0xff] %v5582_v45  ;;  %v5602_v60 = vmul.f32 %v5123_v18, %v4707_v4  ;;  %v1815_v26 = vmul.f32 %v5133_v22, %v4707_v4  ;;  %v2369_v19 = vrot.slane %v2365_v41, 2  ;;  %v5613_v46 = vmul.f32 %v5123_v18, %v4739_v44 }
 0x1ec   : > { %v5597_v36 = vsel %vm542_vm1, %v2354_v51, %v7399_v62  ;;  %v5609_v0 = vsel %vm409_vm0, %v1808_v29, %v7402_v27  ;;  %v1826_v51 = vmul.f32 %v5133_v22, %v4739_v44  ;;  %v7762_v62 = vrot.slane %v5118_v11, 2 }
 0x1ed   : > { %7761 = vst [vmem:[#allocation123_spill] sm:$0xff] %v5597_v36  ;;  %v7408_v57 = vrot.slane %v5602_v60, 1  ;;  %v1819_v4 = vrot.slane %v1815_v26, 1  ;;  %v5623_v36 = vmul.f32 %v5123_v18, %v4717_v7  ;;  %v1927_v29 = vmul.f32 %v5133_v22, %v4717_v7  ;;  %1712 = vrot.lane.b32.xlu0 %v5158_v33, %s3748_s29 }
 0x1ee   : > { %1714 = vrot.lane.b32.xlu1 %v7762_v62, %s3748_s29  ;;  %v7764_v41 = vrot.slane %v5582_v45, 2  ;;  %v7409_v11 = vrot.slane %v5613_v46, 1  ;;  %v1830_v62 = vrot.slane %v1826_v51, 1  ;;  %v5637_v26 = vmul.f32 %v5123_v18, %v4732_v38 }
 0x1ef   : > { %7763 = vst [vmem:[#allocation124_spill] sm:$0xff] %v5623_v36  ;;  %v5642_v44 = vsel %vm409_vm0, %v1819_v4, %v7408_v57  ;;  %v7414_v7 = vrot.slane %v5623_v36, 2  ;;  %v1931_v33 = vrot.slane %v1927_v29, 2  ;;  %v1938_v45 = vmul.f32 %v5133_v22, %v4732_v38 }
 0x1f0   : > { %v5632_v27 = vsel %vm542_vm1, %v2369_v19, %v7764_v41  ;;  %7766 = vst [vmem:[#allocation126_spill] sm:$0xff] %v5637_v26  ;;  %v5650_v19 = vsel %vm409_vm0, %v1830_v62, %v7409_v11  ;;  %v5655_v41 = vmul.f32 %v5123_v18, %v4795_v3  ;;  %v1949_v4 = vmul.f32 %v5133_v22, %v4795_v3  ;;  %v7769_v62 = vld [vmem:[#allocation36_spill] sm:$0xff] }
 0x1f1   : > { %7765 = vst [vmem:[#allocation125_spill] sm:$0xff] %v5632_v27  ;;  %v5663_v29 = vsel %vm542_vm1, %v1931_v33, %v7414_v7  ;;  %v1942_v57 = vrot.slane %v1938_v45, 2  ;;  %1736 = vrot.lane.b32.xlu0 %v5515_v55, %s3747_s22  ;;  %v1745_v11 = vmul.f32 %v5123_v18, %v7769_v62  ;;  %v1744_v51 = vmul.f32 %v5133_v22, %v7769_v62  ;;  %v7770_v27 = vld [vmem:[#allocation37_spill] sm:$0xff] }
 0x1f2   : > { %7767 = vst [vmem:[#allocation127_spill] sm:$0xff] %v5655_v41  ;;  %1738 = vrot.lane.b32.xlu1 %v1733_v50, %s3747_s22  ;;  %7768 = vst [vmem:[#allocation128_spill] sm:$0xff] %v5663_v29  ;;  %v7418_v38 = vrot.slane %v5655_v41, 2  ;;  %v1953_v3 = vrot.slane %v1949_v4, 2  ;;  %v1757_v50 = vmul.f32 %v5123_v18, %v7770_v27  ;;  %v1756_v33 = vmul.f32 %v5133_v22, %v7770_v27 }
 0x1f3   : > { %v7771_v45 = vrot.slane %v5637_v26, 2  ;;  %v5683_v55 = vmul.f32 %v5362_v42, %v4819_v34  ;;  %v2134_v4 = vmul.f32 %v5369_v2, %v4819_v34  ;;  %v5694_v27 = vmul.f32 %v5362_v42, %v4860_v5 }
 0x1f4   : > { %v5688_v62 = vsel %vm542_vm1, %v1953_v3, %v7418_v38  ;;  %v5702_v41 = vmul.f32 %v5362_v42, %v4901_v20  ;;  %v2156_v3 = vmul.f32 %v5369_v2, %v4901_v20  ;;  %v7774_v38 = vld [vmem:[#allocation92_spill] sm:$0xff]  ;;  %v5718_v20 = vmul.f32 %v5362_v42, %v4904_v15 }
 0x1f5   : > { %v5679_v7 = vsel %vm542_vm1, %v1942_v57, %v7771_v45  ;;  %7773 = vst [vmem:[#allocation130_spill] sm:$0xff] %v5688_v62  ;;  %v2145_v57 = vmul.f32 %v5369_v2, %v4860_v5  ;;  %v5708_v34 = vmul.f32 %v5362_v42, %v7774_v38  ;;  %1748 = vrot.lane.b32.xlu0 %v1744_v51, %s3747_s22  ;;  %v2138_v62 = vrot.slane %v2134_v4, 1 }
 0x1f6   : > { %7772 = vst [vmem:[#allocation129_spill] sm:$0xff] %v5679_v7  ;;  %1750 = vrot.lane.b32.xlu1 %v1745_v11, %s3747_s22  ;;  %v7428_v5 = vrot.slane %v5694_v27, 1  ;;  %v2257_v11 = vmul.f32 %v5369_v2, %v7774_v38  ;;  %v7429_v45 = vrot.slane %v5702_v41, 1  ;;  %v2160_v26 = vrot.slane %v2156_v3, 1 }
 0x1f7   : > { %v2149_v7 = vrot.slane %v2145_v57, 1  ;;  %v7775_v36 = vrot.slane %v5683_v55, 1  ;;  %v2268_v3 = vmul.f32 %v5369_v2, %v4904_v15 }
 0x1f8   : > { %v2261_v57 = vrot.slane %v2257_v11, 2  ;;  %v5736_v29 = vsel %vm409_vm0, %v2160_v26, %v7429_v45 }
 0x1f9   : > { %v5723_v51 = vsel %vm409_vm0, %v2138_v62, %v7775_v36  ;;  %v5728_v4 = vsel %vm409_vm0, %v2149_v7, %v7428_v5  ;;  %7776 = vst [vmem:[#allocation131_spill] sm:$0xff] %v5736_v29  ;;  %v5741_v36 = vmul.f32 %v5362_v42, %v4940_v28  ;;  %v2279_v7 = vmul.f32 %v5369_v2, %v4940_v28  ;;  %v7779_v5 = vld [vmem:[#allocation38_spill] sm:$0xff] }
 0x1fa   : > { %1762 = vrot.lane.b32.xlu1 %v1757_v50, %s3747_s22  ;;  %1760 = vrot.lane.b32.xlu0 %v1756_v33, %s3747_s22  ;;  %v7778_v62 = vrot.slane %v5708_v34, 2  ;;  %v2272_v11 = vrot.slane %v2268_v3, 2  ;;  %v1769_v26 = vmul.f32 %v5123_v18, %v7779_v5  ;;  %v1768_v15 = vmul.f32 %v5133_v22, %v7779_v5 }
 0x1fb   : > { %7777 = vst [vmem:[#allocation132_spill] sm:$0xff] %v5741_v36  ;;  %v7434_v45 = vrot.slane %v5741_v36, 2  ;;  %v2283_v38 = vrot.slane %v2279_v7, 2  ;;  %v7780_v29 = vrot.slane %v5718_v20, 2 }
 0x1fc   : > { %v5749_v50 = vsel %vm542_vm1, %v2261_v57, %v7778_v62  ;;  %v7783_v57 = vld [vmem:[#allocation39_spill] sm:$0xff] }
 0x1fd   : > { %v5759_v28 = vsel %vm542_vm1, %v2272_v11, %v7780_v29  ;;  %v5765_v33 = vsel %vm542_vm1, %v2283_v38, %v7434_v45  ;;  %v1781_v3 = vmul.f32 %v5123_v18, %v7783_v57  ;;  %v1780_v7 = vmul.f32 %v5133_v22, %v7783_v57  ;;  %v7784_v29 = vld [vmem:[#allocation41_spill] sm:$0xff]  ;;  %v7800_v45 = vld [vmem:[#allocation55_spill] sm:$0xff]  ;;  %v7801_v57 = vld [vmem:[#allocation82_spill] sm:$0xff] }
 0x1fe   : > { %7781 = vst [vmem:[#allocation133_spill] sm:$0xff] %v5759_v28  ;;  %1774 = vrot.lane.b32.xlu1 %v1769_v26, %s3748_s29  ;;  %7782 = vst [vmem:[#allocation134_spill] sm:$0xff] %v5765_v33  ;;  %1772 = vrot.lane.b32.xlu0 %v1768_v15, %s3748_s29  ;;  %v1793_v62 = vmul.f32 %v5123_v18, %v7784_v29  ;;  %v1792_v11 = vmul.f32 %v5133_v22, %v7784_v29  ;;  %v7785_v38 = vrot.slane %v5171_v21, 1 }
 0x1ff   : > { %v7786_v15 = vrot.slane %v5177_v12, 1  ;;  %v7787_v26 = vrot.slane %v5183_v23, 1  ;;  %v7788_v21 = vrot.slane %v5189_v16, 1  ;;  %v7790_v12 = vrot.slane %v5214_v54, 1 }
 0x200   : > { %v1398_v29 = vmul.f32 %v4960_v47, %v7800_v45  ;;  %v7802_v5 = vrot.slane %v7801_v57, 2 }
 0x202   : > { %1786 = vrot.lane.b32.xlu1 %v1781_v3, %s3748_s29  ;;  %1784 = vrot.lane.b32.xlu0 %v1780_v7, %s3748_s29  ;;  %v7792_v7 = vld [vmem:[#allocation49_spill] sm:$0xff] }
 0x203   : > { %v1390_v54 = vmul.f32 %v4960_v47, %v7792_v7 }
 0x206   : > { %1798 = vrot.lane.b32.xlu1 %v1793_v62, %s3748_s29  ;;  %1796 = vrot.lane.b32.xlu0 %v1792_v11, %s3748_s29  ;;  %v7793_v62 = vrot.slane %v5250_v40, 2  ;;  %v7794_v11 = vld [vmem:[#allocation52_spill] sm:$0xff] }
 0x20a   : > { %1846 = vrot.lane.b32.xlu1 %v7785_v38, %s3747_s22  ;;  %1844 = vrot.lane.b32.xlu0 %v5205_v58, %s3747_s22  ;;  %v7789_v58 = vld [vmem:[#allocation98_spill] sm:$0xff]  ;;  %v1392_v38 = vadd.f32 %v1390_v54, %v7794_v11 }
 0x20e   : > { %1861 = vrot.lane.b32.xlu1 %v7786_v15, %s3747_s22  ;;  %1859 = vrot.lane.b32.xlu0 %v5210_v48, %s3747_s22  ;;  %v7795_v15 = vld [vmem:[#allocation51_spill] sm:$0xff] }
 0x212   : > { %1876 = vrot.lane.b32.xlu1 %v7787_v26, %s3747_s22  ;;  %1874 = vrot.lane.b32.xlu0 %v5221_v8, %s3747_s22  ;;  %v7791_v8 = vrot.slane %v5231_v37, 1  ;;  %v7796_v26 = vld [vmem:[#allocation61_spill] sm:$0xff] }
 0x216   : > { %1891 = vrot.lane.b32.xlu1 %v7788_v21, %s3748_s29  ;;  %1889 = vrot.lane.b32.xlu0 %v7789_v58, %s3748_s29  ;;  %v7797_v21 = vrot.slane %v7796_v26, 2  ;;  %v7798_v58 = vld [vmem:[#allocation83_spill] sm:$0xff] }
 0x217   : > { %v7803_v26 = vld [vmem:[#allocation95_spill] sm:$0xff] }
 0x21a   : > { %1906 = vrot.lane.b32.xlu1 %v7790_v12, %s3748_s29  ;;  %1904 = vrot.lane.b32.xlu0 %v5245_v31, %s3748_s29 }
 0x21b   : > { %v5805_v48 = vpop.permute.xlu1 %1408  ;;  %v1407_v23 = vpop.permute.xlu0 %1406 }
 0x21c   : > { %v1412_v40 = vadd.f32 %v1407_v23, %v1392_v38 }
 0x21e   : > { %1921 = vrot.lane.b32.xlu1 %v7791_v8, %s3748_s29  ;;  %1919 = vrot.lane.b32.xlu0 %v5259_v13, %s3748_s29  ;;  %v1394_v13 = vmul.f32 %v4960_v47, %v7795_v15  ;;  %v7805_v47 = vrot.slane %v5282_v61, 2 }
 0x21f   : > { %v5812_v16 = vpop.permute.xlu1 %1420  ;;  %v1419_v3 = vpop.permute.xlu0 %1418 }
 0x222   : > { %1969 = vrot.lane.b32.xlu1 %v7793_v62, %s3747_s22  ;;  %1967 = vrot.lane.b32.xlu0 %v5287_v10, %s3747_s22  ;;  %v7799_v10 = vld [vmem:[#allocation54_spill] sm:$0xff] }
 0x223   : > { %v5821_v31 = vpop.permute.xlu1 %1432  ;;  %v1431_v37 = vpop.permute.xlu0 %1430  ;;  %v1396_v62 = vadd.f32 %v1394_v13, %v7799_v10 }
 0x226   : > { %1984 = vrot.lane.b32.xlu1 %v7797_v21, %s3747_s22  ;;  %1982 = vrot.lane.b32.xlu0 %v7798_v58, %s3747_s22  ;;  %v1424_v21 = vadd.f32 %v1419_v3, %v1396_v62  ;;  %v7804_v58 = vld [vmem:[#allocation57_spill] sm:$0xff] }
 0x227   : > { %v5831_v12 = vpop.permute.xlu1 %1444  ;;  %v1443_v8 = vpop.permute.xlu0 %1442  ;;  %v1400_v36 = vadd.f32 %v1398_v29, %v7804_v58  ;;  %v7807_v29 = vld [vmem:[#allocation99_spill] sm:$0xff] }
 0x228   : > { %v1448_v54 = vadd.f32 %v1443_v8, %v1412_v40 }
 0x22a   : > { %1999 = vrot.lane.b32.xlu1 %v7802_v5, %s3747_s22  ;;  %1997 = vrot.lane.b32.xlu0 %v7803_v26, %s3747_s22  ;;  %v1483_v23 = vadd.f32 %v5351_v32, %v1448_v54  ;;  %v1436_v5 = vadd.f32 %v1431_v37, %v1400_v36  ;;  %v7806_v32 = vrot.slane %v5295_v1, 2  ;;  %v7809_v36 = vld [vmem:[#allocation90_spill] sm:$0xff]  ;;  %v7810_v37 = vld [vmem:[#allocation60_spill] sm:$0xff] }
 0x22b   : > { %v5841_v33 = vpop.permute.xlu1 %1456  ;;  %v1455_v38 = vpop.permute.xlu0 %1454  ;;  %v2063_v1 = vmul.f32 %v5362_v42, %v7810_v37 }
 0x22c   : > { %v1460_v13 = vadd.f32 %v1455_v38, %v1424_v21  ;;  %v2062_v21 = vmul.f32 %v5369_v2, %v7810_v37 }
 0x22e   : > { %2014 = vrot.lane.b32.xlu1 %v7805_v47, %s3748_s29  ;;  %2012 = vrot.lane.b32.xlu0 %v5328_v9, %s3748_s29  ;;  %v1494_v3 = vadd.f32 %v5374_v24, %v1460_v13  ;;  %v7808_v9 = vrot.slane %v5323_v52, 2  ;;  %v7811_v52 = vld [vmem:[#allocation62_spill] sm:$0xff] }
 0x22f   : > { %v5850_v57 = vpop.permute.xlu1 %1468  ;;  %v1467_v40 = vpop.permute.xlu0 %1466  ;;  %v2075_v38 = vmul.f32 %v5362_v42, %v7811_v52  ;;  %v2074_v47 = vmul.f32 %v5369_v2, %v7811_v52 }
 0x230   : > { %v1472_v8 = vadd.f32 %v1467_v40, %v1436_v5 }
 0x232   : > { %2029 = vrot.lane.b32.xlu1 %v7806_v32, %s3748_s29  ;;  %2027 = vrot.lane.b32.xlu0 %v7807_v29, %s3748_s29  ;;  %v1505_v61 = vadd.f32 %v5385_v17, %v1472_v8  ;;  %v7812_v8 = vld [vmem:[#allocation63_spill] sm:$0xff] }
 0x233   : > { %v1517_v62 = vpop.permute.xlu1 %1516  ;;  %v1515_v54 = vpop.permute.xlu0 %1514  ;;  %v2087_v32 = vmul.f32 %v5362_v42, %v7812_v8  ;;  %v7813_v29 = vld [vmem:[#allocation79_spill] sm:$0xff] }
 0x234   : > { %v1520_v5 = vadd.f32 %v1515_v54, %v1483_v23 }
 0x236   : > { %2044 = vrot.lane.b32.xlu1 %v7808_v9, %s3748_s29  ;;  %2042 = vrot.lane.b32.xlu0 %v7809_v36, %s3748_s29  ;;  %v1391_v9 = vmul.f32 %v7813_v29, %v7792_v7  ;;  %v1395_v7 = vmul.f32 %v7813_v29, %v7795_v15  ;;  %v1399_v15 = vmul.f32 %v7813_v29, %v7800_v45 }
 0x237   : > { %v1530_v26 = vpop.permute.xlu0 %1529 }
 0x238   : > { %v5864_v24 = vpop.permute.xlu1 %1531  ;;  %v1393_v37 = vadd.f32 %v1391_v9, %v7794_v11  ;;  %v7816_v9 = vld [vmem:[#allocation110_spill] sm:$0xff]  ;;  %v1401_v29 = vadd.f32 %v1399_v15, %v7804_v58 }
 0x239   : > { %v7820_v15 = vld [vmem:[#allocation86_spill] sm:$0xff] }
 0x23a   : > { %2068 = vrot.lane.b32.xlu1 %v2063_v1, %s3747_s22  ;;  %2066 = vrot.lane.b32.xlu0 %v2062_v21, %s3747_s22  ;;  %v2086_v1 = vmul.f32 %v5369_v2, %v7812_v8  ;;  %v1397_v8 = vadd.f32 %v1395_v7, %v7799_v10 }
 0x23b   : > { %v1545_v13 = vpop.permute.xlu0 %1544 }
 0x23c   : > { %v5872_v17 = vpop.permute.xlu1 %1546 }
 0x23e   : > { %2080 = vrot.lane.b32.xlu1 %v2075_v38, %s3747_s22  ;;  %2078 = vrot.lane.b32.xlu0 %v2074_v47, %s3747_s22  ;;  %v1535_v38 = vadd.f32 %v1530_v26, %v1494_v3  ;;  %v7814_v47 = vld [vmem:[#allocation64_spill] sm:$0xff]  ;;  %v1413_v3 = vadd.f32 %v5805_v48, %v1393_v37  ;;  %v1550_v26 = vadd.f32 %v1545_v13, %v1505_v61 }
 0x23f   : > { %v1560_v36 = vpop.permute.xlu0 %1559  ;;  %v2099_v23 = vmul.f32 %v5362_v42, %v7814_v47  ;;  %v1425_v61 = vadd.f32 %v5812_v16, %v1397_v8  ;;  %v1437_v16 = vadd.f32 %v5821_v31, %v1401_v29 }
 0x240   : > { %v1562_v40 = vpop.permute.xlu1 %1561  ;;  %v1565_v21 = vadd.f32 %v1560_v36, %v1520_v5  ;;  %v2098_v5 = vmul.f32 %v5369_v2, %v7814_v47  ;;  %v7936_v47 = vld [vmem:[#allocation34_spill] sm:$0xff] }
 0x242   : > { %2092 = vrot.lane.b32.xlu1 %v2087_v32, %s3747_s22  ;;  %2090 = vrot.lane.b32.xlu0 %v2086_v1, %s3747_s22  ;;  %v1606_v54 = vadd.f32 %v5422_v14, %v1565_v21  ;;  %v7815_v1 = vld [vmem:[#allocation65_spill] sm:$0xff] }
 0x243   : > { %v1575_v28 = vpop.permute.xlu0 %1574  ;;  %v2111_v14 = vmul.f32 %v5362_v42, %v7815_v1  ;;  %v2110_v48 = vmul.f32 %v5369_v2, %v7815_v1 }
 0x244   : > { %v1577_v52 = vpop.permute.xlu1 %1576  ;;  %v1580_v36 = vadd.f32 %v1575_v28, %v1535_v38  ;;  %v1449_v28 = vadd.f32 %v5831_v12, %v1413_v3  ;;  %v1461_v12 = vadd.f32 %v5841_v33, %v1425_v61 }
 0x246   : > { %2104 = vrot.lane.b32.xlu1 %v2099_v23, %s3748_s29  ;;  %2102 = vrot.lane.b32.xlu0 %v2098_v5, %s3748_s29  ;;  %v1617_v21 = vadd.f32 %v7816_v9, %v1580_v36  ;;  %v7817_v23 = vld [vmem:[#allocation67_spill] sm:$0xff]  ;;  %v7818_v36 = vld [vmem:[#allocation94_spill] sm:$0xff] }
 0x247   : > { %v1590_v38 = vpop.permute.xlu0 %1589  ;;  %v2123_v7 = vmul.f32 %v5362_v42, %v7817_v23  ;;  %v7819_v3 = vrot.slane %v7818_v36, 1 }
 0x248   : > { %v1592_v32 = vpop.permute.xlu1 %1591  ;;  %v1595_v37 = vadd.f32 %v1590_v38, %v1550_v26 }
 0x249   : > { %v1484_v9 = vadd.f32 %v7819_v3, %v1449_v28  ;;  %v7822_v28 = vld [vmem:[#allocation97_spill] sm:$0xff] }
 0x24a   : > { %2116 = vrot.lane.b32.xlu1 %v2111_v14, %s3748_s29  ;;  %2114 = vrot.lane.b32.xlu0 %v2110_v48, %s3748_s29  ;;  %v1628_v5 = vadd.f32 %v5458_v43, %v1595_v37  ;;  %v2122_v14 = vmul.f32 %v5369_v2, %v7817_v23  ;;  %v1473_v43 = vadd.f32 %v5850_v57, %v1437_v16  ;;  %v7821_v48 = vrot.slane %v7820_v15, 1  ;;  %v7827_v57 = vld [vmem:[#allocation91_spill] sm:$0xff] }
 0x24b   : > { %v1638_v26 = vpop.permute.xlu0 %1637  ;;  %v1521_v8 = vadd.f32 %v1517_v62, %v1484_v9  ;;  %v7823_v36 = vrot.slane %v7822_v28, 1  ;;  %v7825_v62 = vld [vmem:[#allocation87_spill] sm:$0xff]  ;;  %v7828_v16 = vrot.slane %v7827_v57, 2 }
 0x24c   : > { %v1640_v13 = vpop.permute.xlu1 %1639  ;;  %v1495_v33 = vadd.f32 %v7821_v48, %v1461_v12  ;;  %v7826_v29 = vrot.slane %v7825_v62, 1 }
 0x24d   : > { %v1566_v37 = vadd.f32 %v1562_v40, %v1521_v8  ;;  %v7829_v40 = vrot.slane %v5427_v25, 1  ;;  %v7833_v25 = vld [vmem:[#allocation111_spill] sm:$0xff] }
 0x24e   : > { %2128 = vrot.lane.b32.xlu1 %v2123_v7, %s3748_s29  ;;  %2126 = vrot.lane.b32.xlu0 %v2122_v14, %s3748_s29  ;;  %v1536_v3 = vadd.f32 %v5864_v24, %v1495_v33  ;;  %v7824_v7 = vld [vmem:[#allocation112_spill] sm:$0xff]  ;;  %v1506_v9 = vadd.f32 %v7826_v29, %v1473_v43  ;;  %v1643_v24 = vadd.f32 %v1638_v26, %v1606_v54  ;;  %v7834_v57 = vrot.slane %v7833_v25, 1  ;;  %v7835_v54 = vld [vmem:[#allocation115_spill] sm:$0xff]  ;;  %v7842_v25 = vld [vmem:[#allocation106_spill] sm:$0xff] }
 0x24f   : > { %v1653_v61 = vpop.permute.xlu0 %1652  ;;  %v1607_v15 = vadd.f32 %v7828_v16, %v1566_v37  ;;  %v7832_v37 = vld [vmem:[#allocation100_spill] sm:$0xff] }
 0x250   : > { %v1655_v38 = vpop.permute.xlu1 %1654  ;;  %v1581_v14 = vadd.f32 %v1577_v52, %v1536_v3  ;;  %v1551_v8 = vadd.f32 %v5872_v17, %v1506_v9  ;;  %v1721_v62 = vmul.f32 %v5123_v18, %v7832_v37  ;;  %v1720_v17 = vmul.f32 %v5133_v22, %v7832_v37 }
 0x251   : > { %v1644_v48 = vadd.f32 %v1640_v13, %v1607_v15  ;;  %v1658_v13 = vadd.f32 %v1653_v61, %v1617_v21  ;;  %v7841_v21 = vld [vmem:[#allocation117_spill] sm:$0xff] }
 0x252   : > { %2176 = vrot.lane.b32.xlu1 %v7823_v36, %s3747_s22  ;;  %2174 = vrot.lane.b32.xlu0 %v7824_v7, %s3747_s22  ;;  %v1596_v28 = vadd.f32 %v1592_v32, %v1551_v8  ;;  %v7830_v36 = vld [vmem:[#allocation96_spill] sm:$0xff] }
 0x253   : > { %v1668_v12 = vpop.permute.xlu0 %1667  ;;  %v7831_v43 = vrot.slane %v7830_v36, 2  ;;  %v7839_v36 = vld [vmem:[#allocation113_spill] sm:$0xff] }
 0x254   : > { %v1670_v31 = vpop.permute.xlu1 %1669 }
 0x255   : > { %v1618_v52 = vadd.f32 %v7831_v43, %v1581_v14  ;;  %v7836_v14 = vld [vmem:[#allocation109_spill] sm:$0xff]  ;;  %v7840_v43 = vrot.slane %v7839_v36, 1 }
 0x256   : > { %2191 = vrot.lane.b32.xlu1 %v7829_v40, %s3747_s22  ;;  %2189 = vrot.lane.b32.xlu0 %v5475_v49, %s3747_s22  ;;  %v7837_v16 = vrot.slane %v7836_v14, 2 }
 0x257   : > { %v1683_v7 = vpop.permute.xlu0 %1682  ;;  %v1659_v49 = vadd.f32 %v1655_v38, %v1618_v52 }
 0x258   : > { %v1685_v33 = vpop.permute.xlu1 %1684  ;;  %v1688_v29 = vadd.f32 %v1683_v7, %v1643_v24  ;;  %v1629_v15 = vadd.f32 %v7837_v16, %v1596_v28  ;;  %v7846_v16 = vld [vmem:[#allocation116_spill] sm:$0xff] }
 0x259   : > { %v1689_v3 = vadd.f32 %v1685_v33, %v1644_v48  ;;  %v7838_v48 = vld [vmem:[#allocation102_spill] sm:$0xff] }
 0x25a   : > { %2206 = vrot.lane.b32.xlu1 %v7834_v57, %s3747_s22  ;;  %2204 = vrot.lane.b32.xlu0 %v7835_v54, %s3747_s22  ;;  %v1722_v9 = vadd.f32 %v1720_v17, %v1688_v29  ;;  %v1725_v24 = vmul.f32 %v5123_v18, %v7838_v48  ;;  %v1724_v38 = vmul.f32 %v5133_v22, %v7838_v48 }
 0x25b   : > { %v1723_v32 = vadd.f32 %v1721_v62, %v1689_v3  ;;  %v1698_v8 = vpop.permute.xlu0 %1697  ;;  %v1674_v52 = vadd.f32 %v1670_v31, %v1629_v15  ;;  %v1673_v3 = vadd.f32 %v1668_v12, %v1628_v5  ;;  %v1729_v57 = vmul.f32 %v5123_v18, %v7842_v25  ;;  %v7848_v18 = vld [vmem:[#allocation121_spill] sm:$0xff] }
 0x25c   : > { %v1700_v26 = vpop.permute.xlu1 %1699  ;;  %v1703_v33 = vadd.f32 %v1698_v8, %v1658_v13  ;;  %v1728_v31 = vmul.f32 %v5133_v22, %v7842_v25  ;;  %v7845_v13 = vld [vmem:[#allocation118_spill] sm:$0xff]  ;;  %v7847_v15 = vrot.slane %v7846_v16, 1 }
 0x25d   : > { %v1704_v40 = vadd.f32 %v1700_v26, %v1659_v49  ;;  %v7843_v49 = vld [vmem:[#allocation114_spill] sm:$0xff] }
 0x25e   : > { %2221 = vrot.lane.b32.xlu1 %v7840_v43, %s3748_s29  ;;  %2219 = vrot.lane.b32.xlu0 %v7841_v21, %s3748_s29  ;;  %v1726_v7 = vadd.f32 %v1724_v38, %v1703_v33  ;;  %v7844_v54 = vrot.slane %v7843_v49, 1  ;;  %v7851_v43 = vrot.slane %v5519_v35, 2  ;;  %v7854_v35 = vrot.slane %v5567_v63, 1 }
 0x25f   : > { %v1727_v61 = vadd.f32 %v1725_v24, %v1704_v40  ;;  %v1713_v29 = vpop.permute.xlu0 %1712  ;;  %v7849_v24 = vld [vmem:[#allocation119_spill] sm:$0xff] }
 0x260   : > { %v1715_v28 = vpop.permute.xlu1 %1714  ;;  %v1718_v17 = vadd.f32 %v1713_v29, %v1673_v3  ;;  %v7850_v33 = vrot.slane %v7849_v24, 2  ;;  %v7852_v29 = vld [vmem:[#allocation120_spill] sm:$0xff]  ;;  %v7862_v24 = vld [vmem:[#allocation125_spill] sm:$0xff] }
 0x261   : > { %v1719_v62 = vadd.f32 %v1715_v28, %v1674_v52 }
 0x262   : > { %2236 = vrot.lane.b32.xlu1 %v7844_v54, %s3748_s29  ;;  %2234 = vrot.lane.b32.xlu0 %v7845_v13, %s3748_s29  ;;  %v1730_v12 = vadd.f32 %v1728_v31, %v1718_v17  ;;  %v7855_v13 = vrot.slane %v5541_v59, 2  ;;  %v7858_v59 = vld [vmem:[#allocation123_spill] sm:$0xff] }
 0x263   : > { %v1731_v26 = vadd.f32 %v1729_v57, %v1719_v62  ;;  %v1737_v14 = vpop.permute.xlu0 %1736  ;;  %v7853_v57 = vrot.slane %v7852_v29, 2 }
 0x264   : > { %v1739_v5 = vpop.permute.xlu1 %1738  ;;  %v1742_v52 = vadd.f32 %v1737_v14, %v1722_v9 }
 0x265   : > { %v1743_v38 = vadd.f32 %v1739_v5, %v1723_v32 }
 0x266   : > { %2251 = vrot.lane.b32.xlu1 %v7847_v15, %s3748_s29  ;;  %2249 = vrot.lane.b32.xlu0 %v7848_v18, %s3748_s29  ;;  %v7857_v18 = vrot.slane %v5556_v30, 2 }
 0x267   : > { %v1749_v8 = vpop.permute.xlu0 %1748 }
 0x268   : > { %v1751_v40 = vpop.permute.xlu1 %1750  ;;  %v1754_v32 = vadd.f32 %v1749_v8, %v1726_v7  ;;  %v7860_v8 = vld [vmem:[#allocation122_spill] sm:$0xff] }
 0x26a   : > { %2299 = vrot.lane.b32.xlu1 %v7850_v33, %s3747_s22  ;;  %2297 = vrot.lane.b32.xlu0 %v5548_v56, %s3747_s22  ;;  %v1755_v56 = vadd.f32 %v1751_v40, %v1727_v61 }
 0x26c   : > { %v1763_v22 = vpop.permute.xlu1 %1762  ;;  %v1761_v36 = vpop.permute.xlu0 %1760 }
 0x26d   : > { %v1767_v5 = vadd.f32 %v1763_v22, %v1731_v26  ;;  %v1766_v63 = vadd.f32 %v1761_v36, %v1730_v12  ;;  %v7859_v26 = vrot.slane %v5613_v46, 1 }
 0x26e   : > { %2314 = vrot.lane.b32.xlu1 %v7851_v43, %s3747_s22  ;;  %2312 = vrot.lane.b32.xlu0 %v5563_v6, %s3747_s22 }
 0x270   : > { %v1775_v21 = vpop.permute.xlu1 %1774  ;;  %v1773_v28 = vpop.permute.xlu0 %1772 }
 0x271   : > { %v1779_v3 = vadd.f32 %v1775_v21, %v1743_v38  ;;  %v1778_v62 = vadd.f32 %v1773_v28, %v1742_v52 }
 0x272   : > { %2329 = vrot.lane.b32.xlu1 %v7853_v57, %s3747_s22  ;;  %2327 = vrot.lane.b32.xlu0 %v5577_v39, %s3747_s22  ;;  %v7856_v39 = vrot.slane %v5602_v60, 1 }
 0x273   : > { %v1814_v17 = vadd.f32 %v7854_v35, %v1779_v3  ;;  %v1813_v6 = vadd.f32 %v5609_v0, %v1778_v62  ;;  %v7865_v35 = vld [vmem:[#allocation128_spill] sm:$0xff] }
 0x274   : > { %v1787_v49 = vpop.permute.xlu1 %1786  ;;  %v1785_v54 = vpop.permute.xlu0 %1784 }
 0x275   : > { %v1791_v9 = vadd.f32 %v1787_v49, %v1755_v56  ;;  %v1790_v31 = vadd.f32 %v1785_v54, %v1754_v32 }
 0x276   : > { %2344 = vrot.lane.b32.xlu1 %v7855_v13, %s3748_s29  ;;  %2342 = vrot.lane.b32.xlu0 %v5589_v53, %s3748_s29  ;;  %v7866_v13 = vld [vmem:[#allocation126_spill] sm:$0xff] }
 0x277   : > { %v1825_v61 = vadd.f32 %v7856_v39, %v1791_v9  ;;  %v1824_v7 = vadd.f32 %v5642_v44, %v1790_v31  ;;  %v7861_v44 = vrot.slane %v7860_v8, 2 }
 0x278   : > { %v1799_v14 = vpop.permute.xlu1 %1798  ;;  %v1797_v0 = vpop.permute.xlu0 %1796 }
 0x279   : > { %v1803_v16 = vadd.f32 %v1799_v14, %v1767_v5  ;;  %v1802_v15 = vadd.f32 %v1797_v0, %v1766_v63  ;;  %v7867_v5 = vrot.slane %v7866_v13, 2  ;;  %v7868_v63 = vld [vmem:[#allocation129_spill] sm:$0xff] }
 0x27a   : > { %2359 = vrot.lane.b32.xlu1 %v7857_v18, %s3748_s29  ;;  %2357 = vrot.lane.b32.xlu0 %v7858_v59, %s3748_s29 }
 0x27b   : > { %v1836_v53 = vadd.f32 %v7859_v26, %v1803_v16  ;;  %v1835_v60 = vadd.f32 %v5650_v19, %v1802_v15  ;;  %v7863_v19 = vld [vmem:[#allocation124_spill] sm:$0xff]  ;;  %v7869_v15 = vld [vmem:[#allocation127_spill] sm:$0xff]  ;;  %v7871_v26 = vld [vmem:[#allocation130_spill] sm:$0xff] }
 0x27c   : > { %v1847_v40 = vpop.permute.xlu1 %1846  ;;  %v1845_v12 = vpop.permute.xlu0 %1844  ;;  %v7864_v62 = vrot.slane %v7863_v19, 2  ;;  %v7870_v18 = vrot.slane %v7869_v15, 2 }
 0x27d   : > { %v1851_v43 = vadd.f32 %v1847_v40, %v1814_v17  ;;  %v1850_v38 = vadd.f32 %v1845_v12, %v1813_v6 }
 0x27e   : > { %2374 = vrot.lane.b32.xlu1 %v7861_v44, %s3748_s29  ;;  %2372 = vrot.lane.b32.xlu0 %v7862_v24, %s3748_s29 }
 0x280   : > { %v1862_v33 = vpop.permute.xlu1 %1861  ;;  %v1860_v30 = vpop.permute.xlu0 %1859 }
 0x281   : > { %v1866_v28 = vadd.f32 %v1862_v33, %v1825_v61  ;;  %v1865_v57 = vadd.f32 %v1860_v30, %v1824_v7 }
 0x284   : > { %v1877_v22 = vpop.permute.xlu1 %1876  ;;  %v1875_v36 = vpop.permute.xlu0 %1874 }
 0x285   : > { %v1881_v31 = vadd.f32 %v1877_v22, %v1836_v53  ;;  %v1880_v6 = vadd.f32 %v1875_v36, %v1835_v60 }
 0x288   : > { %v1892_v52 = vpop.permute.xlu1 %1891  ;;  %v1890_v21 = vpop.permute.xlu0 %1889 }
 0x289   : > { %v1896_v46 = vadd.f32 %v1892_v52, %v1851_v43  ;;  %v1895_v3 = vadd.f32 %v1890_v21, %v1850_v38  ;;  %v7872_v43 = vld [vmem:[#allocation74_spill] sm:$0xff] }
 0x28a   : > { %v2051_v38 = vmul.f32 %v5362_v42, %v7872_v43 }
 0x28b   : > { %v1937_v29 = vadd.f32 %v7864_v62, %v1896_v46  ;;  %v1936_v32 = vadd.f32 %v7865_v35, %v1895_v3  ;;  %v2050_v46 = vmul.f32 %v5369_v2, %v7872_v43  ;;  %v7873_v35 = vld [vmem:[#allocation85_spill] sm:$0xff] }
 0x28c   : > { %v1907_v56 = vpop.permute.xlu1 %1906  ;;  %v1905_v9 = vpop.permute.xlu0 %1904 }
 0x28d   : > { %v1911_v49 = vadd.f32 %v1907_v56, %v1866_v28  ;;  %v1910_v54 = vadd.f32 %v1905_v9, %v1865_v57 }
 0x28f   : > { %v1948_v17 = vadd.f32 %v7867_v5, %v1911_v49  ;;  %v1947_v14 = vadd.f32 %v7868_v63, %v1910_v54  ;;  %v2054_v49 = vmul.f32 %v5369_v2, %v7873_v35 }
 0x290   : > { %v1922_v39 = vpop.permute.xlu1 %1921  ;;  %v1920_v61 = vpop.permute.xlu0 %1919 }
 0x291   : > { %v1926_v16 = vadd.f32 %v1922_v39, %v1881_v31  ;;  %v1925_v0 = vadd.f32 %v1920_v61, %v1880_v6  ;;  %v7874_v39 = vld [vmem:[#allocation89_spill] sm:$0xff] }
 0x292   : > { %v2059_v63 = vmul.f32 %v5362_v42, %v7874_v39 }
 0x293   : > { %v1959_v7 = vadd.f32 %v7870_v18, %v1926_v16  ;;  %v1958_v40 = vadd.f32 %v7871_v26, %v1925_v0  ;;  %v2058_v16 = vmul.f32 %v5369_v2, %v7874_v39 }
 0x294   : > { %v1970_v59 = vpop.permute.xlu1 %1969  ;;  %v1968_v12 = vpop.permute.xlu0 %1967 }
 0x295   : > { %v1974_v33 = vadd.f32 %v1970_v59, %v1937_v29  ;;  %v1973_v30 = vadd.f32 %v1968_v12, %v1936_v32  ;;  %v2055_v29 = vmul.f32 %v5362_v42, %v7873_v35  ;;  %v7875_v42 = vrot.slane %v5683_v55, 1 }
 0x296   : > { %v7877_v55 = vrot.slane %v5702_v41, 1 }
 0x298   : > { %v1985_v8 = vpop.permute.xlu1 %1984  ;;  %v1983_v44 = vpop.permute.xlu0 %1982 }
 0x299   : > { %v1989_v21 = vadd.f32 %v1985_v8, %v1948_v17  ;;  %v1988_v28 = vadd.f32 %v1983_v44, %v1947_v14 }
 0x29c   : > { %v2000_v53 = vpop.permute.xlu1 %1999  ;;  %v1998_v24 = vpop.permute.xlu0 %1997 }
 0x29d   : > { %v2004_v9 = vadd.f32 %v2000_v53, %v1959_v7  ;;  %v2003_v31 = vadd.f32 %v1998_v24, %v1958_v40 }
 0x2a0   : > { %v2015_v60 = vpop.permute.xlu1 %2014  ;;  %v2013_v36 = vpop.permute.xlu0 %2012 }
 0x2a1   : > { %v2019_v22 = vadd.f32 %v2015_v60, %v1974_v33  ;;  %v2018_v52 = vadd.f32 %v2013_v36, %v1973_v30 }
 0x2a3   : > { %v2053_v3 = vadd.f32 %v2051_v38, %v2019_v22  ;;  %v2052_v62 = vadd.f32 %v2050_v46, %v2018_v52 }
 0x2a4   : > { %v2030_v19 = vpop.permute.xlu1 %2029  ;;  %v2028_v56 = vpop.permute.xlu0 %2027 }
 0x2a5   : > { %v2034_v57 = vadd.f32 %v2030_v19, %v1989_v21  ;;  %v2033_v32 = vadd.f32 %v2028_v56, %v1988_v28  ;;  %v7876_v28 = vrot.slane %v5694_v27, 1 }
 0x2a7   : > { %v2057_v54 = vadd.f32 %v2055_v29, %v2034_v57  ;;  %v2056_v5 = vadd.f32 %v2054_v49, %v2033_v32 }
 0x2a8   : > { %v2045_v13 = vpop.permute.xlu1 %2044  ;;  %v2043_v17 = vpop.permute.xlu0 %2042 }
 0x2a9   : > { %v2049_v6 = vadd.f32 %v2045_v13, %v2004_v9  ;;  %v2048_v14 = vadd.f32 %v2043_v17, %v2003_v31 }
 0x2ab   : > { %v2061_v61 = vadd.f32 %v2059_v63, %v2049_v6  ;;  %v2060_v15 = vadd.f32 %v2058_v16, %v2048_v14 }
 0x2ac   : > { %v2069_v0 = vpop.permute.xlu1 %2068  ;;  %v2067_v18 = vpop.permute.xlu0 %2066 }
 0x2ad   : > { %v2073_v40 = vadd.f32 %v2069_v0, %v2053_v3  ;;  %v2072_v8 = vadd.f32 %v2067_v18, %v2052_v62 }
 0x2b0   : > { %v2081_v59 = vpop.permute.xlu1 %2080  ;;  %v2079_v26 = vpop.permute.xlu0 %2078 }
 0x2b1   : > { %v2085_v30 = vadd.f32 %v2081_v59, %v2057_v54  ;;  %v2084_v22 = vadd.f32 %v2079_v26, %v2056_v5  ;;  %v7878_v54 = vld [vmem:[#allocation131_spill] sm:$0xff] }
 0x2b4   : > { %v2093_v7 = vpop.permute.xlu1 %2092  ;;  %v2091_v12 = vpop.permute.xlu0 %2090 }
 0x2b5   : > { %v2097_v21 = vadd.f32 %v2093_v7, %v2061_v61  ;;  %v2096_v19 = vadd.f32 %v2091_v12, %v2060_v15  ;;  %v7879_v15 = vrot.slane %v5708_v34, 2  ;;  %v7882_v34 = vld [vmem:[#allocation132_spill] sm:$0xff] }
 0x2b8   : > { %v2105_v44 = vpop.permute.xlu1 %2104  ;;  %v2103_v24 = vpop.permute.xlu0 %2102 }
 0x2b9   : > { %v2109_v53 = vadd.f32 %v2105_v44, %v2073_v40  ;;  %v2108_v33 = vadd.f32 %v2103_v24, %v2072_v8  ;;  %v7880_v44 = vrot.slane %v5718_v20, 2 }
 0x2bb   : > { %v2144_v60 = vadd.f32 %v7875_v42, %v2109_v53  ;;  %v2143_v36 = vadd.f32 %v5723_v51, %v2108_v33 }
 0x2bc   : > { %v2117_v2 = vpop.permute.xlu1 %2116  ;;  %v2115_v52 = vpop.permute.xlu0 %2114 }
 0x2bd   : > { %v2121_v38 = vadd.f32 %v2117_v2, %v2085_v30  ;;  %v2120_v46 = vadd.f32 %v2115_v52, %v2084_v22  ;;  %v7881_v30 = vld [vmem:[#allocation133_spill] sm:$0xff] }
 0x2bf   : > { %v2155_v3 = vadd.f32 %v7876_v28, %v2121_v38  ;;  %v2154_v57 = vadd.f32 %v5728_v4, %v2120_v46 }
 0x2c0   : > { %v2129_v62 = vpop.permute.xlu1 %2128  ;;  %v2127_v29 = vpop.permute.xlu0 %2126 }
 0x2c1   : > { %v2133_v56 = vadd.f32 %v2129_v62, %v2097_v21  ;;  %v2132_v32 = vadd.f32 %v2127_v29, %v2096_v19 }
 0x2c3   : > { %v2166_v49 = vadd.f32 %v7877_v55, %v2133_v56  ;;  %v2165_v51 = vadd.f32 %v7878_v54, %v2132_v32 }
 0x2c4   : > { %v2177_v9 = vpop.permute.xlu1 %2176  ;;  %v2175_v31 = vpop.permute.xlu0 %2174 }
 0x2c5   : > { %v2181_v27 = vadd.f32 %v2177_v9, %v2144_v60  ;;  %v2180_v63 = vadd.f32 %v2175_v31, %v2143_v36  ;;  %v7883_v36 = vrot.slane %v7882_v34, 2 }
 0x2c8   : > { %v2192_v13 = vpop.permute.xlu1 %2191  ;;  %v2190_v5 = vpop.permute.xlu0 %2189 }
 0x2c9   : > { %v2196_v0 = vadd.f32 %v2192_v13, %v2155_v3  ;;  %v2195_v41 = vadd.f32 %v2190_v5, %v2154_v57  ;;  %v7885_v13 = vld [vmem:[#allocation12_spill] sm:$0xff] }
 0x2cc   : > { %v2207_v6 = vpop.permute.xlu1 %2206  ;;  %v2205_v17 = vpop.permute.xlu0 %2204 }
 0x2cd   : > { %v2211_v8 = vadd.f32 %v2207_v6, %v2166_v49  ;;  %v2210_v24 = vadd.f32 %v2205_v17, %v2165_v51 }
 0x2d0   : > { %v2222_v14 = vpop.permute.xlu1 %2221  ;;  %v2220_v61 = vpop.permute.xlu0 %2219 }
 0x2d1   : > { %v2226_v16 = vadd.f32 %v2222_v14, %v2181_v27  ;;  %v2225_v4 = vadd.f32 %v2220_v61, %v2180_v63  ;;  %v7886_v63 = vld [vmem:[#allocation11_spill] sm:$0xff] }
 0x2d3   : > { %v2267_v18 = vadd.f32 %v7879_v15, %v2226_v16  ;;  %v2266_v26 = vadd.f32 %v5749_v50, %v2225_v4  ;;  %v7884_v50 = vld [vmem:[#allocation134_spill] sm:$0xff]  ;;  %v7887_v4 = vld [vmem:[#allocation13_spill] sm:$0xff] }
 0x2d4   : > { %v2237_v59 = vpop.permute.xlu1 %2236  ;;  %v2235_v12 = vpop.permute.xlu0 %2234 }
 0x2d5   : > { %v2241_v7 = vadd.f32 %v2237_v59, %v2196_v0  ;;  %v2240_v40 = vadd.f32 %v2235_v12, %v2195_v41  ;;  %v7889_v59 = vld [vmem:[#allocation16_spill] sm:$0xff]  ;;  %v7890_v12 = vld [vmem:[#allocation18_spill] sm:$0xff] }
 0x2d7   : > { %v2278_v53 = vadd.f32 %v7880_v44, %v2241_v7  ;;  %v2277_v42 = vadd.f32 %v7881_v30, %v2240_v40  ;;  %v7892_v30 = vld [vmem:[#allocation15_spill] sm:$0xff] }
 0x2d8   : > { %v2252_v33 = vpop.permute.xlu1 %2251  ;;  %v2250_v22 = vpop.permute.xlu0 %2249 }
 0x2d9   : > { %v2256_v60 = vadd.f32 %v2252_v33, %v2211_v8  ;;  %v2255_v2 = vadd.f32 %v2250_v22, %v2210_v24 }
 0x2db   : > { %v6055_v38 = vadd.f32 %v7883_v36, %v2256_v60  ;;  %v6058_v46 = vadd.f32 %v7884_v50, %v2255_v2 }
 0x2dc   : > { %v2300_v52 = vpop.permute.xlu1 %2299  ;;  %v2298_v21 = vpop.permute.xlu0 %2297 }
 0x2dd   : > { %v2304_v62 = vadd.f32 %v2300_v52, %v2267_v18  ;;  %v2303_v57 = vadd.f32 %v2298_v21, %v2266_v26  ;;  %v7888_v18 = vld [vmem:[#allocation14_spill] sm:$0xff] }
 0x2e0   : > { %v2315_v28 = vpop.permute.xlu1 %2314  ;;  %v2313_v3 = vpop.permute.xlu0 %2312 }
 0x2e1   : > { %v2319_v51 = vadd.f32 %v2315_v28, %v2278_v53  ;;  %v2318_v6 = vadd.f32 %v2313_v3, %v2277_v42  ;;  %v7891_v53 = vld [vmem:[#allocation19_spill] sm:$0xff]  ;;  %v7893_v28 = vld [vmem:[#allocation20_spill] sm:$0xff] }
 0x2e4   : > { %v6060_v20 = vpop.permute.xlu1 %2329  ;;  %v6062_v19 = vpop.permute.xlu0 %2327 }
 0x2e8   : > { %v2345_v56 = vpop.permute.xlu1 %2344  ;;  %v2343_v32 = vpop.permute.xlu0 %2342 }
 0x2e9   : > { %v2349_v29 = vadd.f32 %v2345_v56, %v2304_v62  ;;  %v2348_v55 = vadd.f32 %v2343_v32, %v2303_v57  ;;  %v7894_v57 = vld [vmem:[#allocation21_spill] sm:$0xff] }
 0x2eb   : > { %v6064_v49 = vmax.f32 %v2349_v29, 0.0  ;;  %v6066_v9 = vmax.f32 %v2348_v55, 0.0 }
 0x2ec   : > { %v2360_v54 = vpop.permute.xlu1 %2359  ;;  %v2358_v31 = vpop.permute.xlu0 %2357 }
 0x2ed   : > { %v2399_v5 = vmul.f32 %v6064_v49, %v7885_v13  ;;  %v2398_v17 = vmul.f32 %v6066_v9, %v7885_v13  ;;  %v6072_v27 = vadd.f32 %v2360_v54, %v2319_v51  ;;  %v2411_v14 = vmul.f32 %v6064_v49, %v7886_v63  ;;  %v7895_v54 = vld [vmem:[#allocation22_spill] sm:$0xff] }
 0x2ee   : > { %v6077_v16 = vadd.f32 %v2358_v31, %v2318_v6  ;;  %v2410_v61 = vmul.f32 %v6066_v9, %v7886_v63  ;;  %v2423_v0 = vmul.f32 %v6064_v49, %v7887_v4  ;;  %v2422_v15 = vmul.f32 %v6066_v9, %v7887_v4 }
 0x2ef   : > { %2404 = vrot.lane.b32.xlu1 %v2399_v5, %s3747_s22  ;;  %2402 = vrot.lane.b32.xlu0 %v2398_v17, %s3747_s22  ;;  %v2435_v41 = vmul.f32 %v6064_v49, %v7888_v18  ;;  %v6090_v26 = vmul.f32 %v6064_v49, %v7889_v59  ;;  %v2503_v7 = vmul.f32 %v6066_v9, %v7889_v59  ;;  %v7897_v59 = vld [vmem:[#allocation24_spill] sm:$0xff] }
 0x2f0   : > { %v6096_v40 = vmul.f32 %v6064_v49, %v7890_v12  ;;  %v2434_v8 = vmul.f32 %v6066_v9, %v7888_v18  ;;  %v2518_v44 = vmul.f32 %v6066_v9, %v7890_v12  ;;  %v6104_v24 = vmul.f32 %v6064_v49, %v7891_v53 }
 0x2f1   : > { %v2533_v33 = vmul.f32 %v6066_v9, %v7891_v53  ;;  %v2447_v42 = vmul.f32 %v6064_v49, %v7892_v30  ;;  %v2508_v60 = vrot.slane %v6090_v26, 1  ;;  %v2507_v22 = vrot.slane %v2503_v7, 1  ;;  %v7907_v26 = vld [vmem:[#allocation45_spill] sm:$0xff] }
 0x2f2   : > { %v2523_v2 = vrot.slane %v6096_v40, 1  ;;  %v2446_v34 = vmul.f32 %v6066_v9, %v7892_v30  ;;  %v2522_v36 = vrot.slane %v2518_v44, 1  ;;  %v7453_v52 = vrot.slane %v6104_v24, 1 }
 0x2f3   : > { %2416 = vrot.lane.b32.xlu1 %v2411_v14, %s3747_s22  ;;  %2414 = vrot.lane.b32.xlu0 %v2410_v61, %s3747_s22  ;;  %v2537_v50 = vrot.slane %v2533_v33, 1  ;;  %v6120_v21 = vsel %vm409_vm0, %v2507_v22, %v2508_v60  ;;  %v6124_v3 = vmul.f32 %v6064_v49, %v7893_v28  ;;  %v2548_v62 = vmul.f32 %v6066_v9, %v7893_v28  ;;  %v7896_v14 = vld [vmem:[#allocation23_spill] sm:$0xff]  ;;  %v7898_v33 = vld [vmem:[#allocation25_spill] sm:$0xff] }
 0x2f4   : > { %v6130_v56 = vmul.f32 %v6064_v49, %v7894_v57  ;;  %v6135_v29 = vsel %vm409_vm0, %v2522_v36, %v2523_v2  ;;  %v2563_v55 = vmul.f32 %v6066_v9, %v7894_v57  ;;  %v6146_v51 = vmul.f32 %v6064_v49, %v7895_v54  ;;  %v7899_v57 = vld [vmem:[#allocation27_spill] sm:$0xff] }
 0x2f5   : > { %v6140_v32 = vsel %vm409_vm0, %v2537_v50, %v7453_v52  ;;  %v7452_v31 = vrot.slane %v6124_v3, 1  ;;  %v2552_v13 = vrot.slane %v2548_v62, 1  ;;  %v2578_v6 = vmul.f32 %v6066_v9, %v7895_v54 }
 0x2f6   : > { %v7451_v5 = vrot.slane %v6130_v56, 1  ;;  %v2567_v17 = vrot.slane %v2563_v55, 1  ;;  %v7450_v63 = vrot.slane %v6146_v51, 1  ;;  %v6157_v61 = vmul.f32 %v6064_v49, %v7896_v14 }
 0x2f7   : > { %2428 = vrot.lane.b32.xlu1 %v2423_v0, %s3747_s22  ;;  %2426 = vrot.lane.b32.xlu0 %v2422_v15, %s3747_s22  ;;  %v2626_v4 = vmul.f32 %v6066_v9, %v7896_v14  ;;  %v6164_v0 = vsel %vm409_vm0, %v2552_v13, %v7452_v31  ;;  %v2582_v18 = vrot.slane %v2578_v6, 1  ;;  %v6168_v7 = vmul.f32 %v6064_v49, %v7897_v59  ;;  %v7900_v6 = vld [vmem:[#allocation29_spill] sm:$0xff] }
 0x2f8   : > { %v2641_v15 = vmul.f32 %v6066_v9, %v7897_v59  ;;  %v6175_v12 = vsel %vm409_vm0, %v2567_v17, %v7451_v5  ;;  %v7449_v44 = vrot.slane %v6157_v61, 2  ;;  %v6180_v30 = vmul.f32 %v6064_v49, %v7898_v33  ;;  %v7901_v59 = vld [vmem:[#allocation31_spill] sm:$0xff] }
 0x2f9   : > { %v2630_v53 = vrot.slane %v2626_v4, 2  ;;  %v6186_v22 = vsel %vm409_vm0, %v2582_v18, %v7450_v63  ;;  %v7448_v36 = vrot.slane %v6168_v7, 2  ;;  %v2656_v28 = vmul.f32 %v6066_v9, %v7898_v33 }
 0x2fa   : > { %v2645_v50 = vrot.slane %v2641_v15, 2  ;;  %v6200_v55 = vmul.f32 %v6064_v49, %v7899_v57  ;;  %v2671_v54 = vmul.f32 %v6066_v9, %v7899_v57  ;;  %v6211_v17 = vmul.f32 %v6064_v49, %v7900_v6 }
 0x2fb   : > { %2440 = vrot.lane.b32.xlu1 %v2435_v41, %s3748_s29  ;;  %2438 = vrot.lane.b32.xlu0 %v2434_v8, %s3748_s29  ;;  %v6195_v62 = vsel %vm542_vm1, %v2630_v53, %v7449_v44  ;;  %v7447_v41 = vrot.slane %v6180_v30, 2  ;;  %v2660_v8 = vrot.slane %v2656_v28, 2  ;;  %v2686_v14 = vmul.f32 %v6066_v9, %v7900_v6 }
 0x2fc   : > { %v6207_v13 = vsel %vm542_vm1, %v2645_v50, %v7448_v36  ;;  %v7445_v4 = vrot.slane %v6200_v55, 2  ;;  %v2675_v18 = vrot.slane %v2671_v54, 2  ;;  %v6218_v15 = vmul.f32 %v6064_v49, %v7901_v59 }
 0x2fd   : > { %v2701_v53 = vmul.f32 %v6066_v9, %v7901_v59  ;;  %v6223_v33 = vmax.f32 %v6072_v27, 0.0  ;;  %v6229_v50 = vsel %vm542_vm1, %v2660_v8, %v7447_v41  ;;  %v7444_v28 = vrot.slane %v6211_v17, 2  ;;  %v7902_v59 = vld [vmem:[#allocation17_spill] sm:$0xff] }
 0x2fe   : > { %v2690_v57 = vrot.slane %v2686_v14, 2  ;;  %v6233_v54 = vmax.f32 %v6077_v16, 0.0  ;;  %v6239_v27 = vsel %vm542_vm1, %v2675_v18, %v7445_v4  ;;  %v2459_v8 = vmul.f32 %v6064_v49, %v7902_v59  ;;  %v7903_v18 = vld [vmem:[#allocation40_spill] sm:$0xff] }
 0x2ff   : > { %2452 = vrot.lane.b32.xlu1 %v2447_v42, %s3748_s29  ;;  %2450 = vrot.lane.b32.xlu0 %v2446_v34, %s3748_s29  ;;  %v7446_v42 = vrot.slane %v6218_v15, 2  ;;  %v2705_v6 = vrot.slane %v2701_v53, 2  ;;  %v2458_v16 = vmul.f32 %v6066_v9, %v7902_v59  ;;  %v6260_v53 = vmul.f32 %v6223_v33, %v7903_v18 }
 0x300   : > { %v6247_v14 = vsel %vm542_vm1, %v2690_v57, %v7444_v28  ;;  %v2833_v57 = vmul.f32 %v6233_v54, %v7903_v18  ;;  %v7904_v28 = vld [vmem:[#allocation42_spill] sm:$0xff]  ;;  %v2334_v40 = vadd.f32 %v6060_v20, %v6055_v38  ;;  %v7911_v38 = vrot.slane %v6104_v24, 1 }
 0x301   : > { %v6254_v34 = vsel %vm542_vm1, %v2705_v6, %v7446_v42  ;;  %v6266_v4 = vmul.f32 %v6223_v33, %v7904_v28  ;;  %v2848_v59 = vmul.f32 %v6233_v54, %v7904_v28  ;;  %v7905_v6 = vld [vmem:[#allocation43_spill] sm:$0xff]  ;;  %v7457_v36 = vrot.slane %v6260_v53, 1 }
 0x302   : > { %v6272_v42 = vmul.f32 %v6223_v33, %v7905_v6  ;;  %v2837_v44 = vrot.slane %v2833_v57, 1 }
 0x303   : > { %2464 = vrot.lane.b32.xlu1 %v2459_v8, %s3748_s29  ;;  %2462 = vrot.lane.b32.xlu0 %v2458_v16, %s3748_s29  ;;  %v2863_v8 = vmul.f32 %v6233_v54, %v7905_v6  ;;  %v7906_v16 = vld [vmem:[#allocation44_spill] sm:$0xff]  ;;  %v7454_v63 = vrot.slane %v6266_v4, 1  ;;  %v2852_v28 = vrot.slane %v2848_v59, 1 }
 0x304   : > { %v6278_v41 = vmul.f32 %v6223_v33, %v7906_v16  ;;  %v2878_v18 = vmul.f32 %v6233_v54, %v7906_v16  ;;  %v7456_v5 = vrot.slane %v6272_v42, 1  ;;  %v6294_v57 = vsel %vm409_vm0, %v2837_v44, %v7457_v36 }
 0x305   : > { %v2867_v6 = vrot.slane %v2863_v8, 1  ;;  %v6299_v59 = vsel %vm409_vm0, %v2852_v28, %v7454_v63  ;;  %v2893_v8 = vmul.f32 %v6233_v54, %v7907_v26  ;;  %v7908_v28 = vld [vmem:[#allocation46_spill] sm:$0xff] }
 0x306   : > { %v7455_v31 = vrot.slane %v6278_v41, 1  ;;  %v2882_v52 = vrot.slane %v2878_v18, 1  ;;  %v6320_v63 = vmul.f32 %v6223_v33, %v7908_v28 }
 0x307   : > { %2512 = vrot.lane.b32.xlu1 %v2508_v60, %s3747_s22  ;;  %2510 = vrot.lane.b32.xlu0 %v6120_v21, %s3747_s22  ;;  %v6303_v60 = vmul.f32 %v6223_v33, %v7907_v26  ;;  %v6310_v21 = vsel %vm409_vm0, %v2867_v6, %v7456_v5  ;;  %v2897_v18 = vrot.slane %v2893_v8, 1  ;;  %v2908_v26 = vmul.f32 %v6233_v54, %v7908_v28  ;;  %v2375_v6 = vpop.permute.xlu1 %2374  ;;  %v7909_v5 = vld [vmem:[#allocation47_spill] sm:$0xff] }
 0x308   : > { %v6315_v44 = vsel %vm409_vm0, %v2882_v52, %v7455_v31  ;;  %v7461_v8 = vrot.slane %v6320_v63, 1  ;;  %v6337_v36 = vmul.f32 %v6223_v33, %v7909_v5  ;;  %v2956_v28 = vmul.f32 %v6233_v54, %v7909_v5 }
 0x309   : > { %v7458_v16 = vrot.slane %v6303_v60, 1  ;;  %v2912_v31 = vrot.slane %v2908_v26, 1  ;;  %v2379_v35 = vadd.f32 %v2375_v6, %v2334_v40  ;;  %v7913_v40 = vld [vmem:[#allocation53_spill] sm:$0xff] }
 0x30a   : > { %v7463_v26 = vrot.slane %v6337_v36, 2  ;;  %v2960_v20 = vrot.slane %v2956_v28, 2  ;;  %v6371_v24 = vmul.f32 %v6223_v33, %v7913_v40 }
 0x30b   : > { %2527 = vrot.lane.b32.xlu1 %v2523_v2, %s3747_s22  ;;  %2525 = vrot.lane.b32.xlu0 %v6135_v29, %s3747_s22  ;;  %v6332_v52 = vsel %vm409_vm0, %v2897_v18, %v7458_v16  ;;  %v2373_v2 = vpop.permute.xlu0 %2372  ;;  %v2333_v29 = vadd.f32 %v6062_v19, %v6058_v46  ;;  %v6348_v18 = vsel %vm409_vm0, %v2912_v31, %v7461_v8  ;;  %v7910_v16 = vld [vmem:[#allocation48_spill] sm:$0xff]  ;;  %v7912_v19 = vld [vmem:[#allocation50_spill] sm:$0xff] }
 0x30c   : > { %v6353_v39 = vmul.f32 %v6223_v33, %v7910_v16  ;;  %v2971_v46 = vmul.f32 %v6233_v54, %v7910_v16  ;;  %v6362_v5 = vmul.f32 %v6223_v33, %v7912_v19  ;;  %v2986_v6 = vmul.f32 %v6233_v54, %v7912_v19  ;;  %v7914_v8 = vld [vmem:[#allocation56_spill] sm:$0xff] }
 0x30d   : > { %v2378_v31 = vadd.f32 %v2373_v2, %v2333_v29  ;;  %v6376_v16 = vsel %vm542_vm1, %v2960_v20, %v7463_v26  ;;  %v6384_v19 = vmul.f32 %v6223_v33, %v7914_v8  ;;  %v3016_v43 = vmul.f32 %v6233_v54, %v7914_v8 }
 0x30e   : > { %v2975_v28 = vrot.slane %v2971_v46, 2  ;;  %v2990_v29 = vrot.slane %v2986_v6, 2  ;;  %v7915_v20 = vrot.slane %v6124_v3, 1  ;;  %v7916_v46 = vrot.slane %v6353_v39, 2  ;;  %v7917_v6 = vld [vmem:[#allocation26_spill] sm:$0xff] }
 0x30f   : > { %2542 = vrot.lane.b32.xlu1 %v7911_v38, %s3747_s22  ;;  %2540 = vrot.lane.b32.xlu0 %v6140_v32, %s3747_s22  ;;  %v3001_v32 = vmul.f32 %v6233_v54, %v7913_v40  ;;  %v6398_v38 = vmul.f32 %v6064_v49, %v7917_v6  ;;  %v2470_v2 = vmul.f32 %v6066_v9, %v7917_v6  ;;  %v7918_v8 = vrot.slane %v6362_v5, 2 }
 0x310   : > { %v6394_v26 = vsel %vm542_vm1, %v2975_v28, %v7916_v46  ;;  %v3020_v28 = vrot.slane %v3016_v43, 2  ;;  %v7919_v46 = vld [vmem:[#allocation58_spill] sm:$0xff]  ;;  %v7921_v25 = vrot.slane %v6371_v24, 2 }
 0x311   : > { %v3005_v40 = vrot.slane %v3001_v32, 2  ;;  %v6407_v3 = vsel %vm542_vm1, %v2990_v29, %v7918_v8  ;;  %v6412_v32 = vmul.f32 %v6223_v33, %v7919_v46  ;;  %v7470_v6 = vrot.slane %v6398_v38, 1  ;;  %v7922_v8 = vld [vmem:[#allocation28_spill] sm:$0xff]  ;;  %v7925_v43 = vld [vmem:[#allocation30_spill] sm:$0xff] }
 0x312   : > { %v3031_v37 = vmul.f32 %v6233_v54, %v7919_v46  ;;  %v6430_v23 = vmul.f32 %v6064_v49, %v7922_v8  ;;  %v6447_v1 = vmul.f32 %v6064_v49, %v7925_v43 }
 0x313   : > { %2557 = vrot.lane.b32.xlu1 %v7915_v20, %s3748_s29  ;;  %2555 = vrot.lane.b32.xlu0 %v6164_v0, %s3748_s29  ;;  %v7468_v20 = vrot.slane %v6384_v19, 2  ;;  %7920 = vst [vmem:[#allocation98_spill] sm:$0xff] %v6412_v32  ;;  %v6417_v48 = vsel %vm542_vm1, %v3005_v40, %v7921_v25  ;;  %v2474_v0 = vrot.slane %v2470_v2, 1  ;;  %v2481_v25 = vmul.f32 %v6066_v9, %v7922_v8 }
 0x314   : > { %7923 = vst [vmem:[#allocation52_spill] sm:$0xff] %v6430_v23  ;;  %v7924_v2 = vrot.slane %v6130_v56, 1  ;;  %v7471_v46 = vrot.slane %v6430_v23, 1  ;;  %v2492_v56 = vmul.f32 %v6066_v9, %v7925_v43  ;;  %v6451_v8 = vmax.f32 %v2379_v35, 0.0 }
 0x315   : > { %v6425_v29 = vsel %vm542_vm1, %v3020_v28, %v7468_v20  ;;  %v6440_v40 = vsel %vm409_vm0, %v2474_v0, %v7470_v6  ;;  %v3035_v28 = vrot.slane %v3031_v37, 2  ;;  %v2485_v20 = vrot.slane %v2481_v25, 1 }
 0x316   : > { %v6458_v37 = vmax.f32 %v2378_v31, 0.0  ;;  %v7472_v25 = vrot.slane %v6447_v1, 1  ;;  %v2496_v6 = vrot.slane %v2492_v56, 1  ;;  %v7928_v43 = vrot.slane %v6146_v51, 1  ;;  %v7930_v31 = vld [vmem:[#allocation32_spill] sm:$0xff]  ;;  %v7932_v56 = vld [vmem:[#allocation33_spill] sm:$0xff] }
 0x317   : > { %2572 = vrot.lane.b32.xlu1 %v7924_v2, %s3748_s29  ;;  %2570 = vrot.lane.b32.xlu0 %v6175_v12, %s3748_s29  ;;  %v7926_v2 = vrot.slane %v6412_v32, 2  ;;  %v6463_v12 = vsel %vm409_vm0, %v2485_v20, %v7471_v46  ;;  %v2593_v20 = vmul.f32 %v6066_v9, %v7930_v31  ;;  %v2604_v51 = vmul.f32 %v6066_v9, %v7932_v56 }
 0x318   : > { %v6474_v35 = vsel %vm409_vm0, %v2496_v6, %v7472_v25  ;;  %v7937_v23 = vrot.slane %v6157_v61, 2  ;;  %v2615_v6 = vmul.f32 %v6066_v9, %v7936_v47 }
 0x319   : > { %v6456_v0 = vsel %vm542_vm1, %v3035_v28, %v7926_v2  ;;  %7929 = vst [vmem:[#allocation83_spill] sm:$0xff] %v6474_v35  ;;  %v6478_v28 = vmul.f32 %v6064_v49, %v7930_v31  ;;  %v6484_v2 = vmul.f32 %v6064_v49, %v7932_v56  ;;  %v2597_v46 = vrot.slane %v2593_v20, 2 }
 0x31a   : > { %7927 = vst [vmem:[#allocation61_spill] sm:$0xff] %v6456_v0  ;;  %v6497_v31 = vmul.f32 %v6064_v49, %v7936_v47  ;;  %v2608_v0 = vrot.slane %v2604_v51, 2  ;;  %v2619_v47 = vrot.slane %v2615_v6, 2 }
 0x31b   : > { %2587 = vrot.lane.b32.xlu1 %v7928_v43, %s3748_s29  ;;  %2585 = vrot.lane.b32.xlu0 %v6186_v22, %s3748_s29  ;;  %7931 = vst [vmem:[#allocation54_spill] sm:$0xff] %v6478_v28  ;;  %7933 = vst [vmem:[#allocation55_spill] sm:$0xff] %v6484_v2  ;;  %v7934_v22 = vld [vmem:[#allocation66_spill] sm:$0xff]  ;;  %v7938_v20 = vrot.slane %v6478_v28, 2  ;;  %v7940_v51 = vrot.slane %v6484_v2, 2  ;;  %v7942_v28 = vld [vmem:[#allocation69_spill] sm:$0xff] }
 0x31c   : > { %v6490_v43 = vmul.f32 %v6451_v8, %v7934_v22  ;;  %v3163_v25 = vmul.f32 %v6458_v37, %v7934_v22  ;;  %v3193_v2 = vmul.f32 %v6458_v37, %v7942_v28 }
 0x31d   : > { %v6511_v22 = vsel %vm542_vm1, %v2597_v46, %v7938_v20  ;;  %v6521_v32 = vsel %vm542_vm1, %v2608_v0, %v7940_v51  ;;  %v6527_v46 = vmul.f32 %v6451_v8, %v7942_v28  ;;  %v7946_v0 = vld [vmem:[#allocation70_spill] sm:$0xff]  ;;  %v7949_v51 = vrot.slane %v6497_v31, 2 }
 0x31e   : > { %7935 = vst [vmem:[#allocation82_spill] sm:$0xff] %v6490_v43  ;;  %v3167_v35 = vrot.slane %v3163_v25, 1  ;;  %7941 = vst [vmem:[#allocation95_spill] sm:$0xff] %v6521_v32  ;;  %v7944_v25 = vrot.slane %v6490_v43, 1  ;;  %v6539_v6 = vmul.f32 %v6451_v8, %v7946_v0  ;;  %v3208_v61 = vmul.f32 %v6458_v37, %v7946_v0  ;;  %v7951_v32 = vld [vmem:[#allocation71_spill] sm:$0xff] }
 0x31f   : > { %2635 = vrot.lane.b32.xlu1 %v7937_v23, %s3747_s22  ;;  %2633 = vrot.lane.b32.xlu0 %v6195_v62, %s3747_s22  ;;  %v7939_v23 = vld [vmem:[#allocation68_spill] sm:$0xff]  ;;  %7943 = vst [vmem:[#allocation57_spill] sm:$0xff] %v6527_v46  ;;  %v6547_v43 = vsel %vm542_vm1, %v2619_v47, %v7949_v51  ;;  %v3197_v28 = vrot.slane %v3193_v2, 1  ;;  %v3223_v47 = vmul.f32 %v6458_v37, %v7951_v32 }
 0x320   : > { %v6516_v56 = vmul.f32 %v6451_v8, %v7939_v23  ;;  %v3178_v62 = vmul.f32 %v6458_v37, %v7939_v23  ;;  %v6532_v20 = vsel %vm409_vm0, %v3167_v35, %v7944_v25  ;;  %7947 = vst [vmem:[#allocation90_spill] sm:$0xff] %v6539_v6  ;;  %v7948_v23 = vrot.slane %v6168_v7, 2  ;;  %7950 = vst [vmem:[#allocation79_spill] sm:$0xff] %v6547_v43 }
 0x321   : > { %7945 = vst [vmem:[#allocation99_spill] sm:$0xff] %v6532_v20  ;;  %v7479_v25 = vrot.slane %v6527_v46, 1  ;;  %v6557_v7 = vmul.f32 %v6451_v8, %v7951_v32  ;;  %v3212_v51 = vrot.slane %v3208_v61, 1  ;;  %v3227_v0 = vrot.slane %v3223_v47, 1  ;;  %v7955_v20 = vld [vmem:[#allocation72_spill] sm:$0xff] }
 0x322   : > { %v3182_v35 = vrot.slane %v3178_v62, 1  ;;  %v7953_v62 = vrot.slane %v6516_v56, 1  ;;  %v6574_v43 = vmul.f32 %v6451_v8, %v7955_v20  ;;  %v7957_v32 = vrot.slane %v6180_v30, 2  ;;  %v7961_v30 = vld [vmem:[#allocation73_spill] sm:$0xff] }
 0x323   : > { %2650 = vrot.lane.b32.xlu1 %v7948_v23, %s3747_s22  ;;  %2648 = vrot.lane.b32.xlu0 %v6207_v13, %s3747_s22  ;;  %7952 = vst [vmem:[#allocation110_spill] sm:$0xff] %v6557_v7  ;;  %v6569_v13 = vsel %vm409_vm0, %v3197_v28, %v7479_v25  ;;  %v7481_v2 = vrot.slane %v6557_v7, 1  ;;  %v3238_v28 = vmul.f32 %v6458_v37, %v7955_v20  ;;  %v7964_v7 = vld [vmem:[#allocation75_spill] sm:$0xff] }
 0x324   : > { %v6564_v23 = vsel %vm409_vm0, %v3182_v35, %v7953_v62  ;;  %7954 = vst [vmem:[#allocation94_spill] sm:$0xff] %v6569_v13  ;;  %7956 = vst [vmem:[#allocation86_spill] sm:$0xff] %v6574_v43  ;;  %v7958_v35 = vrot.slane %v6539_v6, 1  ;;  %v7967_v6 = vrot.slane %v6200_v55, 2 }
 0x325   : > { %v6591_v47 = vsel %vm409_vm0, %v3227_v0, %v7481_v2  ;;  %v3242_v25 = vrot.slane %v3238_v28, 1  ;;  %v6608_v0 = vmul.f32 %v6451_v8, %v7964_v7  ;;  %v7968_v28 = vrot.slane %v6574_v43, 1  ;;  %v7970_v2 = vld [vmem:[#allocation77_spill] sm:$0xff] }
 0x326   : > { %v6582_v61 = vsel %vm409_vm0, %v3212_v51, %v7958_v35  ;;  %7960 = vst [vmem:[#allocation112_spill] sm:$0xff] %v6591_v47  ;;  %v3286_v51 = vmul.f32 %v6458_v37, %v7961_v30  ;;  %v7963_v35 = vld [vmem:[#allocation35_spill] sm:$0xff]  ;;  %v3301_v47 = vmul.f32 %v6458_v37, %v7964_v7  ;;  %v6630_v7 = vmul.f32 %v6451_v8, %v7970_v2 }
 0x327   : > { %2665 = vrot.lane.b32.xlu1 %v7957_v32, %s3747_s22  ;;  %7959 = vst [vmem:[#allocation97_spill] sm:$0xff] %v6582_v61  ;;  %2663 = vrot.lane.b32.xlu0 %v6229_v50, %s3747_s22  ;;  %v6596_v32 = vmul.f32 %v6451_v8, %v7961_v30  ;;  %v2729_v20 = vmul.f32 %v6223_v33, %v7963_v35  ;;  %v7965_v61 = vld [vmem:[#allocation76_spill] sm:$0xff] }
 0x328   : > { %v6604_v50 = vmul.f32 %v6233_v54, %v7963_v35  ;;  %v3290_v62 = vrot.slane %v3286_v51, 2  ;;  %v6615_v30 = vmul.f32 %v6451_v8, %v7965_v61  ;;  %v6623_v35 = vsel %vm409_vm0, %v3242_v25, %v7968_v28  ;;  %7971 = vst [vmem:[#allocation111_spill] sm:$0xff] %v6630_v7 }
 0x329   : > { %7962 = vst [vmem:[#allocation87_spill] sm:$0xff] %v6596_v32  ;;  %7969 = vst [vmem:[#allocation96_spill] sm:$0xff] %v6623_v35  ;;  %v3316_v51 = vmul.f32 %v6458_v37, %v7965_v61  ;;  %v7972_v55 = vrot.slane %v6596_v32, 2  ;;  %v3305_v43 = vrot.slane %v3301_v47, 2  ;;  %v3331_v28 = vmul.f32 %v6458_v37, %v7970_v2  ;;  %v7973_v35 = vld [vmem:[#allocation80_spill] sm:$0xff] }
 0x32a   : > { %7966 = vst [vmem:[#allocation91_spill] sm:$0xff] %v6615_v30  ;;  %v6645_v46 = vmul.f32 %v6451_v8, %v7973_v35  ;;  %v7975_v32 = vrot.slane %v6608_v0, 2  ;;  %v7979_v61 = vrot.slane %v6615_v30, 2 }
 0x32b   : > { %2680 = vrot.lane.b32.xlu1 %v7967_v6, %s3748_s29  ;;  %2678 = vrot.lane.b32.xlu0 %v6239_v27, %s3748_s29  ;;  %v6637_v6 = vsel %vm542_vm1, %v3290_v62, %v7972_v55  ;;  %v3320_v13 = vrot.slane %v3316_v51, 2  ;;  %v3346_v27 = vmul.f32 %v6458_v37, %v7973_v35  ;;  %v3335_v47 = vrot.slane %v3331_v28, 2  ;;  %v7977_v55 = vld [vmem:[#allocation101_spill] sm:$0xff] }
 0x32c   : > { %7974 = vst [vmem:[#allocation115_spill] sm:$0xff] %v6645_v46  ;;  %v6652_v62 = vsel %vm542_vm1, %v3305_v43, %v7975_v32  ;;  %v6656_v25 = vmul.f32 %v6223_v33, %v7977_v55  ;;  %v2800_v2 = vmul.f32 %v6233_v54, %v7977_v55  ;;  %v7978_v51 = vrot.slane %v6211_v17, 2  ;;  %v7981_v28 = vld [vmem:[#allocation81_spill] sm:$0xff] }
 0x32d   : > { %7976 = vst [vmem:[#allocation109_spill] sm:$0xff] %v6652_v62  ;;  %v6666_v35 = vsel %vm542_vm1, %v3320_v13, %v7979_v61  ;;  %v7488_v43 = vrot.slane %v6645_v46, 2  ;;  %v3350_v32 = vrot.slane %v3346_v27, 2  ;;  %v6671_v62 = vmul.f32 %v6451_v8, %v7981_v28 }
 0x32e   : > { %7980 = vst [vmem:[#allocation113_spill] sm:$0xff] %v6666_v35  ;;  %v7983_v55 = vrot.slane %v6630_v7, 2  ;;  %v2804_v30 = vrot.slane %v2800_v2, 1  ;;  %v3361_v13 = vmul.f32 %v6458_v37, %v7981_v28  ;;  %v7986_v35 = vld [vmem:[#allocation103_spill] sm:$0xff] }
 0x32f   : > { %2695 = vrot.lane.b32.xlu1 %v7978_v51, %s3748_s29  ;;  %7982 = vst [vmem:[#allocation117_spill] sm:$0xff] %v6671_v62  ;;  %2693 = vrot.lane.b32.xlu0 %v6247_v14, %s3748_s29  ;;  %v7489_v51 = vrot.slane %v6656_v25, 1  ;;  %v6686_v61 = vsel %vm542_vm1, %v3350_v32, %v7488_v43  ;;  %v6691_v14 = vmul.f32 %v6223_v33, %v7986_v35  ;;  %v7991_v43 = vrot.slane %v6218_v15, 2 }
 0x330   : > { %v6678_v17 = vsel %vm542_vm1, %v3335_v47, %v7983_v55  ;;  %7985 = vst [vmem:[#allocation118_spill] sm:$0xff] %v6686_v61  ;;  %v2811_v47 = vmul.f32 %v6233_v54, %v7986_v35  ;;  %v3365_v28 = vrot.slane %v3361_v13, 2  ;;  %v7989_v55 = vld [vmem:[#allocation107_spill] sm:$0xff]  ;;  %v7992_v61 = vld [vmem:[#allocation104_spill] sm:$0xff]  ;;  %v7994_v13 = vrot.slane %v6671_v62, 2 }
 0x331   : > { %7984 = vst [vmem:[#allocation114_spill] sm:$0xff] %v6678_v17  ;;  %7987 = vst [vmem:[#allocation116_spill] sm:$0xff] %v6691_v14  ;;  %v6698_v2 = vsel %vm409_vm0, %v2804_v30, %v7489_v51  ;;  %v6702_v46 = vmul.f32 %v6223_v33, %v7989_v55  ;;  %v2822_v32 = vmul.f32 %v6233_v54, %v7989_v55  ;;  %v7493_v27 = vrot.slane %v6691_v14, 1  ;;  %v7996_v51 = vld [vmem:[#allocation105_spill] sm:$0xff]  ;;  %v8013_v14 = vld [vmem:[#allocation59_spill] sm:$0xff] }
 0x332   : > { %7988 = vst [vmem:[#allocation121_spill] sm:$0xff] %v6698_v2  ;;  %v2815_v35 = vrot.slane %v2811_v47, 1  ;;  %v6712_v17 = vmul.f32 %v6223_v33, %v7992_v61  ;;  %v2923_v30 = vmul.f32 %v6233_v54, %v7992_v61  ;;  %v6721_v55 = vsel %vm542_vm1, %v3365_v28, %v7994_v13  ;;  %v8000_v13 = vld [vmem:[#allocation108_spill] sm:$0xff] }
 0x333   : > { %7990 = vst [vmem:[#allocation119_spill] sm:$0xff] %v6702_v46  ;;  %2710 = vrot.lane.b32.xlu1 %v7991_v43, %s3748_s29  ;;  %2708 = vrot.lane.b32.xlu0 %v6254_v34, %s3748_s29  ;;  %7995 = vst [vmem:[#allocation123_spill] sm:$0xff] %v6721_v55  ;;  %v7492_v15 = vrot.slane %v6702_v46, 1  ;;  %v2826_v43 = vrot.slane %v2822_v32, 1  ;;  %v6726_v47 = vmul.f32 %v6223_v33, %v7996_v51 }
 0x334   : > { %7993 = vst [vmem:[#allocation120_spill] sm:$0xff] %v6712_v17  ;;  %v6731_v7 = vsel %vm409_vm0, %v2815_v35, %v7493_v27  ;;  %v7494_v61 = vrot.slane %v6712_v17, 2  ;;  %v2927_v34 = vrot.slane %v2923_v30, 2  ;;  %v2934_v62 = vmul.f32 %v6233_v54, %v7996_v51  ;;  %v8009_v17 = vld [vmem:[#allocation88_spill] sm:$0xff] }
 0x335   : > { %7997 = vst [vmem:[#allocation122_spill] sm:$0xff] %v6726_v47  ;;  %7998 = vst [vmem:[#allocation125_spill] sm:$0xff] %v6731_v7  ;;  %v6739_v28 = vsel %vm409_vm0, %v2826_v43, %v7492_v15  ;;  %v6744_v55 = vmul.f32 %v6223_v33, %v8000_v13  ;;  %v2945_v35 = vmul.f32 %v6233_v54, %v8000_v13  ;;  %v8003_v43 = vld [vmem:[#allocation36_spill] sm:$0xff] }
 0x336   : > { %7999 = vst [vmem:[#allocation124_spill] sm:$0xff] %v6739_v28  ;;  %v6752_v51 = vsel %vm542_vm1, %v2927_v34, %v7494_v61  ;;  %v2938_v30 = vrot.slane %v2934_v62, 2  ;;  %v2741_v15 = vmul.f32 %v6223_v33, %v8003_v43  ;;  %v2740_v27 = vmul.f32 %v6233_v54, %v8003_v43  ;;  %v8004_v28 = vld [vmem:[#allocation37_spill] sm:$0xff] }
 0x337   : > { %8001 = vst [vmem:[#allocation128_spill] sm:$0xff] %v6744_v55  ;;  %2734 = vrot.lane.b32.xlu1 %v2729_v20, %s3747_s22  ;;  %8002 = vst [vmem:[#allocation126_spill] sm:$0xff] %v6752_v51  ;;  %2732 = vrot.lane.b32.xlu0 %v6604_v50, %s3747_s22  ;;  %v7497_v32 = vrot.slane %v6744_v55, 2  ;;  %v2949_v13 = vrot.slane %v2945_v35, 2  ;;  %v2753_v20 = vmul.f32 %v6223_v33, %v8004_v28  ;;  %v8005_v62 = vrot.slane %v6726_v47, 2  ;;  %v8007_v50 = vld [vmem:[#allocation84_spill] sm:$0xff] }
 0x338   : > { %v2752_v34 = vmul.f32 %v6233_v54, %v8004_v28  ;;  %v6772_v51 = vmul.f32 %v6451_v8, %v8007_v50  ;;  %v3130_v35 = vmul.f32 %v6458_v37, %v8007_v50  ;;  %v6783_v28 = vmul.f32 %v6451_v8, %v8009_v17 }
 0x339   : > { %v6768_v61 = vsel %vm542_vm1, %v2938_v30, %v8005_v62  ;;  %v6777_v43 = vsel %vm542_vm1, %v2949_v13, %v7497_v32  ;;  %v3141_v30 = vmul.f32 %v6458_v37, %v8009_v17  ;;  %v8012_v32 = vld [vmem:[#allocation92_spill] sm:$0xff] }
 0x33a   : > { %8006 = vst [vmem:[#allocation129_spill] sm:$0xff] %v6768_v61  ;;  %8008 = vst [vmem:[#allocation127_spill] sm:$0xff] %v6777_v43  ;;  %v8010_v61 = vld [vmem:[#allocation93_spill] sm:$0xff]  ;;  %v6797_v50 = vmul.f32 %v6451_v8, %v8012_v32  ;;  %v3134_v43 = vrot.slane %v3130_v35, 1  ;;  %v7501_v17 = vrot.slane %v6783_v28, 1  ;;  %v8014_v2 = vrot.slane %v6772_v51, 1 }
 0x33b   : > { %2746 = vrot.lane.b32.xlu1 %v2741_v15, %s3747_s22  ;;  %v6791_v55 = vmul.f32 %v6451_v8, %v8010_v61  ;;  %v3152_v13 = vmul.f32 %v6458_v37, %v8010_v61  ;;  %2744 = vrot.lane.b32.xlu0 %v2740_v27, %s3747_s22  ;;  %v3145_v47 = vrot.slane %v3141_v30, 1  ;;  %v3253_v15 = vmul.f32 %v6458_v37, %v8012_v32 }
 0x33c   : > { %v6807_v61 = vmul.f32 %v6451_v8, %v8013_v14  ;;  %v6812_v27 = vsel %vm409_vm0, %v3134_v43, %v8014_v2  ;;  %v3264_v30 = vmul.f32 %v6458_v37, %v8013_v14  ;;  %v8016_v2 = vld [vmem:[#allocation78_spill] sm:$0xff]  ;;  %v8017_v14 = vrot.slane %v6797_v50, 2 }
 0x33d   : > { %8011 = vst [vmem:[#allocation130_spill] sm:$0xff] %v6791_v55  ;;  %v7502_v62 = vrot.slane %v6791_v55, 1  ;;  %v3156_v46 = vrot.slane %v3152_v13, 1  ;;  %v6817_v35 = vsel %vm409_vm0, %v3145_v47, %v7501_v17  ;;  %v3257_v32 = vrot.slane %v3253_v15, 2  ;;  %v8018_v17 = vld [vmem:[#allocation38_spill] sm:$0xff] }
 0x33e   : > { %v6830_v43 = vmul.f32 %v6451_v8, %v8016_v2  ;;  %v3275_v47 = vmul.f32 %v6458_v37, %v8016_v2  ;;  %v3268_v15 = vrot.slane %v3264_v30, 2  ;;  %v8019_v55 = vrot.slane %v6807_v61, 2 }
 0x33f   : > { %2758 = vrot.lane.b32.xlu1 %v2753_v20, %s3747_s22  ;;  %v6825_v13 = vsel %vm409_vm0, %v3156_v46, %v7502_v62  ;;  %2756 = vrot.lane.b32.xlu0 %v2752_v34, %s3747_s22  ;;  %v6838_v20 = vsel %vm542_vm1, %v3257_v32, %v8017_v14  ;;  %v2765_v46 = vmul.f32 %v6223_v33, %v8018_v17  ;;  %v8020_v32 = vld [vmem:[#allocation39_spill] sm:$0xff] }
 0x340   : > { %8015 = vst [vmem:[#allocation131_spill] sm:$0xff] %v6825_v13  ;;  %v3280_v62 = vrot.slane %v6830_v43, 2  ;;  %v3279_v7 = vrot.slane %v3275_v47, 2  ;;  %v2764_v13 = vmul.f32 %v6233_v54, %v8018_v17  ;;  %v6848_v2 = vsel %vm542_vm1, %v3268_v15, %v8019_v55  ;;  %v8021_v55 = vld [vmem:[#allocation41_spill] sm:$0xff] }
 0x341   : > { %v2777_v30 = vmul.f32 %v6223_v33, %v8020_v32  ;;  %v2776_v17 = vmul.f32 %v6233_v54, %v8020_v32  ;;  %v2789_v47 = vmul.f32 %v6223_v33, %v8021_v55  ;;  %v2788_v14 = vmul.f32 %v6233_v54, %v8021_v55 }
 0x342   : > { %v6854_v34 = vsel %vm542_vm1, %v3279_v7, %v3280_v62  ;;  %v8022_v7 = vrot.slane %v6260_v53, 1  ;;  %v8024_v15 = vrot.slane %v6272_v42, 1  ;;  %v8025_v53 = vrot.slane %v6278_v41, 1 }
 0x343   : > { %2770 = vrot.lane.b32.xlu1 %v2765_v46, %s3748_s29  ;;  %2768 = vrot.lane.b32.xlu0 %v2764_v13, %s3748_s29  ;;  %v8023_v13 = vrot.slane %v6266_v4, 1  ;;  %v8026_v4 = vrot.slane %v6303_v60, 1  ;;  %v8028_v46 = vld [vmem:[#allocation49_spill] sm:$0xff]  ;;  %v8029_v60 = vrot.slane %v6337_v36, 2 }
 0x344   : > { %v2387_v55 = vmul.f32 %v6064_v49, %v8028_v46 }
 0x347   : > { %2782 = vrot.lane.b32.xlu1 %v2777_v30, %s3748_s29  ;;  %2780 = vrot.lane.b32.xlu0 %v2776_v17, %s3748_s29  ;;  %v8030_v30 = vld [vmem:[#allocation51_spill] sm:$0xff] }
 0x348   : > { %v2390_v17 = vmul.f32 %v6066_v9, %v8030_v30 }
 0x34b   : > { %2794 = vrot.lane.b32.xlu1 %v2789_v47, %s3748_s29  ;;  %2792 = vrot.lane.b32.xlu0 %v2788_v14, %s3748_s29 }
 0x34f   : > { %2842 = vrot.lane.b32.xlu1 %v8022_v7, %s3747_s22  ;;  %2840 = vrot.lane.b32.xlu0 %v6294_v57, %s3747_s22  ;;  %v2392_v7 = vadd.f32 %v2390_v17, %v7799_v10 }
 0x353   : > { %2857 = vrot.lane.b32.xlu1 %v8023_v13, %s3747_s22  ;;  %2855 = vrot.lane.b32.xlu0 %v6299_v59, %s3747_s22  ;;  %v8027_v59 = vrot.slane %v6320_v63, 1  ;;  %v2394_v13 = vmul.f32 %v6066_v9, %v7800_v45 }
 0x357   : > { %2872 = vrot.lane.b32.xlu1 %v8024_v15, %s3747_s22  ;;  %2870 = vrot.lane.b32.xlu0 %v6310_v21, %s3747_s22 }
 0x35b   : > { %2887 = vrot.lane.b32.xlu1 %v8025_v53, %s3748_s29  ;;  %2885 = vrot.lane.b32.xlu0 %v6315_v44, %s3748_s29  ;;  %v2386_v44 = vmul.f32 %v6066_v9, %v8028_v46  ;;  %v2389_v53 = vadd.f32 %v2387_v55, %v7794_v11 }
 0x35d   : > { %v2388_v63 = vadd.f32 %v2386_v44, %v7794_v11  ;;  %v2396_v44 = vadd.f32 %v2394_v13, %v7804_v58  ;;  %v8033_v11 = vrot.slane %v6371_v24, 2 }
 0x35f   : > { %2902 = vrot.lane.b32.xlu1 %v8026_v4, %s3748_s29  ;;  %2900 = vrot.lane.b32.xlu0 %v6332_v52, %s3748_s29 }
 0x361   : > { %v2405_v57 = vpop.permute.xlu1 %2404  ;;  %v2403_v42 = vpop.permute.xlu0 %2402 }
 0x362   : > { %v2408_v36 = vadd.f32 %v2403_v42, %v2388_v63  ;;  %v2409_v46 = vadd.f32 %v2405_v57, %v2389_v53 }
 0x363   : > { %2917 = vrot.lane.b32.xlu1 %v8027_v59, %s3748_s29  ;;  %2915 = vrot.lane.b32.xlu0 %v6348_v18, %s3748_s29  ;;  %v8031_v18 = vrot.slane %v6353_v39, 2  ;;  %v8032_v39 = vrot.slane %v6362_v5, 2 }
 0x365   : > { %v2417_v41 = vpop.permute.xlu1 %2416  ;;  %v2415_v21 = vpop.permute.xlu0 %2414 }
 0x366   : > { %v2420_v4 = vadd.f32 %v2415_v21, %v2392_v7  ;;  %v8040_v7 = vld [vmem:[#allocation61_spill] sm:$0xff] }
 0x367   : > { %2965 = vrot.lane.b32.xlu1 %v8029_v60, %s3747_s22  ;;  %2963 = vrot.lane.b32.xlu0 %v6376_v16, %s3747_s22  ;;  %v2395_v16 = vmul.f32 %v6064_v49, %v7800_v45 }
 0x369   : > { %v2429_v52 = vpop.permute.xlu1 %2428  ;;  %v2427_v32 = vpop.permute.xlu0 %2426  ;;  %v2397_v45 = vadd.f32 %v2395_v16, %v7804_v58 }
 0x36b   : > { %2980 = vrot.lane.b32.xlu1 %v8031_v18, %s3747_s22  ;;  %2978 = vrot.lane.b32.xlu0 %v6394_v26, %s3747_s22  ;;  %v2391_v26 = vmul.f32 %v6064_v49, %v8030_v30  ;;  %v2433_v60 = vadd.f32 %v2429_v52, %v2397_v45  ;;  %v8034_v18 = vrot.slane %v6384_v19, 2 }
 0x36d   : > { %v2441_v47 = vpop.permute.xlu1 %2440  ;;  %v2439_v14 = vpop.permute.xlu0 %2438  ;;  %v2393_v49 = vadd.f32 %v2391_v26, %v7799_v10  ;;  %v8035_v10 = vrot.slane %v6398_v38, 1 }
 0x36e   : > { %v2444_v15 = vadd.f32 %v2439_v14, %v2408_v36  ;;  %v2445_v63 = vadd.f32 %v2441_v47, %v2409_v46  ;;  %v8038_v14 = vld [vmem:[#allocation98_spill] sm:$0xff] }
 0x36f   : > { %2995 = vrot.lane.b32.xlu1 %v8032_v39, %s3747_s22  ;;  %2993 = vrot.lane.b32.xlu0 %v6407_v3, %s3747_s22  ;;  %v2432_v3 = vadd.f32 %v2427_v32, %v2396_v44  ;;  %v2421_v21 = vadd.f32 %v2417_v41, %v2393_v49  ;;  %v8039_v19 = vrot.slane %v8038_v14, 2  ;;  %v8043_v39 = vld [vmem:[#allocation60_spill] sm:$0xff]  ;;  %v8044_v46 = vld [vmem:[#allocation62_spill] sm:$0xff]  ;;  %v8051_v14 = vld [vmem:[#allocation65_spill] sm:$0xff] }
 0x370   : > { %v2479_v59 = vadd.f32 %v6440_v40, %v2444_v15  ;;  %v2480_v52 = vadd.f32 %v8035_v10, %v2445_v63  ;;  %v3071_v45 = vmul.f32 %v6451_v8, %v8044_v46 }
 0x371   : > { %v2453_v42 = vpop.permute.xlu1 %2452  ;;  %v2451_v9 = vpop.permute.xlu0 %2450 }
 0x372   : > { %v2456_v5 = vadd.f32 %v2451_v9, %v2420_v4  ;;  %v2457_v24 = vadd.f32 %v2453_v42, %v2421_v21  ;;  %v3058_v4 = vmul.f32 %v6458_v37, %v8043_v39 }
 0x373   : > { %3010 = vrot.lane.b32.xlu1 %v8033_v11, %s3748_s29  ;;  %3008 = vrot.lane.b32.xlu0 %v6417_v48, %s3748_s29  ;;  %v8036_v48 = vrot.slane %v6447_v1, 1  ;;  %v3059_v1 = vmul.f32 %v6451_v8, %v8043_v39  ;;  %v8053_v39 = vrot.slane %v6497_v31, 2 }
 0x374   : > { %v2490_v57 = vadd.f32 %v6463_v12, %v2456_v5  ;;  %v8037_v12 = vld [vmem:[#allocation83_spill] sm:$0xff]  ;;  %v3070_v5 = vmul.f32 %v6458_v37, %v8044_v46 }
 0x375   : > { %v2465_v40 = vpop.permute.xlu1 %2464  ;;  %v2463_v17 = vpop.permute.xlu0 %2462 }
 0x376   : > { %v2469_v30 = vadd.f32 %v2465_v40, %v2433_v60  ;;  %v2468_v58 = vadd.f32 %v2463_v17, %v2432_v3  ;;  %v8045_v60 = vld [vmem:[#allocation63_spill] sm:$0xff] }
 0x377   : > { %3025 = vrot.lane.b32.xlu1 %v8034_v18, %s3748_s29  ;;  %3023 = vrot.lane.b32.xlu0 %v6425_v29, %s3748_s29  ;;  %v8041_v29 = vld [vmem:[#allocation52_spill] sm:$0xff]  ;;  %v3083_v63 = vmul.f32 %v6451_v8, %v8045_v60 }
 0x378   : > { %v2502_v32 = vadd.f32 %v8036_v48, %v2469_v30  ;;  %v2501_v41 = vadd.f32 %v8037_v12, %v2468_v58  ;;  %v8042_v13 = vrot.slane %v8041_v29, 1  ;;  %v8046_v30 = vld [vmem:[#allocation54_spill] sm:$0xff] }
 0x379   : > { %v2513_v55 = vpop.permute.xlu1 %2512  ;;  %v2511_v47 = vpop.permute.xlu0 %2510  ;;  %v8047_v17 = vrot.slane %v8046_v30, 2 }
 0x37a   : > { %v2517_v36 = vadd.f32 %v2513_v55, %v2480_v52  ;;  %v2516_v16 = vadd.f32 %v2511_v47, %v2479_v59  ;;  %v2491_v38 = vadd.f32 %v8042_v13, %v2457_v24  ;;  %v8048_v24 = vld [vmem:[#allocation64_spill] sm:$0xff] }
 0x37b   : > { %3040 = vrot.lane.b32.xlu1 %v8039_v19, %s3748_s29  ;;  %3038 = vrot.lane.b32.xlu0 %v8040_v7, %s3748_s29  ;;  %v3095_v10 = vmul.f32 %v6451_v8, %v8048_v24  ;;  %v3094_v55 = vmul.f32 %v6458_v37, %v8048_v24  ;;  %v3107_v19 = vmul.f32 %v6451_v8, %v8051_v14  ;;  %v8052_v7 = vld [vmem:[#allocation95_spill] sm:$0xff] }
 0x37d   : > { %v2528_v15 = vpop.permute.xlu1 %2527  ;;  %v2526_v26 = vpop.permute.xlu0 %2525 }
 0x37e   : > { %v2532_v53 = vadd.f32 %v2528_v15, %v2491_v38  ;;  %v2531_v42 = vadd.f32 %v2526_v26, %v2490_v57  ;;  %v3082_v57 = vmul.f32 %v6458_v37, %v8045_v60  ;;  %v3106_v38 = vmul.f32 %v6458_v37, %v8051_v14  ;;  %v8054_v26 = vld [vmem:[#allocation67_spill] sm:$0xff]  ;;  %v8056_v60 = vld [vmem:[#allocation82_spill] sm:$0xff] }
 0x37f   : > { %3064 = vrot.lane.b32.xlu1 %v3059_v1, %s3747_s22  ;;  %3062 = vrot.lane.b32.xlu0 %v3058_v4, %s3747_s22  ;;  %v3119_v4 = vmul.f32 %v6451_v8, %v8054_v26  ;;  %v8064_v14 = vld [vmem:[#allocation102_spill] sm:$0xff] }
 0x381   : > { %v2543_v59 = vpop.permute.xlu1 %2542  ;;  %v2541_v44 = vpop.permute.xlu0 %2540 }
 0x382   : > { %v2547_v9 = vadd.f32 %v2543_v59, %v2502_v32  ;;  %v2546_v11 = vadd.f32 %v2541_v44, %v2501_v41  ;;  %v8049_v41 = vld [vmem:[#allocation55_spill] sm:$0xff] }
 0x383   : > { %3076 = vrot.lane.b32.xlu1 %v3071_v45, %s3747_s22  ;;  %3074 = vrot.lane.b32.xlu0 %v3070_v5, %s3747_s22 }
 0x385   : > { %v2558_v49 = vpop.permute.xlu1 %2557  ;;  %v2556_v40 = vpop.permute.xlu0 %2555 }
 0x386   : > { %v2562_v3 = vadd.f32 %v2558_v49, %v2517_v36  ;;  %v2561_v21 = vadd.f32 %v2556_v40, %v2516_v16  ;;  %v8050_v36 = vrot.slane %v8049_v41, 2 }
 0x387   : > { %3088 = vrot.lane.b32.xlu1 %v3083_v63, %s3747_s22  ;;  %3086 = vrot.lane.b32.xlu0 %v3082_v57, %s3747_s22  ;;  %v8057_v63 = vrot.slane %v8056_v60, 1 }
 0x388   : > { %v2603_v58 = vadd.f32 %v8047_v17, %v2562_v3  ;;  %v2602_v52 = vadd.f32 %v6511_v22, %v2561_v21  ;;  %v8058_v3 = vld [vmem:[#allocation99_spill] sm:$0xff]  ;;  %v8059_v17 = vrot.slane %v6516_v56, 1  ;;  %v8063_v56 = vld [vmem:[#allocation94_spill] sm:$0xff] }
 0x389   : > { %v2573_v18 = vpop.permute.xlu1 %2572  ;;  %v2571_v32 = vpop.permute.xlu0 %2570 }
 0x38a   : > { %v2577_v48 = vadd.f32 %v2573_v18, %v2532_v53  ;;  %v2576_v12 = vadd.f32 %v2571_v32, %v2531_v42  ;;  %v8055_v42 = vld [vmem:[#allocation79_spill] sm:$0xff]  ;;  %v8061_v32 = vld [vmem:[#allocation57_spill] sm:$0xff] }
 0x38b   : > { %3100 = vrot.lane.b32.xlu1 %v3095_v10, %s3748_s29  ;;  %3098 = vrot.lane.b32.xlu0 %v3094_v55, %s3748_s29  ;;  %v8060_v10 = vld [vmem:[#allocation100_spill] sm:$0xff]  ;;  %v8062_v55 = vrot.slane %v8061_v32, 1  ;;  %v8078_v32 = vld [vmem:[#allocation109_spill] sm:$0xff] }
 0x38c   : > { %v2614_v47 = vadd.f32 %v8050_v36, %v2577_v48  ;;  %v2613_v29 = vadd.f32 %v8052_v7, %v2576_v12  ;;  %v2716_v12 = vmul.f32 %v6233_v54, %v8060_v10 }
 0x38d   : > { %v2588_v16 = vpop.permute.xlu1 %2587  ;;  %v2586_v13 = vpop.permute.xlu0 %2585 }
 0x38e   : > { %v2592_v22 = vadd.f32 %v2588_v16, %v2547_v9  ;;  %v2591_v15 = vadd.f32 %v2586_v13, %v2546_v11  ;;  %v3118_v9 = vmul.f32 %v6458_v37, %v8054_v26  ;;  %v2720_v13 = vmul.f32 %v6233_v54, %v8064_v14 }
 0x38f   : > { %3112 = vrot.lane.b32.xlu1 %v3107_v19, %s3748_s29  ;;  %3110 = vrot.lane.b32.xlu0 %v3106_v38, %s3748_s29  ;;  %v2721_v19 = vmul.f32 %v6223_v33, %v8064_v14  ;;  %v8067_v38 = vld [vmem:[#allocation97_spill] sm:$0xff] }
 0x390   : > { %v2625_v1 = vadd.f32 %v8053_v39, %v2592_v22  ;;  %v2624_v59 = vadd.f32 %v8055_v42, %v2591_v15 }
 0x391   : > { %v2636_v53 = vpop.permute.xlu1 %2635  ;;  %v2634_v45 = vpop.permute.xlu0 %2633 }
 0x392   : > { %v2640_v46 = vadd.f32 %v2636_v53, %v2603_v58  ;;  %v2639_v44 = vadd.f32 %v2634_v45, %v2602_v52  ;;  %v2717_v52 = vmul.f32 %v6223_v33, %v8060_v10 }
 0x393   : > { %3124 = vrot.lane.b32.xlu1 %v3119_v4, %s3748_s29  ;;  %3122 = vrot.lane.b32.xlu0 %v3118_v9, %s3748_s29  ;;  %v8068_v4 = vld [vmem:[#allocation106_spill] sm:$0xff] }
 0x394   : > { %v2725_v42 = vmul.f32 %v6223_v33, %v8068_v4  ;;  %v2724_v9 = vmul.f32 %v6233_v54, %v8068_v4  ;;  %v8089_v4 = vld [vmem:[#allocation125_spill] sm:$0xff] }
 0x395   : > { %v2651_v5 = vpop.permute.xlu1 %2650  ;;  %v2649_v31 = vpop.permute.xlu0 %2648 }
 0x396   : > { %v2655_v11 = vadd.f32 %v2651_v5, %v2614_v47  ;;  %v2654_v49 = vadd.f32 %v2649_v31, %v2613_v29  ;;  %v8065_v29 = vld [vmem:[#allocation90_spill] sm:$0xff] }
 0x397   : > { %3172 = vrot.lane.b32.xlu1 %v8057_v63, %s3747_s22  ;;  %3170 = vrot.lane.b32.xlu0 %v8058_v3, %s3747_s22  ;;  %v8066_v22 = vrot.slane %v8065_v29, 1  ;;  %v8072_v3 = vld [vmem:[#allocation86_spill] sm:$0xff] }
 0x398   : > { %v8073_v33 = vrot.slane %v8072_v3, 1 }
 0x399   : > { %v2666_v40 = vpop.permute.xlu1 %2665  ;;  %v2664_v21 = vpop.permute.xlu0 %2663 }
 0x39a   : > { %v2670_v57 = vadd.f32 %v2666_v40, %v2625_v1  ;;  %v2669_v30 = vadd.f32 %v2664_v21, %v2624_v59  ;;  %v8074_v40 = vld [vmem:[#allocation96_spill] sm:$0xff] }
 0x39b   : > { %3187 = vrot.lane.b32.xlu1 %v8059_v17, %s3747_s22  ;;  %3185 = vrot.lane.b32.xlu0 %v6564_v23, %s3747_s22  ;;  %v8075_v17 = vld [vmem:[#allocation87_spill] sm:$0xff] }
 0x39d   : > { %v2681_v58 = vpop.permute.xlu1 %2680  ;;  %v2679_v24 = vpop.permute.xlu0 %2678 }
 0x39e   : > { %v2685_v18 = vadd.f32 %v2681_v58, %v2640_v46  ;;  %v2684_v48 = vadd.f32 %v2679_v24, %v2639_v44  ;;  %v8069_v46 = vld [vmem:[#allocation110_spill] sm:$0xff]  ;;  %v8071_v44 = vld [vmem:[#allocation112_spill] sm:$0xff]  ;;  %v8076_v58 = vrot.slane %v8075_v17, 2 }
 0x39f   : > { %3202 = vrot.lane.b32.xlu1 %v8062_v55, %s3747_s22  ;;  %3200 = vrot.lane.b32.xlu0 %v8063_v56, %s3747_s22  ;;  %v8070_v45 = vrot.slane %v8069_v46, 1 }
 0x3a0   : > { %v2719_v41 = vadd.f32 %v2717_v52, %v2685_v18  ;;  %v2718_v23 = vadd.f32 %v2716_v12, %v2684_v48  ;;  %v8077_v48 = vrot.slane %v6608_v0, 2  ;;  %v8083_v0 = vld [vmem:[#allocation121_spill] sm:$0xff] }
 0x3a1   : > { %v2696_v36 = vpop.permute.xlu1 %2695  ;;  %v2694_v16 = vpop.permute.xlu0 %2693 }
 0x3a2   : > { %v2700_v47 = vadd.f32 %v2696_v36, %v2655_v11  ;;  %v2699_v7 = vadd.f32 %v2694_v16, %v2654_v49  ;;  %v8079_v36 = vld [vmem:[#allocation91_spill] sm:$0xff] }
 0x3a3   : > { %3217 = vrot.lane.b32.xlu1 %v8066_v22, %s3748_s29  ;;  %3215 = vrot.lane.b32.xlu0 %v8067_v38, %s3748_s29 }
 0x3a4   : > { %v2723_v15 = vadd.f32 %v2721_v19, %v2700_v47  ;;  %v2722_v1 = vadd.f32 %v2720_v13, %v2699_v7  ;;  %v8082_v47 = vrot.slane %v6656_v25, 1  ;;  %v8084_v13 = vld [vmem:[#allocation111_spill] sm:$0xff] }
 0x3a5   : > { %v2711_v39 = vpop.permute.xlu1 %2710  ;;  %v2709_v26 = vpop.permute.xlu0 %2708  ;;  %v8085_v38 = vrot.slane %v8084_v13, 2 }
 0x3a6   : > { %v2715_v53 = vadd.f32 %v2711_v39, %v2670_v57  ;;  %v2714_v59 = vadd.f32 %v2709_v26, %v2669_v30  ;;  %v8087_v39 = vld [vmem:[#allocation116_spill] sm:$0xff] }
 0x3a7   : > { %3232 = vrot.lane.b32.xlu1 %v8070_v45, %s3748_s29  ;;  %3230 = vrot.lane.b32.xlu0 %v8071_v44, %s3748_s29  ;;  %v8090_v45 = vld [vmem:[#allocation115_spill] sm:$0xff]  ;;  %v8092_v44 = vld [vmem:[#allocation118_spill] sm:$0xff] }
 0x3a8   : > { %v2727_v5 = vadd.f32 %v2725_v42, %v2715_v53  ;;  %v2726_v31 = vadd.f32 %v2724_v9, %v2714_v59  ;;  %v8091_v9 = vrot.slane %v8090_v45, 2 }
 0x3a9   : > { %v2735_v11 = vpop.permute.xlu1 %2734  ;;  %v2733_v60 = vpop.permute.xlu0 %2732 }
 0x3aa   : > { %v2739_v49 = vadd.f32 %v2735_v11, %v2719_v41  ;;  %v2738_v63 = vadd.f32 %v2733_v60, %v2718_v23  ;;  %v8080_v23 = vrot.slane %v8079_v36, 2  ;;  %v8095_v60 = vld [vmem:[#allocation124_spill] sm:$0xff] }
 0x3ab   : > { %3247 = vrot.lane.b32.xlu1 %v8073_v33, %s3748_s29  ;;  %3245 = vrot.lane.b32.xlu0 %v8074_v40, %s3748_s29 }
 0x3ad   : > { %v2747_v57 = vpop.permute.xlu1 %2746  ;;  %v2745_v30 = vpop.permute.xlu0 %2744 }
 0x3ae   : > { %v2751_v21 = vadd.f32 %v2747_v57, %v2723_v15  ;;  %v2750_v54 = vadd.f32 %v2745_v30, %v2722_v1  ;;  %v8086_v15 = vld [vmem:[#allocation114_spill] sm:$0xff]  ;;  %v8088_v1 = vrot.slane %v8087_v39, 1  ;;  %v8096_v57 = vld [vmem:[#allocation117_spill] sm:$0xff]  ;;  %v8098_v30 = vld [vmem:[#allocation123_spill] sm:$0xff] }
 0x3af   : > { %3295 = vrot.lane.b32.xlu1 %v8076_v58, %s3747_s22  ;;  %3293 = vrot.lane.b32.xlu0 %v6637_v6, %s3747_s22  ;;  %v8081_v6 = vld [vmem:[#allocation113_spill] sm:$0xff] }
 0x3b1   : > { %v2759_v18 = vpop.permute.xlu1 %2758  ;;  %v2757_v10 = vpop.permute.xlu0 %2756 }
 0x3b2   : > { %v2763_v24 = vadd.f32 %v2759_v18, %v2727_v5  ;;  %v2762_v52 = vadd.f32 %v2757_v10, %v2726_v31  ;;  %v8093_v5 = vld [vmem:[#allocation119_spill] sm:$0xff] }
 0x3b3   : > { %3310 = vrot.lane.b32.xlu1 %v8077_v48, %s3747_s22  ;;  %3308 = vrot.lane.b32.xlu0 %v8078_v32, %s3747_s22  ;;  %v8094_v11 = vrot.slane %v8093_v5, 1 }
 0x3b5   : > { %v2771_v55 = vpop.permute.xlu1 %2770  ;;  %v2769_v56 = vpop.permute.xlu0 %2768 }
 0x3b6   : > { %v2775_v12 = vadd.f32 %v2771_v55, %v2739_v49  ;;  %v2774_v41 = vadd.f32 %v2769_v56, %v2738_v63 }
 0x3b7   : > { %3325 = vrot.lane.b32.xlu1 %v8080_v23, %s3747_s22  ;;  %3323 = vrot.lane.b32.xlu0 %v8081_v6, %s3747_s22  ;;  %s3570_s22 = smul.u32 48, %s8123_s16 }
 0x3b8   : > { %v2810_v16 = vadd.f32 %v8082_v47, %v2775_v12  ;;  %v2809_v19 = vadd.f32 %v8083_v0, %v2774_v41  ;;  %v8099_v41 = vld [vmem:[#allocation120_spill] sm:$0xff]  ;;  %v8101_v47 = vld [vmem:[#allocation126_spill] sm:$0xff] }
 0x3b9   : > { %v2783_v14 = vpop.permute.xlu1 %2782  ;;  %v2781_v29 = vpop.permute.xlu0 %2780  ;;  %v8100_v36 = vrot.slane %v8099_v41, 2  ;;  %s217_s28 = scalar_lea.vmem %s7148_s3, %s3570_s22 }
 0x3ba   : > { %v2787_v7 = vadd.f32 %v2783_v14, %v2751_v21  ;;  %v2786_v22 = vadd.f32 %v2781_v29, %v2750_v54  ;;  %v8097_v21 = vrot.slane %v8096_v57, 2 }
 0x3bb   : > { %3340 = vrot.lane.b32.xlu1 %v8085_v38, %s3748_s29  ;;  %3338 = vrot.lane.b32.xlu0 %v8086_v15, %s3748_s29  ;;  %v8104_v38 = vld [vmem:[#allocation129_spill] sm:$0xff] }
 0x3bc   : > { %v2821_v53 = vadd.f32 %v8088_v1, %v2787_v7  ;;  %v2820_v25 = vadd.f32 %v8089_v4, %v2786_v22  ;;  %v8102_v7 = vld [vmem:[#allocation122_spill] sm:$0xff] }
 0x3bd   : > { %v2795_v26 = vpop.permute.xlu1 %2794  ;;  %v2793_v59 = vpop.permute.xlu0 %2792  ;;  %v8103_v29 = vrot.slane %v8102_v7, 2 }
 0x3be   : > { %v2799_v42 = vadd.f32 %v2795_v26, %v2763_v24  ;;  %v2798_v46 = vadd.f32 %v2793_v59, %v2762_v52  ;;  %v8105_v26 = vld [vmem:[#allocation128_spill] sm:$0xff]  ;;  %v8107_v59 = vld [vmem:[#allocation127_spill] sm:$0xff] }
 0x3bf   : > { %3355 = vrot.lane.b32.xlu1 %v8091_v9, %s3748_s29  ;;  %3353 = vrot.lane.b32.xlu0 %v8092_v44, %s3748_s29  ;;  %v8106_v4 = vrot.slane %v8105_v26, 2 }
 0x3c0   : > { %v2832_v31 = vadd.f32 %v8094_v11, %v2799_v42  ;;  %v2831_v63 = vadd.f32 %v8095_v60, %v2798_v46 }
 0x3c1   : > { %v2843_v49 = vpop.permute.xlu1 %2842  ;;  %v2841_v33 = vpop.permute.xlu0 %2840 }
 0x3c2   : > { %v2847_v3 = vadd.f32 %v2843_v49, %v2810_v16  ;;  %v2846_v40 = vadd.f32 %v2841_v33, %v2809_v19 }
 0x3c3   : > { %3370 = vrot.lane.b32.xlu1 %v8097_v21, %s3748_s29  ;;  %3368 = vrot.lane.b32.xlu0 %v8098_v30, %s3748_s29  ;;  %v8108_v30 = vld [vmem:[#allocation74_spill] sm:$0xff] }
 0x3c5   : > { %v2858_v54 = vpop.permute.xlu1 %2857  ;;  %v2856_v58 = vpop.permute.xlu0 %2855 }
 0x3c6   : > { %v2862_v17 = vadd.f32 %v2858_v54, %v2821_v53  ;;  %v2861_v18 = vadd.f32 %v2856_v58, %v2820_v25  ;;  %v3047_v54 = vmul.f32 %v6451_v8, %v8108_v30  ;;  %v3046_v58 = vmul.f32 %v6458_v37, %v8108_v30 }
 0x3c9   : > { %v2873_v24 = vpop.permute.xlu1 %2872  ;;  %v2871_v52 = vpop.permute.xlu0 %2870 }
 0x3ca   : > { %v2877_v10 = vadd.f32 %v2873_v24, %v2832_v31  ;;  %v2876_v48 = vadd.f32 %v2871_v52, %v2831_v63 }
 0x3cd   : > { %v2888_v32 = vpop.permute.xlu1 %2887  ;;  %v2886_v12 = vpop.permute.xlu0 %2885 }
 0x3ce   : > { %v2892_v55 = vadd.f32 %v2888_v32, %v2847_v3  ;;  %v2891_v56 = vadd.f32 %v2886_v12, %v2846_v40  ;;  %v8109_v32 = vld [vmem:[#allocation85_spill] sm:$0xff] }
 0x3d0   : > { %v2933_v23 = vadd.f32 %v8100_v36, %v2892_v55  ;;  %v2932_v16 = vadd.f32 %v8101_v47, %v2891_v56  ;;  %v3051_v55 = vmul.f32 %v6451_v8, %v8109_v32  ;;  %v3050_v56 = vmul.f32 %v6458_v37, %v8109_v32 }
 0x3d1   : > { %v2903_v6 = vpop.permute.xlu1 %2902  ;;  %v2901_v0 = vpop.permute.xlu0 %2900 }
 0x3d2   : > { %v2907_v14 = vadd.f32 %v2903_v6, %v2862_v17  ;;  %v2906_v19 = vadd.f32 %v2901_v0, %v2861_v18 }
 0x3d4   : > { %v2944_v22 = vadd.f32 %v8103_v29, %v2907_v14  ;;  %v2943_v15 = vadd.f32 %v8104_v38, %v2906_v19 }
 0x3d5   : > { %v2918_v13 = vpop.permute.xlu1 %2917  ;;  %v2916_v1 = vpop.permute.xlu0 %2915 }
 0x3d6   : > { %v2922_v39 = vadd.f32 %v2918_v13, %v2877_v10  ;;  %v2921_v53 = vadd.f32 %v2916_v1, %v2876_v48 }
 0x3d8   : > { %v2955_v25 = vadd.f32 %v8106_v4, %v2922_v39  ;;  %v2954_v46 = vadd.f32 %v8107_v59, %v2921_v53 }
 0x3d9   : > { %v2966_v42 = vpop.permute.xlu1 %2965  ;;  %v2964_v9 = vpop.permute.xlu0 %2963 }
 0x3da   : > { %v2970_v45 = vadd.f32 %v2966_v42, %v2933_v23  ;;  %v2969_v44 = vadd.f32 %v2964_v9, %v2932_v16  ;;  %v8110_v16 = vld [vmem:[#allocation89_spill] sm:$0xff] }
 0x3db   : > { %v3055_v14 = vmul.f32 %v6451_v8, %v8110_v16  ;;  %v3054_v19 = vmul.f32 %v6458_v37, %v8110_v16  ;;  %v8111_v8 = vrot.slane %v6772_v51, 1  ;;  %v8113_v51 = vld [vmem:[#allocation130_spill] sm:$0xff] }
 0x3dd   : > { %v2981_v5 = vpop.permute.xlu1 %2980  ;;  %v2979_v31 = vpop.permute.xlu0 %2978 }
 0x3de   : > { %v2985_v11 = vadd.f32 %v2981_v5, %v2944_v22  ;;  %v2984_v49 = vadd.f32 %v2979_v31, %v2943_v15 }
 0x3e1   : > { %v2996_v60 = vpop.permute.xlu1 %2995  ;;  %v2994_v3 = vpop.permute.xlu0 %2993 }
 0x3e2   : > { %v3000_v63 = vadd.f32 %v2996_v60, %v2955_v25  ;;  %v2999_v33 = vadd.f32 %v2994_v3, %v2954_v46  ;;  %v8112_v60 = vrot.slane %v6783_v28, 1 }
 0x3e5   : > { %v3011_v40 = vpop.permute.xlu1 %3010  ;;  %v3009_v21 = vpop.permute.xlu0 %3008 }
 0x3e6   : > { %v3015_v57 = vadd.f32 %v3011_v40, %v2970_v45  ;;  %v3014_v17 = vadd.f32 %v3009_v21, %v2969_v44 }
 0x3e8   : > { %v3049_v18 = vadd.f32 %v3047_v54, %v3015_v57  ;;  %v3048_v10 = vadd.f32 %v3046_v58, %v3014_v17  ;;  %v8114_v54 = vrot.slane %v8113_v51, 1 }
 0x3e9   : > { %v3026_v24 = vpop.permute.xlu1 %3025  ;;  %v3024_v48 = vpop.permute.xlu0 %3023 }
 0x3ea   : > { %v3030_v52 = vadd.f32 %v3026_v24, %v2985_v11  ;;  %v3029_v12 = vadd.f32 %v3024_v48, %v2984_v49 }
 0x3ec   : > { %v3053_v41 = vadd.f32 %v3051_v55, %v3030_v52  ;;  %v3052_v23 = vadd.f32 %v3050_v56, %v3029_v12 }
 0x3ed   : > { %v3041_v36 = vpop.permute.xlu1 %3040  ;;  %v3039_v47 = vpop.permute.xlu0 %3038 }
 0x3ee   : > { %v3045_v6 = vadd.f32 %v3041_v36, %v3000_v63  ;;  %v3044_v0 = vadd.f32 %v3039_v47, %v2999_v33 }
 0x3f0   : > { %v3057_v7 = vadd.f32 %v3055_v14, %v3045_v6  ;;  %v3056_v22 = vadd.f32 %v3054_v19, %v3044_v0 }
 0x3f1   : > { %v3065_v29 = vpop.permute.xlu1 %3064  ;;  %v3063_v13 = vpop.permute.xlu0 %3062 }
 0x3f2   : > { %v3069_v53 = vadd.f32 %v3065_v29, %v3049_v18  ;;  %v3068_v26 = vadd.f32 %v3063_v13, %v3048_v10  ;;  %v8115_v18 = vld [vmem:[#allocation131_spill] sm:$0xff] }
 0x3f5   : > { %v3077_v38 = vpop.permute.xlu1 %3076  ;;  %v3075_v15 = vpop.permute.xlu0 %3074 }
 0x3f6   : > { %v3081_v46 = vadd.f32 %v3077_v38, %v3053_v41  ;;  %v3080_v9 = vadd.f32 %v3075_v15, %v3052_v23  ;;  %v8116_v23 = vrot.slane %v6797_v50, 2 }
 0x3f9   : > { %v3089_v39 = vpop.permute.xlu1 %3088  ;;  %v3087_v1 = vpop.permute.xlu0 %3086 }
 0x3fa   : > { %v3093_v49 = vadd.f32 %v3089_v39, %v3057_v7  ;;  %v3092_v3 = vadd.f32 %v3087_v1, %v3056_v22  ;;  %v8117_v22 = vrot.slane %v6807_v61, 2 }
 0x3fd   : > { %v3101_v4 = vpop.permute.xlu1 %3100  ;;  %v3099_v42 = vpop.permute.xlu0 %3098 }
 0x3fe   : > { %v3105_v25 = vadd.f32 %v3101_v4, %v3069_v53  ;;  %v3104_v59 = vadd.f32 %v3099_v42, %v3068_v26 }
 0x400   : > { %v3140_v45 = vadd.f32 %v8111_v8, %v3105_v25  ;;  %v3139_v44 = vadd.f32 %v6812_v27, %v3104_v59 }
 0x401   : > { %v3113_v37 = vpop.permute.xlu1 %3112  ;;  %v3111_v11 = vpop.permute.xlu0 %3110 }
 0x402   : > { %v3117_v5 = vadd.f32 %v3113_v37, %v3081_v46  ;;  %v3116_v31 = vadd.f32 %v3111_v11, %v3080_v9 }
 0x404   : > { %v3151_v63 = vadd.f32 %v8112_v60, %v3117_v5  ;;  %v3150_v40 = vadd.f32 %v6817_v35, %v3116_v31 }
 0x405   : > { %v3125_v33 = vpop.permute.xlu1 %3124  ;;  %v3123_v21 = vpop.permute.xlu0 %3122 }
 0x406   : > { %v3129_v57 = vadd.f32 %v3125_v33, %v3093_v49  ;;  %v3128_v30 = vadd.f32 %v3123_v21, %v3092_v3 }
 0x408   : > { %v3162_v17 = vadd.f32 %v8114_v54, %v3129_v57  ;;  %v3161_v27 = vadd.f32 %v8115_v18, %v3128_v30 }
 0x409   : > { %v3173_v58 = vpop.permute.xlu1 %3172  ;;  %v3171_v24 = vpop.permute.xlu0 %3170 }
 0x40a   : > { %v3177_v28 = vadd.f32 %v3173_v58, %v3140_v45  ;;  %v3176_v55 = vadd.f32 %v3171_v24, %v3139_v44 }
 0x40d   : > { %v3188_v10 = vpop.permute.xlu1 %3187  ;;  %v3186_v52 = vpop.permute.xlu0 %3185 }
 0x40e   : > { %v3192_v36 = vadd.f32 %v3188_v10, %v3151_v63  ;;  %v3191_v47 = vadd.f32 %v3186_v52, %v3150_v40 }
 0x411   : > { %v3203_v48 = vpop.permute.xlu1 %3202  ;;  %v3201_v32 = vpop.permute.xlu0 %3200 }
 0x412   : > { %v3207_v29 = vadd.f32 %v3203_v48, %v3162_v17  ;;  %v3206_v38 = vadd.f32 %v3201_v32, %v3161_v27 }
 0x415   : > { %v3218_v12 = vpop.permute.xlu1 %3217  ;;  %v3216_v41 = vpop.permute.xlu0 %3215 }
 0x416   : > { %v3222_v56 = vadd.f32 %v3218_v12, %v3177_v28  ;;  %v3221_v35 = vadd.f32 %v3216_v41, %v3176_v55 }
 0x418   : > { %v3263_v6 = vadd.f32 %v8116_v23, %v3222_v56  ;;  %v3262_v14 = vadd.f32 %v6838_v20, %v3221_v35 }
 0x419   : > { %v3233_v16 = vpop.permute.xlu1 %3232  ;;  %v3231_v19 = vpop.permute.xlu0 %3230 }
 0x41a   : > { %v3237_v0 = vadd.f32 %v3233_v16, %v3192_v36  ;;  %v3236_v7 = vadd.f32 %v3231_v19, %v3191_v47 }
 0x41c   : > { %v3274_v13 = vadd.f32 %v8117_v22, %v3237_v0  ;;  %v3273_v39 = vadd.f32 %v6848_v2, %v3236_v7 }
 0x41d   : > { %v3248_v15 = vpop.permute.xlu1 %3247  ;;  %v3246_v50 = vpop.permute.xlu0 %3245 }
 0x41e   : > { %v3252_v1 = vadd.f32 %v3248_v15, %v3207_v29  ;;  %v3251_v53 = vadd.f32 %v3246_v50, %v3206_v38 }
 0x420   : > { %v3285_v26 = vadd.f32 %v3280_v62, %v3252_v1  ;;  %v3284_v20 = vadd.f32 %v6854_v34, %v3251_v53 }
 0x421   : > { %v3296_v4 = vpop.permute.xlu1 %3295  ;;  %v3294_v25 = vpop.permute.xlu0 %3293 }
 0x422   : > { %v3300_v8 = vadd.f32 %v3296_v4, %v3263_v6  ;;  %v3299_v45 = vadd.f32 %v3294_v25, %v3262_v14 }
 0x425   : > { %v3311_v42 = vpop.permute.xlu1 %3310  ;;  %v3309_v59 = vpop.permute.xlu0 %3308 }
 0x426   : > { %v3315_v9 = vadd.f32 %v3311_v42, %v3274_v13  ;;  %v3314_v37 = vadd.f32 %v3309_v59, %v3273_v39 }
 0x429   : > { %v3326_v61 = vpop.permute.xlu1 %3325  ;;  %v3324_v46 = vpop.permute.xlu0 %3323 }
 0x42a   : > { %v3330_v49 = vadd.f32 %v3326_v61, %v3285_v26  ;;  %v3329_v60 = vadd.f32 %v3324_v46, %v3284_v20 }
 0x42d   : > { %v3341_v2 = vpop.permute.xlu1 %3340  ;;  %v3339_v43 = vpop.permute.xlu0 %3338 }
 0x42e   : > { %v3345_v62 = vadd.f32 %v3341_v2, %v3300_v8  ;;  %v3344_v34 = vadd.f32 %v3339_v43, %v3299_v45 }
 0x430   : > { %3379 = vst.msk [vmem:[%s217_s28 + $0x8] sm:$0x3] %vm3378_vm2, %v3345_v62 }
 0x431   : > { %3377 = vst.msk [vmem:[%s217_s28] sm:$0xff] %vm3376_vm3, %v3344_v34  ;;  %v3356_v44 = vpop.permute.xlu1 %3355  ;;  %v3354_v11 = vpop.permute.xlu0 %3353 }
 0x432   : > { %v3360_v5 = vadd.f32 %v3356_v44, %v3315_v9  ;;  %v3359_v31 = vadd.f32 %v3354_v11, %v3314_v37 }
 0x434   : > { %3381 = vst.msk [vmem:[%s217_s28 + $0x18] sm:$0x3] %vm3378_vm2, %v3360_v5 }
 0x435   : > { %3380 = vst.msk [vmem:[%s217_s28 + $0x10] sm:$0xff] %vm3376_vm3, %v3359_v31  ;;  %v3371_v63 = vpop.permute.xlu1 %3370  ;;  %v3369_v33 = vpop.permute.xlu0 %3368 }
 0x436   : > { %v3375_v3 = vadd.f32 %v3371_v63, %v3330_v49  ;;  %v3374_v40 = vadd.f32 %v3369_v33, %v3329_v60 }
 0x438   : > { %3383 = vst.msk [vmem:[%s217_s28 + $0x28] sm:$0x3] %vm3378_vm2, %v3375_v3 }
 0x439   : > { %3382 = vst.msk [vmem:[%s217_s28 + $0x20] sm:$0xff] %vm3376_vm3, %v3374_v40 }
 0x43a PF: > { %p15_p11 = scmp.ge.s32.totalorder %s3791_s17, 4   ;;  %s8118_s12 = smov %s3732_s13 }
 0x43b   : > { %s8119_s13 = smov %s3736_s14  ;;  %s8120_s14 = smov %s3801_s20 }
 0x43c   : > { %s8121_s15 = smov %s3791_s17  ;;  %17 = sbr.rel (!%p15_p11) target bundleno = 5 (0x5), region = 81 }
 0x443   :  { %3405 = vsyncpa [#allocation3], 1 }
 0x444   :  { %3407 = vsyncpa [#allocation3 + $0x1], 1 }
 0x445   :  { %3408 = vsyncpa [#allocation4], 1 }
 0x446   :  { %3410 = vsyncpa [#allocation4 + $0x1], 1 }
 0x447   :  { %3411 = vsyncpa [#allocation6], 1 }

</bundles_post_ra>
